<compile_context>
chip_gen: v7x
topology: tpu7x:2x2x1
jax: 0.10.0
libtpu: 0.0.40
codegen_flags: <defaults>
</compile_context>

<pallas_src>
import functools
import math

import numpy as np
import jax
import jax.numpy as jnp
from jax import lax
from jax.experimental import pallas as pl
from jax.experimental.pallas import tpu as pltpu

# ----------------------------- hyper-params (small) -------------------------
D_EMB      = 16
D_QUERY    = 8
D_MODEL    = 32
D_PAIRWISE = 16
NHEAD      = 4
FFDIM      = 64
NLAYERS    = 2
FC_NLAYERS = 2

S    = 5                   # tokens per tree (before CLS)
B    = 6                   # flattened "batch" of tree instances
LENS = (2, 4)              # static grouping used by torch.split / pad_sequence

T  = S + 1                 # tokens including CLS
BT = B * T
G  = len(LENS)
L  = max(LENS)
DH = D_MODEL // NHEAD

SLAB_W = 128               # lane width of the packed parameter slab


# ============================ parameter initialization =======================
def init_linear(key, d_in, d_out):
    kw, kb = jax.random.split(key)
    bound = 1.0 / math.sqrt(d_in)
    w = jax.random.uniform(kw, (d_in, d_out), jnp.float32, -bound, bound)
    b = jax.random.uniform(kb, (1, d_out), jnp.float32, -bound, bound)
    return w, b


def init_fc(key, d_in, d_out, n_layers):
    # mirrors FC(): dims = linspace(d_in, d_out, n+1).long()
    dims = np.linspace(d_in, d_out, n_layers + 1).astype(np.int64)
    keys = jax.random.split(key, n_layers)
    params = []
    for i in range(n_layers - 1):
        w, b = init_linear(keys[i], int(dims[i]), int(dims[i + 1]))
        g = jnp.ones((1, int(dims[i + 1])), jnp.float32)
        beta = jnp.zeros((1, int(dims[i + 1])), jnp.float32)
        params.append((w, b, g, beta))
    wl, bl = init_linear(keys[-1], int(dims[-2]), d_out)
    params.append((wl, bl))
    return params


def init_transformer_layer(key, d_model, ffdim):
    k1, k2, k3, k4 = jax.random.split(key, 4)
    w_in, b_in = init_linear(k1, d_model, 3 * d_model)
    w_out, b_out = init_linear(k2, d_model, d_model)
    w1, b1 = init_linear(k3, d_model, ffdim)
    w2, b2 = init_linear(k4, ffdim, d_model)
    return dict(w_in=w_in, b_in=b_in, w_out=w_out, b_out=b_out,
                w1=w1, b1=b1, w2=w2, b2=b2,
                ln1_g=jnp.ones((1, d_model), jnp.float32),
                ln1_b=jnp.zeros((1, d_model), jnp.float32),
                ln2_g=jnp.ones((1, d_model), jnp.float32),
                ln2_b=jnp.zeros((1, d_model), jnp.float32))


def init_net(key):
    ks = jax.random.split(key, 6 + NLAYERS)
    d_q = D_MODEL // 2
    d_enc_out = (D_MODEL + 1) // 2
    cls_bound = math.sqrt(6.0 / (D_MODEL + D_MODEL))   # xavier_uniform
    return dict(
        qn=init_linear(ks[0], D_QUERY, d_q),
        enc=init_linear(ks[1], D_EMB, d_enc_out),
        cls=jax.random.uniform(ks[2], (1, D_MODEL), jnp.float32,
                               -cls_bound, cls_bound),
        key=init_fc(ks[3], D_MODEL, D_PAIRWISE, FC_NLAYERS),
        query=init_fc(ks[4], D_MODEL, D_PAIRWISE, FC_NLAYERS),
        val=init_fc(ks[5], D_MODEL, 1, FC_NLAYERS),
        layers=[init_transformer_layer(ks[6 + i], D_MODEL, FFDIM)
                for i in range(NLAYERS)],
    )


# ========================= host-side parameter packing =======================
def pack_params(params):
    """Pack every weight/bias + all static constants into one (rows,128) f32
    slab.  Per-head q/k/v/out projections are pre-split, 1/sqrt(DH) is folded
    into w_q/b_q, 1/sqrt(d_pairwise) into the query head's last linear, and
    the additive block-diagonal mask / selection matrices are stored as
    constants so the kernel never constructs them."""
    entries = []

    def add(name, arr):
        arr = jnp.asarray(arr, jnp.float32)
        if arr.ndim == 1:
            arr = arr.reshape(1, -1)
        entries.append((name, arr))

    add('qn_w', params['qn'][0]);   add('qn_b', params['qn'][1])
    add('enc_w', params['enc'][0]); add('enc_b', params['enc'][1])
    add('cls', params['cls'])

    head_scale = 1.0 / math.sqrt(DH)
    for l, lp in enumerate(params['layers']):
        w_in, b_in, w_out = lp['w_in'], lp['b_in'], lp['w_out']
        for h in range(NHEAD):
            lo, hi = h * DH, (h + 1) * DH
            add(f'l{l}h{h}_wq', w_in[:, lo:hi] * head_scale)
            add(f'l{l}h{h}_bq', b_in[:, lo:hi] * head_scale)
            add(f'l{l}h{h}_wk', w_in[:, D_MODEL + lo:D_MODEL + hi])
            add(f'l{l}h{h}_bk', b_in[:, D_MODEL + lo:D_MODEL + hi])
            add(f'l{l}h{h}_wv', w_in[:, 2 * D_MODEL + lo:2 * D_MODEL + hi])
            add(f'l{l}h{h}_bv', b_in[:, 2 * D_MODEL + lo:2 * D_MODEL + hi])
            add(f'l{l}h{h}_wo', w_out[lo:hi, :])
        add(f'l{l}_bo', lp['b_out'])
        add(f'l{l}_w1', lp['w1']); add(f'l{l}_b1', lp['b1'])
        add(f'l{l}_w2', lp['w2']); add(f'l{l}_b2', lp['b2'])
        add(f'l{l}_ln1g', lp['ln1_g']); add(f'l{l}_ln1b', lp['ln1_b'])
        add(f'l{l}_ln2g', lp['ln2_g']); add(f'l{l}_ln2b', lp['ln2_b'])

    def add_fc(prefix, fcp, out_scale=1.0):
        for i, (w, b, g, beta) in enumerate(fcp[:-1]):
            add(f'{prefix}_l{i}_w', w);  add(f'{prefix}_l{i}_b', b)
            add(f'{prefix}_l{i}_g', g);  add(f'{prefix}_l{i}_beta', beta)
        wl, bl = fcp[-1]
        add(f'{prefix}_wl', wl * out_scale)
        add(f'{prefix}_bl', bl * out_scale)

    add_fc('key', params['key'])
    add_fc('query', params['query'], out_scale=1.0 / math.sqrt(D_PAIRWISE))
    add_fc('val', params['val'])

    # --- static constants ----------------------------------------------------
    # additive attention mask (CLS-first token layout): token i belongs to tree
    #   i            if i < B   (CLS tokens)
    #   (i - B)//S   otherwise  (body tokens)
    grp = np.array([i if i < B else (i - B) // S for i in range(BT)], np.int64)
    add('mask', np.where(grp[:, None] == grp[None, :], 0.0, -1e30))

    # q-repeat selection matrix: row b*S+s selects q row b
    expand = np.zeros((B * S, B), np.float32)
    for b in range(B):
        expand[b * S:(b + 1) * S, b] = 1.0
    add('expand', expand)

    # torch.split(x[0], lens) + pad_sequence(batch_first=True) as one matmul
    padm = np.zeros((G * L, B), np.float32)
    off = 0
    for g, ln in enumerate(LENS):
        for r in range(ln):
            padm[g * L + r, off + r] = 1.0
        off += ln
    add('pad', padm)

    # torch.mean(x, 1) over the PADDED tensor (divide by L) — matches reference
    avgm = np.zeros((G, G * L), np.float32)
    for g in range(G):
        avgm[g, g * L:(g + 1) * L] = 1.0 / L
    add('avg', avgm)

    # --- build the slab (each entry 8-row aligned, 128-lane wide) -------------
    layout = {}
    chunks = []
    row = 0
    for name, arr in entries:
        r, c = arr.shape
        layout[name] = (row, r, c)
        rp = ((r + 7) // 8) * 8
        chunks.append(jnp.pad(arr, ((0, rp - r), (0, SLAB_W - c))))
        row += rp
    slab = jnp.concatenate(chunks, axis=0)
    return slab, layout


# ============================== fused Pallas kernel ==========================
def _fused_net_kernel(q_ref, x_ref, slab_ref, p_out_ref, v_out_ref, *, layout):
    def get(name):
        off, r, c = layout[name]
        return slab_ref[off:off + r, :c]        # load at point of use

    def mm(a, b):
        return jnp.dot(a, b, preferred_element_type=jnp.float32)

    def dot_nt(a, b):       # a @ b.T without an explicit transpose (MXU-native)
        return lax.dot_general(a, b, (((1,), (1,)), ((), ())),
                               preferred_element_type=jnp.float32)

    def layernorm(x, g, b, relu=False):
        mu = jnp.mean(x, axis=-1, keepdims=True)
        var = jnp.mean((x - mu) ** 2, axis=-1, keepdims=True)
        y = (x - mu) * lax.rsqrt(var + 1e-5) * g + b
        return jnp.maximum(y, 0.0) if relu else y

    def fc(prefix, x):      # FC(): [Linear, Dropout(id), LayerNorm, ReLU]*(n-1)+Linear
        for i in range(FC_NLAYERS - 1):
            x = layernorm(mm(x, get(f'{prefix}_l{i}_w')) + get(f'{prefix}_l{i}_b'),
                          get(f'{prefix}_l{i}_g'), get(f'{prefix}_l{i}_beta'),
                          relu=True)
        return mm(x, get(f'{prefix}_wl')) + get(f'{prefix}_bl')

    # qn / enc projections
    qp = mm(q_ref[...], get('qn_w')) + get('qn_b')      # (B, D_MODEL//2)
    xe = mm(x_ref[...], get('enc_w')) + get('enc_b')    # (B*S, (D_MODEL+1)//2)

    # Token matrix, CLS-first layout: rows 0..B-1 = CLS tokens, row B + b*S + s
    # = body token s of tree b.  q is repeated per token by a constant matmul.
    body = jnp.concatenate([xe, mm(get('expand'), qp)], axis=-1)       # (B*S, 32)
    x2 = jnp.concatenate(
        [jnp.broadcast_to(get('cls'), (B, D_MODEL)), body], axis=0)    # (BT, 32)

    mask_bias = get('mask')     # (BT, BT): 0 within a tree, -1e30 across trees

    # TODO(synk): TreeTransformerEncoderLayer is not provided; a standard
    # post-norm encoder layer (MHA + ReLU-FFN) is used and `indices` is ignored.
    for l in range(NLAYERS):
        attn = None
        for h in range(NHEAD):
            pfx = f'l{l}h{h}'
            qh = mm(x2, get(pfx + '_wq')) + get(pfx + '_bq')   # 1/sqrt(DH) folded
            kh = mm(x2, get(pfx + '_wk')) + get(pfx + '_bk')
            vh = mm(x2, get(pfx + '_wv')) + get(pfx + '_bv')
            s = dot_nt(qh, kh) + mask_bias                     # (BT, BT)
            e = jnp.exp(s - jnp.max(s, axis=-1, keepdims=True))
            w = e * pl.reciprocal(jnp.sum(e, axis=-1, keepdims=True), approx=True)
            contrib = mm(mm(w, vh), get(pfx + '_wo'))          # head-fold into out proj
            attn = contrib if attn is None else attn + contrib
        attn = attn + get(f'l{l}_bo')
        x2 = layernorm(x2 + attn, get(f'l{l}_ln1g'), get(f'l{l}_ln1b'))
        ff = jnp.maximum(mm(x2, get(f'l{l}_w1')) + get(f'l{l}_b1'), 0.0)
        ff = mm(ff, get(f'l{l}_w2')) + get(f'l{l}_b2')
        x2 = layernorm(x2 + ff, get(f'l{l}_ln2g'), get(f'l{l}_ln2b'))

    x0 = x2[:B, :]               # CLS outputs: contiguous slice       (B, 32)
    xp = mm(get('pad'), x0)      # split + pad_sequence                (G*L, 32)
    xm = mm(get('avg'), xp)      # mean over padded rows               (G, 32)

    v_out_ref[...] = fc('val', xm)                                   # (G, 1)
    kf = fc('key', xp)                                               # (G*L, DP)
    qf = fc('query', xp)                                             # (G*L, DP), /sqrt(DP) folded
    for g in range(G):           # P = k @ q^T per group, written directly
        p_out_ref[g * L:(g + 1) * L, :] = dot_nt(kf[g * L:(g + 1) * L, :],
                                                 qf[g * L:(g + 1) * L, :])


# ================================ forward pass ===============================
def make_forward(layout):
    kernel = functools.partial(_fused_net_kernel, layout=layout)
    vmem = pl.BlockSpec(memory_space=pltpu.MemorySpace.VMEM)

    @jax.jit
    def forward(slab, q_in, x_in):
        """slab: packed params; q_in: (B, d_query); x_in: (S, B, d_emb)."""
        # sequence-first -> batch-first flattened rows (b*S + s)
        xt = jnp.transpose(x_in, (1, 0, 2)).reshape(B * S, D_EMB)
        P2, V = pl.pallas_call(
            kernel,
            out_shape=(jax.ShapeDtypeStruct((G * L, L), jnp.float32),
                       jax.ShapeDtypeStruct((G, 1), jnp.float32)),
            in_specs=[vmem, vmem, vmem],      # q, x, packed slab (one DMA each)
            out_specs=(vmem, vmem),
        )(q_in, xt, slab)
        return P2.reshape(G, L, L), V

    return forward


# ==================================== main ===================================
if __name__ == "__main__":
    root = jax.random.PRNGKey(0)
    k_par, k_q, k_x = jax.random.split(root, 3)

    params = init_net(k_par)
    slab, layout = pack_params(params)          # one-time host-side packing
    slab = jax.block_until_ready(slab)
    forward = make_forward(layout)

    q_in = jax.random.normal(k_q, (B, D_QUERY), jnp.float32)
    x_in = jax.random.normal(k_x, (S, B, D_EMB), jnp.float32)
    # `indices` (tree structure) is unused by the standard encoder-layer stand-in.

    P, V = forward(slab, q_in, x_in)
    P = jax.block_until_ready(P)
    V = jax.block_until_ready(V)

    assert P.shape == (G, L, L), P.shape
    assert V.shape == (G, 1), V.shape
    assert bool(jnp.all(jnp.isfinite(P))) and bool(jnp.all(jnp.isfinite(V)))
    print("KERNEL_OK")
</pallas_src>

<mosaic_0001>
module attributes {stable_mosaic.version = 11 : i64} {
  func.func @_fused_net_kernel(%arg0: memref<6x8xf32, #tpu.memory_space<vmem>>, %arg1: memref<30x16xf32, #tpu.memory_space<vmem>>, %arg2: memref<1720x128xf32, #tpu.memory_space<vmem>>, %arg3: memref<8x4xf32, #tpu.memory_space<vmem>>, %arg4: memref<2x1xf32, #tpu.memory_space<vmem>>) attributes {dimension_semantics = [], scalar_prefetch = 0 : i64, scratch_operands = 0 : i64, tpu.core_type = #tpu.core_type<tc>} {
    %c0 = arith.constant 0 : index
    %c0_0 = arith.constant 0 : index
    %0 = vector.load %arg0[%c0, %c0_0] : memref<6x8xf32, #tpu.memory_space<vmem>>, vector<6x8xf32>
    %c0_1 = arith.constant 0 : index
    %c0_2 = arith.constant 0 : index
    %1 = vector.load %arg2[%c0_1, %c0_2] : memref<1720x128xf32, #tpu.memory_space<vmem>>, vector<8x16xf32>
    %cst = arith.constant dense<0.000000e+00> : vector<6x16xf32>
    %2 = tpu.matmul %0, %1, %cst {dimension_numbers = #tpu.dot_dimension_numbers<[1], [0], [0], [1], [0, 0, 1, 1], [], []>} : vector<6x8xf32>, vector<8x16xf32>, vector<6x16xf32> -> vector<6x16xf32>
    %c8 = arith.constant 8 : index
    %c0_3 = arith.constant 0 : index
    %3 = vector.load %arg2[%c8, %c0_3] : memref<1720x128xf32, #tpu.memory_space<vmem>>, vector<1x16xf32>
    %4 = vector.broadcast %3 : vector<1x16xf32> to vector<6x16xf32>
    %5 = arith.addf %2, %4 : vector<6x16xf32>
    %c0_4 = arith.constant 0 : index
    %c0_5 = arith.constant 0 : index
    %6 = vector.load %arg1[%c0_4, %c0_5] : memref<30x16xf32, #tpu.memory_space<vmem>>, vector<30x16xf32>
    %c16 = arith.constant 16 : index
    %c0_6 = arith.constant 0 : index
    %7 = vector.load %arg2[%c16, %c0_6] : memref<1720x128xf32, #tpu.memory_space<vmem>>, vector<16x16xf32>
    %cst_7 = arith.constant dense<0.000000e+00> : vector<30x16xf32>
    %8 = tpu.matmul %6, %7, %cst_7 {dimension_numbers = #tpu.dot_dimension_numbers<[1], [0], [0], [1], [0, 0, 1, 1], [], []>} : vector<30x16xf32>, vector<16x16xf32>, vector<30x16xf32> -> vector<30x16xf32>
    %c32 = arith.constant 32 : index
    %c0_8 = arith.constant 0 : index
    %9 = vector.load %arg2[%c32, %c0_8] : memref<1720x128xf32, #tpu.memory_space<vmem>>, vector<1x16xf32>
    %10 = vector.broadcast %9 : vector<1x16xf32> to vector<30x16xf32>
    %11 = arith.addf %8, %10 : vector<30x16xf32>
    %c1672 = arith.constant 1672 : index
    %c0_9 = arith.constant 0 : index
    %12 = vector.load %arg2[%c1672, %c0_9] : memref<1720x128xf32, #tpu.memory_space<vmem>>, vector<30x6xf32>
    %cst_10 = arith.constant dense<0.000000e+00> : vector<30x16xf32>
    %13 = tpu.matmul %12, %5, %cst_10 {dimension_numbers = #tpu.dot_dimension_numbers<[1], [0], [0], [1], [0, 0, 1, 1], [], []>} : vector<30x6xf32>, vector<6x16xf32>, vector<30x16xf32> -> vector<30x16xf32>
    %14 = tpu.concatenate %11, %13 in 1 : vector<30x16xf32>, vector<30x16xf32> -> vector<30x32xf32>
    %c40 = arith.constant 40 : index
    %c0_11 = arith.constant 0 : index
    %15 = vector.load %arg2[%c40, %c0_11] : memref<1720x128xf32, #tpu.memory_space<vmem>>, vector<1x32xf32>
    %16 = vector.shape_cast %15 : vector<1x32xf32> to vector<1x32xf32>
    %17 = vector.broadcast %16 : vector<1x32xf32> to vector<6x32xf32>
    %18 = tpu.concatenate %17, %14 in 0 : vector<6x32xf32>, vector<30x32xf32> -> vector<36x32xf32>
    %c1632 = arith.constant 1632 : index
    %c0_12 = arith.constant 0 : index
    %19 = vector.load %arg2[%c1632, %c0_12] : memref<1720x128xf32, #tpu.memory_space<vmem>>, vector<36x36xf32>
    %c48 = arith.constant 48 : index
    %c0_13 = arith.constant 0 : index
    %20 = vector.load %arg2[%c48, %c0_13] : memref<1720x128xf32, #tpu.memory_space<vmem>>, vector<32x8xf32>
    %cst_14 = arith.constant dense<0.000000e+00> : vector<36x8xf32>
    %21 = tpu.matmul %18, %20, %cst_14 {dimension_numbers = #tpu.dot_dimension_numbers<[1], [0], [0], [1], [0, 0, 1, 1], [], []>} : vector<36x32xf32>, vector<32x8xf32>, vector<36x8xf32> -> vector<36x8xf32>
    %c80 = arith.constant 80 : index
    %c0_15 = arith.constant 0 : index
    %22 = vector.load %arg2[%c80, %c0_15] : memref<1720x128xf32, #tpu.memory_space<vmem>>, vector<1x8xf32>
    %23 = vector.broadcast %22 : vector<1x8xf32> to vector<36x8xf32>
    %24 = arith.addf %21, %23 : vector<36x8xf32>
    %c88 = arith.constant 88 : index
    %c0_16 = arith.constant 0 : index
    %25 = vector.load %arg2[%c88, %c0_16] : memref<1720x128xf32, #tpu.memory_space<vmem>>, vector<32x8xf32>
    %cst_17 = arith.constant dense<0.000000e+00> : vector<36x8xf32>
    %26 = tpu.matmul %18, %25, %cst_17 {dimension_numbers = #tpu.dot_dimension_numbers<[1], [0], [0], [1], [0, 0, 1, 1], [], []>} : vector<36x32xf32>, vector<32x8xf32>, vector<36x8xf32> -> vector<36x8xf32>
    %c120 = arith.constant 120 : index
    %c0_18 = arith.constant 0 : index
    %27 = vector.load %arg2[%c120, %c0_18] : memref<1720x128xf32, #tpu.memory_space<vmem>>, vector<1x8xf32>
    %28 = vector.broadcast %27 : vector<1x8xf32> to vector<36x8xf32>
    %29 = arith.addf %26, %28 : vector<36x8xf32>
    %c128 = arith.constant 128 : index
    %c0_19 = arith.constant 0 : index
    %30 = vector.load %arg2[%c128, %c0_19] : memref<1720x128xf32, #tpu.memory_space<vmem>>, vector<32x8xf32>
    %cst_20 = arith.constant dense<0.000000e+00> : vector<36x8xf32>
    %31 = tpu.matmul %18, %30, %cst_20 {dimension_numbers = #tpu.dot_dimension_numbers<[1], [0], [0], [1], [0, 0, 1, 1], [], []>} : vector<36x32xf32>, vector<32x8xf32>, vector<36x8xf32> -> vector<36x8xf32>
    %c160 = arith.constant 160 : index
    %c0_21 = arith.constant 0 : index
    %32 = vector.load %arg2[%c160, %c0_21] : memref<1720x128xf32, #tpu.memory_space<vmem>>, vector<1x8xf32>
    %33 = vector.broadcast %32 : vector<1x8xf32> to vector<36x8xf32>
    %34 = arith.addf %31, %33 : vector<36x8xf32>
    %cst_22 = arith.constant dense<0.000000e+00> : vector<36x36xf32>
    %35 = tpu.matmul %24, %29, %cst_22 {dimension_numbers = #tpu.dot_dimension_numbers<[1], [1], [0], [0], [0, 0, 1, 0], [], []>} : vector<36x8xf32>, vector<36x8xf32>, vector<36x36xf32> -> vector<36x36xf32>
    %36 = arith.addf %35, %19 : vector<36x36xf32>
    %cst_23 = arith.constant dense<0xFF800000> : vector<36xf32>
    %37 = vector.multi_reduction <maximumf>, %36, %cst_23 [1] : vector<36x36xf32> to vector<36xf32>
    %38 = vector.shape_cast %37 : vector<36xf32> to vector<36x1xf32>
    %39 = vector.broadcast %38 : vector<36x1xf32> to vector<36x36xf32>
    %40 = arith.subf %36, %39 : vector<36x36xf32>
    %41 = math.exp %40 : vector<36x36xf32>
    %cst_24 = arith.constant dense<0.000000e+00> : vector<36xf32>
    %42 = vector.multi_reduction <add>, %41, %cst_24 [1] : vector<36x36xf32> to vector<36xf32>
    %43 = vector.shape_cast %42 : vector<36xf32> to vector<36x1xf32>
    %44 = tpu.reciprocal %43 {approx = true} : vector<36x1xf32> -> vector<36x1xf32>
    %45 = vector.broadcast %44 : vector<36x1xf32> to vector<36x36xf32>
    %46 = arith.mulf %41, %45 : vector<36x36xf32>
    %cst_25 = arith.constant dense<0.000000e+00> : vector<36x8xf32>
    %47 = tpu.matmul %46, %34, %cst_25 {dimension_numbers = #tpu.dot_dimension_numbers<[1], [0], [0], [1], [0, 0, 1, 1], [], []>} : vector<36x36xf32>, vector<36x8xf32>, vector<36x8xf32> -> vector<36x8xf32>
    %c168 = arith.constant 168 : index
    %c0_26 = arith.constant 0 : index
    %48 = vector.load %arg2[%c168, %c0_26] : memref<1720x128xf32, #tpu.memory_space<vmem>>, vector<8x32xf32>
    %cst_27 = arith.constant dense<0.000000e+00> : vector<36x32xf32>
    %49 = tpu.matmul %47, %48, %cst_27 {dimension_numbers = #tpu.dot_dimension_numbers<[1], [0], [0], [1], [0, 0, 1, 1], [], []>} : vector<36x8xf32>, vector<8x32xf32>, vector<36x32xf32> -> vector<36x32xf32>
    %c176 = arith.constant 176 : index
    %c0_28 = arith.constant 0 : index
    %50 = vector.load %arg2[%c176, %c0_28] : memref<1720x128xf32, #tpu.memory_space<vmem>>, vector<32x8xf32>
    %cst_29 = arith.constant dense<0.000000e+00> : vector<36x8xf32>
    %51 = tpu.matmul %18, %50, %cst_29 {dimension_numbers = #tpu.dot_dimension_numbers<[1], [0], [0], [1], [0, 0, 1, 1], [], []>} : vector<36x32xf32>, vector<32x8xf32>, vector<36x8xf32> -> vector<36x8xf32>
    %c208 = arith.constant 208 : index
    %c0_30 = arith.constant 0 : index
    %52 = vector.load %arg2[%c208, %c0_30] : memref<1720x128xf32, #tpu.memory_space<vmem>>, vector<1x8xf32>
    %53 = vector.broadcast %52 : vector<1x8xf32> to vector<36x8xf32>
    %54 = arith.addf %51, %53 : vector<36x8xf32>
    %c216 = arith.constant 216 : index
    %c0_31 = arith.constant 0 : index
    %55 = vector.load %arg2[%c216, %c0_31] : memref<1720x128xf32, #tpu.memory_space<vmem>>, vector<32x8xf32>
    %cst_32 = arith.constant dense<0.000000e+00> : vector<36x8xf32>
    %56 = tpu.matmul %18, %55, %cst_32 {dimension_numbers = #tpu.dot_dimension_numbers<[1], [0], [0], [1], [0, 0, 1, 1], [], []>} : vector<36x32xf32>, vector<32x8xf32>, vector<36x8xf32> -> vector<36x8xf32>
    %c248 = arith.constant 248 : index
    %c0_33 = arith.constant 0 : index
    %57 = vector.load %arg2[%c248, %c0_33] : memref<1720x128xf32, #tpu.memory_space<vmem>>, vector<1x8xf32>
    %58 = vector.broadcast %57 : vector<1x8xf32> to vector<36x8xf32>
    %59 = arith.addf %56, %58 : vector<36x8xf32>
    %c256 = arith.constant 256 : index
    %c0_34 = arith.constant 0 : index
    %60 = vector.load %arg2[%c256, %c0_34] : memref<1720x128xf32, #tpu.memory_space<vmem>>, vector<32x8xf32>
    %cst_35 = arith.constant dense<0.000000e+00> : vector<36x8xf32>
    %61 = tpu.matmul %18, %60, %cst_35 {dimension_numbers = #tpu.dot_dimension_numbers<[1], [0], [0], [1], [0, 0, 1, 1], [], []>} : vector<36x32xf32>, vector<32x8xf32>, vector<36x8xf32> -> vector<36x8xf32>
    %c288 = arith.constant 288 : index
    %c0_36 = arith.constant 0 : index
    %62 = vector.load %arg2[%c288, %c0_36] : memref<1720x128xf32, #tpu.memory_space<vmem>>, vector<1x8xf32>
    %63 = vector.broadcast %62 : vector<1x8xf32> to vector<36x8xf32>
    %64 = arith.addf %61, %63 : vector<36x8xf32>
    %cst_37 = arith.constant dense<0.000000e+00> : vector<36x36xf32>
    %65 = tpu.matmul %54, %59, %cst_37 {dimension_numbers = #tpu.dot_dimension_numbers<[1], [1], [0], [0], [0, 0, 1, 0], [], []>} : vector<36x8xf32>, vector<36x8xf32>, vector<36x36xf32> -> vector<36x36xf32>
    %66 = arith.addf %65, %19 : vector<36x36xf32>
    %cst_38 = arith.constant dense<0xFF800000> : vector<36xf32>
    %67 = vector.multi_reduction <maximumf>, %66, %cst_38 [1] : vector<36x36xf32> to vector<36xf32>
    %68 = vector.shape_cast %67 : vector<36xf32> to vector<36x1xf32>
    %69 = vector.broadcast %68 : vector<36x1xf32> to vector<36x36xf32>
    %70 = arith.subf %66, %69 : vector<36x36xf32>
    %71 = math.exp %70 : vector<36x36xf32>
    %cst_39 = arith.constant dense<0.000000e+00> : vector<36xf32>
    %72 = vector.multi_reduction <add>, %71, %cst_39 [1] : vector<36x36xf32> to vector<36xf32>
    %73 = vector.shape_cast %72 : vector<36xf32> to vector<36x1xf32>
    %74 = tpu.reciprocal %73 {approx = true} : vector<36x1xf32> -> vector<36x1xf32>
    %75 = vector.broadcast %74 : vector<36x1xf32> to vector<36x36xf32>
    %76 = arith.mulf %71, %75 : vector<36x36xf32>
    %cst_40 = arith.constant dense<0.000000e+00> : vector<36x8xf32>
    %77 = tpu.matmul %76, %64, %cst_40 {dimension_numbers = #tpu.dot_dimension_numbers<[1], [0], [0], [1], [0, 0, 1, 1], [], []>} : vector<36x36xf32>, vector<36x8xf32>, vector<36x8xf32> -> vector<36x8xf32>
    %c296 = arith.constant 296 : index
    %c0_41 = arith.constant 0 : index
    %78 = vector.load %arg2[%c296, %c0_41] : memref<1720x128xf32, #tpu.memory_space<vmem>>, vector<8x32xf32>
    %cst_42 = arith.constant dense<0.000000e+00> : vector<36x32xf32>
    %79 = tpu.matmul %77, %78, %cst_42 {dimension_numbers = #tpu.dot_dimension_numbers<[1], [0], [0], [1], [0, 0, 1, 1], [], []>} : vector<36x8xf32>, vector<8x32xf32>, vector<36x32xf32> -> vector<36x32xf32>
    %80 = arith.addf %49, %79 : vector<36x32xf32>
    %c304 = arith.constant 304 : index
    %c0_43 = arith.constant 0 : index
    %81 = vector.load %arg2[%c304, %c0_43] : memref<1720x128xf32, #tpu.memory_space<vmem>>, vector<32x8xf32>
    %cst_44 = arith.constant dense<0.000000e+00> : vector<36x8xf32>
    %82 = tpu.matmul %18, %81, %cst_44 {dimension_numbers = #tpu.dot_dimension_numbers<[1], [0], [0], [1], [0, 0, 1, 1], [], []>} : vector<36x32xf32>, vector<32x8xf32>, vector<36x8xf32> -> vector<36x8xf32>
    %c336 = arith.constant 336 : index
    %c0_45 = arith.constant 0 : index
    %83 = vector.load %arg2[%c336, %c0_45] : memref<1720x128xf32, #tpu.memory_space<vmem>>, vector<1x8xf32>
    %84 = vector.broadcast %83 : vector<1x8xf32> to vector<36x8xf32>
    %85 = arith.addf %82, %84 : vector<36x8xf32>
    %c344 = arith.constant 344 : index
    %c0_46 = arith.constant 0 : index
    %86 = vector.load %arg2[%c344, %c0_46] : memref<1720x128xf32, #tpu.memory_space<vmem>>, vector<32x8xf32>
    %cst_47 = arith.constant dense<0.000000e+00> : vector<36x8xf32>
    %87 = tpu.matmul %18, %86, %cst_47 {dimension_numbers = #tpu.dot_dimension_numbers<[1], [0], [0], [1], [0, 0, 1, 1], [], []>} : vector<36x32xf32>, vector<32x8xf32>, vector<36x8xf32> -> vector<36x8xf32>
    %c376 = arith.constant 376 : index
    %c0_48 = arith.constant 0 : index
    %88 = vector.load %arg2[%c376, %c0_48] : memref<1720x128xf32, #tpu.memory_space<vmem>>, vector<1x8xf32>
    %89 = vector.broadcast %88 : vector<1x8xf32> to vector<36x8xf32>
    %90 = arith.addf %87, %89 : vector<36x8xf32>
    %c384 = arith.constant 384 : index
    %c0_49 = arith.constant 0 : index
    %91 = vector.load %arg2[%c384, %c0_49] : memref<1720x128xf32, #tpu.memory_space<vmem>>, vector<32x8xf32>
    %cst_50 = arith.constant dense<0.000000e+00> : vector<36x8xf32>
    %92 = tpu.matmul %18, %91, %cst_50 {dimension_numbers = #tpu.dot_dimension_numbers<[1], [0], [0], [1], [0, 0, 1, 1], [], []>} : vector<36x32xf32>, vector<32x8xf32>, vector<36x8xf32> -> vector<36x8xf32>
    %c416 = arith.constant 416 : index
    %c0_51 = arith.constant 0 : index
    %93 = vector.load %arg2[%c416, %c0_51] : memref<1720x128xf32, #tpu.memory_space<vmem>>, vector<1x8xf32>
    %94 = vector.broadcast %93 : vector<1x8xf32> to vector<36x8xf32>
    %95 = arith.addf %92, %94 : vector<36x8xf32>
    %cst_52 = arith.constant dense<0.000000e+00> : vector<36x36xf32>
    %96 = tpu.matmul %85, %90, %cst_52 {dimension_numbers = #tpu.dot_dimension_numbers<[1], [1], [0], [0], [0, 0, 1, 0], [], []>} : vector<36x8xf32>, vector<36x8xf32>, vector<36x36xf32> -> vector<36x36xf32>
    %97 = arith.addf %96, %19 : vector<36x36xf32>
    %cst_53 = arith.constant dense<0xFF800000> : vector<36xf32>
    %98 = vector.multi_reduction <maximumf>, %97, %cst_53 [1] : vector<36x36xf32> to vector<36xf32>
    %99 = vector.shape_cast %98 : vector<36xf32> to vector<36x1xf32>
    %100 = vector.broadcast %99 : vector<36x1xf32> to vector<36x36xf32>
    %101 = arith.subf %97, %100 : vector<36x36xf32>
    %102 = math.exp %101 : vector<36x36xf32>
    %cst_54 = arith.constant dense<0.000000e+00> : vector<36xf32>
    %103 = vector.multi_reduction <add>, %102, %cst_54 [1] : vector<36x36xf32> to vector<36xf32>
    %104 = vector.shape_cast %103 : vector<36xf32> to vector<36x1xf32>
    %105 = tpu.reciprocal %104 {approx = true} : vector<36x1xf32> -> vector<36x1xf32>
    %106 = vector.broadcast %105 : vector<36x1xf32> to vector<36x36xf32>
    %107 = arith.mulf %102, %106 : vector<36x36xf32>
    %cst_55 = arith.constant dense<0.000000e+00> : vector<36x8xf32>
    %108 = tpu.matmul %107, %95, %cst_55 {dimension_numbers = #tpu.dot_dimension_numbers<[1], [0], [0], [1], [0, 0, 1, 1], [], []>} : vector<36x36xf32>, vector<36x8xf32>, vector<36x8xf32> -> vector<36x8xf32>
    %c424 = arith.constant 424 : index
    %c0_56 = arith.constant 0 : index
    %109 = vector.load %arg2[%c424, %c0_56] : memref<1720x128xf32, #tpu.memory_space<vmem>>, vector<8x32xf32>
    %cst_57 = arith.constant dense<0.000000e+00> : vector<36x32xf32>
    %110 = tpu.matmul %108, %109, %cst_57 {dimension_numbers = #tpu.dot_dimension_numbers<[1], [0], [0], [1], [0, 0, 1, 1], [], []>} : vector<36x8xf32>, vector<8x32xf32>, vector<36x32xf32> -> vector<36x32xf32>
    %111 = arith.addf %80, %110 : vector<36x32xf32>
    %c432 = arith.constant 432 : index
    %c0_58 = arith.constant 0 : index
    %112 = vector.load %arg2[%c432, %c0_58] : memref<1720x128xf32, #tpu.memory_space<vmem>>, vector<32x8xf32>
    %cst_59 = arith.constant dense<0.000000e+00> : vector<36x8xf32>
    %113 = tpu.matmul %18, %112, %cst_59 {dimension_numbers = #tpu.dot_dimension_numbers<[1], [0], [0], [1], [0, 0, 1, 1], [], []>} : vector<36x32xf32>, vector<32x8xf32>, vector<36x8xf32> -> vector<36x8xf32>
    %c464 = arith.constant 464 : index
    %c0_60 = arith.constant 0 : index
    %114 = vector.load %arg2[%c464, %c0_60] : memref<1720x128xf32, #tpu.memory_space<vmem>>, vector<1x8xf32>
    %115 = vector.broadcast %114 : vector<1x8xf32> to vector<36x8xf32>
    %116 = arith.addf %113, %115 : vector<36x8xf32>
    %c472 = arith.constant 472 : index
    %c0_61 = arith.constant 0 : index
    %117 = vector.load %arg2[%c472, %c0_61] : memref<1720x128xf32, #tpu.memory_space<vmem>>, vector<32x8xf32>
    %cst_62 = arith.constant dense<0.000000e+00> : vector<36x8xf32>
    %118 = tpu.matmul %18, %117, %cst_62 {dimension_numbers = #tpu.dot_dimension_numbers<[1], [0], [0], [1], [0, 0, 1, 1], [], []>} : vector<36x32xf32>, vector<32x8xf32>, vector<36x8xf32> -> vector<36x8xf32>
    %c504 = arith.constant 504 : index
    %c0_63 = arith.constant 0 : index
    %119 = vector.load %arg2[%c504, %c0_63] : memref<1720x128xf32, #tpu.memory_space<vmem>>, vector<1x8xf32>
    %120 = vector.broadcast %119 : vector<1x8xf32> to vector<36x8xf32>
    %121 = arith.addf %118, %120 : vector<36x8xf32>
    %c512 = arith.constant 512 : index
    %c0_64 = arith.constant 0 : index
    %122 = vector.load %arg2[%c512, %c0_64] : memref<1720x128xf32, #tpu.memory_space<vmem>>, vector<32x8xf32>
    %cst_65 = arith.constant dense<0.000000e+00> : vector<36x8xf32>
    %123 = tpu.matmul %18, %122, %cst_65 {dimension_numbers = #tpu.dot_dimension_numbers<[1], [0], [0], [1], [0, 0, 1, 1], [], []>} : vector<36x32xf32>, vector<32x8xf32>, vector<36x8xf32> -> vector<36x8xf32>
    %c544 = arith.constant 544 : index
    %c0_66 = arith.constant 0 : index
    %124 = vector.load %arg2[%c544, %c0_66] : memref<1720x128xf32, #tpu.memory_space<vmem>>, vector<1x8xf32>
    %125 = vector.broadcast %124 : vector<1x8xf32> to vector<36x8xf32>
    %126 = arith.addf %123, %125 : vector<36x8xf32>
    %cst_67 = arith.constant dense<0.000000e+00> : vector<36x36xf32>
    %127 = tpu.matmul %116, %121, %cst_67 {dimension_numbers = #tpu.dot_dimension_numbers<[1], [1], [0], [0], [0, 0, 1, 0], [], []>} : vector<36x8xf32>, vector<36x8xf32>, vector<36x36xf32> -> vector<36x36xf32>
    %128 = arith.addf %127, %19 : vector<36x36xf32>
    %cst_68 = arith.constant dense<0xFF800000> : vector<36xf32>
    %129 = vector.multi_reduction <maximumf>, %128, %cst_68 [1] : vector<36x36xf32> to vector<36xf32>
    %130 = vector.shape_cast %129 : vector<36xf32> to vector<36x1xf32>
    %131 = vector.broadcast %130 : vector<36x1xf32> to vector<36x36xf32>
    %132 = arith.subf %128, %131 : vector<36x36xf32>
    %133 = math.exp %132 : vector<36x36xf32>
    %cst_69 = arith.constant dense<0.000000e+00> : vector<36xf32>
    %134 = vector.multi_reduction <add>, %133, %cst_69 [1] : vector<36x36xf32> to vector<36xf32>
    %135 = vector.shape_cast %134 : vector<36xf32> to vector<36x1xf32>
    %136 = tpu.reciprocal %135 {approx = true} : vector<36x1xf32> -> vector<36x1xf32>
    %137 = vector.broadcast %136 : vector<36x1xf32> to vector<36x36xf32>
    %138 = arith.mulf %133, %137 : vector<36x36xf32>
    %cst_70 = arith.constant dense<0.000000e+00> : vector<36x8xf32>
    %139 = tpu.matmul %138, %126, %cst_70 {dimension_numbers = #tpu.dot_dimension_numbers<[1], [0], [0], [1], [0, 0, 1, 1], [], []>} : vector<36x36xf32>, vector<36x8xf32>, vector<36x8xf32> -> vector<36x8xf32>
    %c552 = arith.constant 552 : index
    %c0_71 = arith.constant 0 : index
    %140 = vector.load %arg2[%c552, %c0_71] : memref<1720x128xf32, #tpu.memory_space<vmem>>, vector<8x32xf32>
    %cst_72 = arith.constant dense<0.000000e+00> : vector<36x32xf32>
    %141 = tpu.matmul %139, %140, %cst_72 {dimension_numbers = #tpu.dot_dimension_numbers<[1], [0], [0], [1], [0, 0, 1, 1], [], []>} : vector<36x8xf32>, vector<8x32xf32>, vector<36x32xf32> -> vector<36x32xf32>
    %142 = arith.addf %111, %141 : vector<36x32xf32>
    %c560 = arith.constant 560 : index
    %c0_73 = arith.constant 0 : index
    %143 = vector.load %arg2[%c560, %c0_73] : memref<1720x128xf32, #tpu.memory_space<vmem>>, vector<1x32xf32>
    %144 = vector.broadcast %143 : vector<1x32xf32> to vector<36x32xf32>
    %145 = arith.addf %142, %144 : vector<36x32xf32>
    %146 = arith.addf %18, %145 : vector<36x32xf32>
    %c680 = arith.constant 680 : index
    %c0_74 = arith.constant 0 : index
    %147 = vector.load %arg2[%c680, %c0_74] : memref<1720x128xf32, #tpu.memory_space<vmem>>, vector<1x32xf32>
    %c688 = arith.constant 688 : index
    %c0_75 = arith.constant 0 : index
    %148 = vector.load %arg2[%c688, %c0_75] : memref<1720x128xf32, #tpu.memory_space<vmem>>, vector<1x32xf32>
    %cst_76 = arith.constant dense<0.000000e+00> : vector<36xf32>
    %149 = vector.multi_reduction <add>, %146, %cst_76 [1] : vector<36x32xf32> to vector<36xf32>
    %150 = vector.shape_cast %149 : vector<36xf32> to vector<36x1xf32>
    %cst_77 = arith.constant 3.200000e+01 : f32
    %151 = vector.broadcast %cst_77 : f32 to vector<36x1xf32>
    %152 = arith.divf %150, %151 : vector<36x1xf32>
    %153 = vector.broadcast %152 : vector<36x1xf32> to vector<36x32xf32>
    %154 = arith.subf %146, %153 : vector<36x32xf32>
    %155 = arith.mulf %154, %154 : vector<36x32xf32>
    %cst_78 = arith.constant dense<0.000000e+00> : vector<36xf32>
    %156 = vector.multi_reduction <add>, %155, %cst_78 [1] : vector<36x32xf32> to vector<36xf32>
    %157 = vector.shape_cast %156 : vector<36xf32> to vector<36x1xf32>
    %cst_79 = arith.constant 3.200000e+01 : f32
    %158 = vector.broadcast %cst_79 : f32 to vector<36x1xf32>
    %159 = arith.divf %157, %158 : vector<36x1xf32>
    %160 = vector.broadcast %152 : vector<36x1xf32> to vector<36x32xf32>
    %161 = arith.subf %146, %160 : vector<36x32xf32>
    %cst_80 = arith.constant 9.99999974E-6 : f32
    %162 = vector.broadcast %cst_80 : f32 to vector<36x1xf32>
    %163 = arith.addf %159, %162 : vector<36x1xf32>
    %164 = math.rsqrt %163 : vector<36x1xf32>
    %165 = vector.broadcast %164 : vector<36x1xf32> to vector<36x32xf32>
    %166 = arith.mulf %161, %165 : vector<36x32xf32>
    %167 = vector.broadcast %147 : vector<1x32xf32> to vector<36x32xf32>
    %168 = arith.mulf %166, %167 : vector<36x32xf32>
    %169 = vector.broadcast %148 : vector<1x32xf32> to vector<36x32xf32>
    %170 = arith.addf %168, %169 : vector<36x32xf32>
    %c568 = arith.constant 568 : index
    %c0_81 = arith.constant 0 : index
    %171 = vector.load %arg2[%c568, %c0_81] : memref<1720x128xf32, #tpu.memory_space<vmem>>, vector<32x64xf32>
    %cst_82 = arith.constant dense<0.000000e+00> : vector<36x64xf32>
    %172 = tpu.matmul %170, %171, %cst_82 {dimension_numbers = #tpu.dot_dimension_numbers<[1], [0], [0], [1], [0, 0, 1, 1], [], []>} : vector<36x32xf32>, vector<32x64xf32>, vector<36x64xf32> -> vector<36x64xf32>
    %c600 = arith.constant 600 : index
    %c0_83 = arith.constant 0 : index
    %173 = vector.load %arg2[%c600, %c0_83] : memref<1720x128xf32, #tpu.memory_space<vmem>>, vector<1x64xf32>
    %174 = vector.broadcast %173 : vector<1x64xf32> to vector<36x64xf32>
    %175 = arith.addf %172, %174 : vector<36x64xf32>
    %cst_84 = arith.constant 0.000000e+00 : f32
    %176 = vector.broadcast %cst_84 : f32 to vector<36x64xf32>
    %177 = arith.maximumf %175, %176 : vector<36x64xf32>
    %c608 = arith.constant 608 : index
    %c0_85 = arith.constant 0 : index
    %178 = vector.load %arg2[%c608, %c0_85] : memref<1720x128xf32, #tpu.memory_space<vmem>>, vector<64x32xf32>
    %cst_86 = arith.constant dense<0.000000e+00> : vector<36x32xf32>
    %179 = tpu.matmul %177, %178, %cst_86 {dimension_numbers = #tpu.dot_dimension_numbers<[1], [0], [0], [1], [0, 0, 1, 1], [], []>} : vector<36x64xf32>, vector<64x32xf32>, vector<36x32xf32> -> vector<36x32xf32>
    %c672 = arith.constant 672 : index
    %c0_87 = arith.constant 0 : index
    %180 = vector.load %arg2[%c672, %c0_87] : memref<1720x128xf32, #tpu.memory_space<vmem>>, vector<1x32xf32>
    %181 = vector.broadcast %180 : vector<1x32xf32> to vector<36x32xf32>
    %182 = arith.addf %179, %181 : vector<36x32xf32>
    %183 = arith.addf %170, %182 : vector<36x32xf32>
    %c696 = arith.constant 696 : index
    %c0_88 = arith.constant 0 : index
    %184 = vector.load %arg2[%c696, %c0_88] : memref<1720x128xf32, #tpu.memory_space<vmem>>, vector<1x32xf32>
    %c704 = arith.constant 704 : index
    %c0_89 = arith.constant 0 : index
    %185 = vector.load %arg2[%c704, %c0_89] : memref<1720x128xf32, #tpu.memory_space<vmem>>, vector<1x32xf32>
    %cst_90 = arith.constant dense<0.000000e+00> : vector<36xf32>
    %186 = vector.multi_reduction <add>, %183, %cst_90 [1] : vector<36x32xf32> to vector<36xf32>
    %187 = vector.shape_cast %186 : vector<36xf32> to vector<36x1xf32>
    %cst_91 = arith.constant 3.200000e+01 : f32
    %188 = vector.broadcast %cst_91 : f32 to vector<36x1xf32>
    %189 = arith.divf %187, %188 : vector<36x1xf32>
    %190 = vector.broadcast %189 : vector<36x1xf32> to vector<36x32xf32>
    %191 = arith.subf %183, %190 : vector<36x32xf32>
    %192 = arith.mulf %191, %191 : vector<36x32xf32>
    %cst_92 = arith.constant dense<0.000000e+00> : vector<36xf32>
    %193 = vector.multi_reduction <add>, %192, %cst_92 [1] : vector<36x32xf32> to vector<36xf32>
    %194 = vector.shape_cast %193 : vector<36xf32> to vector<36x1xf32>
    %cst_93 = arith.constant 3.200000e+01 : f32
    %195 = vector.broadcast %cst_93 : f32 to vector<36x1xf32>
    %196 = arith.divf %194, %195 : vector<36x1xf32>
    %197 = vector.broadcast %189 : vector<36x1xf32> to vector<36x32xf32>
    %198 = arith.subf %183, %197 : vector<36x32xf32>
    %cst_94 = arith.constant 9.99999974E-6 : f32
    %199 = vector.broadcast %cst_94 : f32 to vector<36x1xf32>
    %200 = arith.addf %196, %199 : vector<36x1xf32>
    %201 = math.rsqrt %200 : vector<36x1xf32>
    %202 = vector.broadcast %201 : vector<36x1xf32> to vector<36x32xf32>
    %203 = arith.mulf %198, %202 : vector<36x32xf32>
    %204 = vector.broadcast %184 : vector<1x32xf32> to vector<36x32xf32>
    %205 = arith.mulf %203, %204 : vector<36x32xf32>
    %206 = vector.broadcast %185 : vector<1x32xf32> to vector<36x32xf32>
    %207 = arith.addf %205, %206 : vector<36x32xf32>
    %c712 = arith.constant 712 : index
    %c0_95 = arith.constant 0 : index
    %208 = vector.load %arg2[%c712, %c0_95] : memref<1720x128xf32, #tpu.memory_space<vmem>>, vector<32x8xf32>
    %cst_96 = arith.constant dense<0.000000e+00> : vector<36x8xf32>
    %209 = tpu.matmul %207, %208, %cst_96 {dimension_numbers = #tpu.dot_dimension_numbers<[1], [0], [0], [1], [0, 0, 1, 1], [], []>} : vector<36x32xf32>, vector<32x8xf32>, vector<36x8xf32> -> vector<36x8xf32>
    %c744 = arith.constant 744 : index
    %c0_97 = arith.constant 0 : index
    %210 = vector.load %arg2[%c744, %c0_97] : memref<1720x128xf32, #tpu.memory_space<vmem>>, vector<1x8xf32>
    %211 = vector.broadcast %210 : vector<1x8xf32> to vector<36x8xf32>
    %212 = arith.addf %209, %211 : vector<36x8xf32>
    %c752 = arith.constant 752 : index
    %c0_98 = arith.constant 0 : index
    %213 = vector.load %arg2[%c752, %c0_98] : memref<1720x128xf32, #tpu.memory_space<vmem>>, vector<32x8xf32>
    %cst_99 = arith.constant dense<0.000000e+00> : vector<36x8xf32>
    %214 = tpu.matmul %207, %213, %cst_99 {dimension_numbers = #tpu.dot_dimension_numbers<[1], [0], [0], [1], [0, 0, 1, 1], [], []>} : vector<36x32xf32>, vector<32x8xf32>, vector<36x8xf32> -> vector<36x8xf32>
    %c784 = arith.constant 784 : index
    %c0_100 = arith.constant 0 : index
    %215 = vector.load %arg2[%c784, %c0_100] : memref<1720x128xf32, #tpu.memory_space<vmem>>, vector<1x8xf32>
    %216 = vector.broadcast %215 : vector<1x8xf32> to vector<36x8xf32>
    %217 = arith.addf %214, %216 : vector<36x8xf32>
    %c792 = arith.constant 792 : index
    %c0_101 = arith.constant 0 : index
    %218 = vector.load %arg2[%c792, %c0_101] : memref<1720x128xf32, #tpu.memory_space<vmem>>, vector<32x8xf32>
    %cst_102 = arith.constant dense<0.000000e+00> : vector<36x8xf32>
    %219 = tpu.matmul %207, %218, %cst_102 {dimension_numbers = #tpu.dot_dimension_numbers<[1], [0], [0], [1], [0, 0, 1, 1], [], []>} : vector<36x32xf32>, vector<32x8xf32>, vector<36x8xf32> -> vector<36x8xf32>
    %c824 = arith.constant 824 : index
    %c0_103 = arith.constant 0 : index
    %220 = vector.load %arg2[%c824, %c0_103] : memref<1720x128xf32, #tpu.memory_space<vmem>>, vector<1x8xf32>
    %221 = vector.broadcast %220 : vector<1x8xf32> to vector<36x8xf32>
    %222 = arith.addf %219, %221 : vector<36x8xf32>
    %cst_104 = arith.constant dense<0.000000e+00> : vector<36x36xf32>
    %223 = tpu.matmul %212, %217, %cst_104 {dimension_numbers = #tpu.dot_dimension_numbers<[1], [1], [0], [0], [0, 0, 1, 0], [], []>} : vector<36x8xf32>, vector<36x8xf32>, vector<36x36xf32> -> vector<36x36xf32>
    %224 = arith.addf %223, %19 : vector<36x36xf32>
    %cst_105 = arith.constant dense<0xFF800000> : vector<36xf32>
    %225 = vector.multi_reduction <maximumf>, %224, %cst_105 [1] : vector<36x36xf32> to vector<36xf32>
    %226 = vector.shape_cast %225 : vector<36xf32> to vector<36x1xf32>
    %227 = vector.broadcast %226 : vector<36x1xf32> to vector<36x36xf32>
    %228 = arith.subf %224, %227 : vector<36x36xf32>
    %229 = math.exp %228 : vector<36x36xf32>
    %cst_106 = arith.constant dense<0.000000e+00> : vector<36xf32>
    %230 = vector.multi_reduction <add>, %229, %cst_106 [1] : vector<36x36xf32> to vector<36xf32>
    %231 = vector.shape_cast %230 : vector<36xf32> to vector<36x1xf32>
    %232 = tpu.reciprocal %231 {approx = true} : vector<36x1xf32> -> vector<36x1xf32>
    %233 = vector.broadcast %232 : vector<36x1xf32> to vector<36x36xf32>
    %234 = arith.mulf %229, %233 : vector<36x36xf32>
    %cst_107 = arith.constant dense<0.000000e+00> : vector<36x8xf32>
    %235 = tpu.matmul %234, %222, %cst_107 {dimension_numbers = #tpu.dot_dimension_numbers<[1], [0], [0], [1], [0, 0, 1, 1], [], []>} : vector<36x36xf32>, vector<36x8xf32>, vector<36x8xf32> -> vector<36x8xf32>
    %c832 = arith.constant 832 : index
    %c0_108 = arith.constant 0 : index
    %236 = vector.load %arg2[%c832, %c0_108] : memref<1720x128xf32, #tpu.memory_space<vmem>>, vector<8x32xf32>
    %cst_109 = arith.constant dense<0.000000e+00> : vector<36x32xf32>
    %237 = tpu.matmul %235, %236, %cst_109 {dimension_numbers = #tpu.dot_dimension_numbers<[1], [0], [0], [1], [0, 0, 1, 1], [], []>} : vector<36x8xf32>, vector<8x32xf32>, vector<36x32xf32> -> vector<36x32xf32>
    %c840 = arith.constant 840 : index
    %c0_110 = arith.constant 0 : index
    %238 = vector.load %arg2[%c840, %c0_110] : memref<1720x128xf32, #tpu.memory_space<vmem>>, vector<32x8xf32>
    %cst_111 = arith.constant dense<0.000000e+00> : vector<36x8xf32>
    %239 = tpu.matmul %207, %238, %cst_111 {dimension_numbers = #tpu.dot_dimension_numbers<[1], [0], [0], [1], [0, 0, 1, 1], [], []>} : vector<36x32xf32>, vector<32x8xf32>, vector<36x8xf32> -> vector<36x8xf32>
    %c872 = arith.constant 872 : index
    %c0_112 = arith.constant 0 : index
    %240 = vector.load %arg2[%c872, %c0_112] : memref<1720x128xf32, #tpu.memory_space<vmem>>, vector<1x8xf32>
    %241 = vector.broadcast %240 : vector<1x8xf32> to vector<36x8xf32>
    %242 = arith.addf %239, %241 : vector<36x8xf32>
    %c880 = arith.constant 880 : index
    %c0_113 = arith.constant 0 : index
    %243 = vector.load %arg2[%c880, %c0_113] : memref<1720x128xf32, #tpu.memory_space<vmem>>, vector<32x8xf32>
    %cst_114 = arith.constant dense<0.000000e+00> : vector<36x8xf32>
    %244 = tpu.matmul %207, %243, %cst_114 {dimension_numbers = #tpu.dot_dimension_numbers<[1], [0], [0], [1], [0, 0, 1, 1], [], []>} : vector<36x32xf32>, vector<32x8xf32>, vector<36x8xf32> -> vector<36x8xf32>
    %c912 = arith.constant 912 : index
    %c0_115 = arith.constant 0 : index
    %245 = vector.load %arg2[%c912, %c0_115] : memref<1720x128xf32, #tpu.memory_space<vmem>>, vector<1x8xf32>
    %246 = vector.broadcast %245 : vector<1x8xf32> to vector<36x8xf32>
    %247 = arith.addf %244, %246 : vector<36x8xf32>
    %c920 = arith.constant 920 : index
    %c0_116 = arith.constant 0 : index
    %248 = vector.load %arg2[%c920, %c0_116] : memref<1720x128xf32, #tpu.memory_space<vmem>>, vector<32x8xf32>
    %cst_117 = arith.constant dense<0.000000e+00> : vector<36x8xf32>
    %249 = tpu.matmul %207, %248, %cst_117 {dimension_numbers = #tpu.dot_dimension_numbers<[1], [0], [0], [1], [0, 0, 1, 1], [], []>} : vector<36x32xf32>, vector<32x8xf32>, vector<36x8xf32> -> vector<36x8xf32>
    %c952 = arith.constant 952 : index
    %c0_118 = arith.constant 0 : index
    %250 = vector.load %arg2[%c952, %c0_118] : memref<1720x128xf32, #tpu.memory_space<vmem>>, vector<1x8xf32>
    %251 = vector.broadcast %250 : vector<1x8xf32> to vector<36x8xf32>
    %252 = arith.addf %249, %251 : vector<36x8xf32>
    %cst_119 = arith.constant dense<0.000000e+00> : vector<36x36xf32>
    %253 = tpu.matmul %242, %247, %cst_119 {dimension_numbers = #tpu.dot_dimension_numbers<[1], [1], [0], [0], [0, 0, 1, 0], [], []>} : vector<36x8xf32>, vector<36x8xf32>, vector<36x36xf32> -> vector<36x36xf32>
    %254 = arith.addf %253, %19 : vector<36x36xf32>
    %cst_120 = arith.constant dense<0xFF800000> : vector<36xf32>
    %255 = vector.multi_reduction <maximumf>, %254, %cst_120 [1] : vector<36x36xf32> to vector<36xf32>
    %256 = vector.shape_cast %255 : vector<36xf32> to vector<36x1xf32>
    %257 = vector.broadcast %256 : vector<36x1xf32> to vector<36x36xf32>
    %258 = arith.subf %254, %257 : vector<36x36xf32>
    %259 = math.exp %258 : vector<36x36xf32>
    %cst_121 = arith.constant dense<0.000000e+00> : vector<36xf32>
    %260 = vector.multi_reduction <add>, %259, %cst_121 [1] : vector<36x36xf32> to vector<36xf32>
    %261 = vector.shape_cast %260 : vector<36xf32> to vector<36x1xf32>
    %262 = tpu.reciprocal %261 {approx = true} : vector<36x1xf32> -> vector<36x1xf32>
    %263 = vector.broadcast %262 : vector<36x1xf32> to vector<36x36xf32>
    %264 = arith.mulf %259, %263 : vector<36x36xf32>
    %cst_122 = arith.constant dense<0.000000e+00> : vector<36x8xf32>
    %265 = tpu.matmul %264, %252, %cst_122 {dimension_numbers = #tpu.dot_dimension_numbers<[1], [0], [0], [1], [0, 0, 1, 1], [], []>} : vector<36x36xf32>, vector<36x8xf32>, vector<36x8xf32> -> vector<36x8xf32>
    %c960 = arith.constant 960 : index
    %c0_123 = arith.constant 0 : index
    %266 = vector.load %arg2[%c960, %c0_123] : memref<1720x128xf32, #tpu.memory_space<vmem>>, vector<8x32xf32>
    %cst_124 = arith.constant dense<0.000000e+00> : vector<36x32xf32>
    %267 = tpu.matmul %265, %266, %cst_124 {dimension_numbers = #tpu.dot_dimension_numbers<[1], [0], [0], [1], [0, 0, 1, 1], [], []>} : vector<36x8xf32>, vector<8x32xf32>, vector<36x32xf32> -> vector<36x32xf32>
    %268 = arith.addf %237, %267 : vector<36x32xf32>
    %c968 = arith.constant 968 : index
    %c0_125 = arith.constant 0 : index
    %269 = vector.load %arg2[%c968, %c0_125] : memref<1720x128xf32, #tpu.memory_space<vmem>>, vector<32x8xf32>
    %cst_126 = arith.constant dense<0.000000e+00> : vector<36x8xf32>
    %270 = tpu.matmul %207, %269, %cst_126 {dimension_numbers = #tpu.dot_dimension_numbers<[1], [0], [0], [1], [0, 0, 1, 1], [], []>} : vector<36x32xf32>, vector<32x8xf32>, vector<36x8xf32> -> vector<36x8xf32>
    %c1000 = arith.constant 1000 : index
    %c0_127 = arith.constant 0 : index
    %271 = vector.load %arg2[%c1000, %c0_127] : memref<1720x128xf32, #tpu.memory_space<vmem>>, vector<1x8xf32>
    %272 = vector.broadcast %271 : vector<1x8xf32> to vector<36x8xf32>
    %273 = arith.addf %270, %272 : vector<36x8xf32>
    %c1008 = arith.constant 1008 : index
    %c0_128 = arith.constant 0 : index
    %274 = vector.load %arg2[%c1008, %c0_128] : memref<1720x128xf32, #tpu.memory_space<vmem>>, vector<32x8xf32>
    %cst_129 = arith.constant dense<0.000000e+00> : vector<36x8xf32>
    %275 = tpu.matmul %207, %274, %cst_129 {dimension_numbers = #tpu.dot_dimension_numbers<[1], [0], [0], [1], [0, 0, 1, 1], [], []>} : vector<36x32xf32>, vector<32x8xf32>, vector<36x8xf32> -> vector<36x8xf32>
    %c1040 = arith.constant 1040 : index
    %c0_130 = arith.constant 0 : index
    %276 = vector.load %arg2[%c1040, %c0_130] : memref<1720x128xf32, #tpu.memory_space<vmem>>, vector<1x8xf32>
    %277 = vector.broadcast %276 : vector<1x8xf32> to vector<36x8xf32>
    %278 = arith.addf %275, %277 : vector<36x8xf32>
    %c1048 = arith.constant 1048 : index
    %c0_131 = arith.constant 0 : index
    %279 = vector.load %arg2[%c1048, %c0_131] : memref<1720x128xf32, #tpu.memory_space<vmem>>, vector<32x8xf32>
    %cst_132 = arith.constant dense<0.000000e+00> : vector<36x8xf32>
    %280 = tpu.matmul %207, %279, %cst_132 {dimension_numbers = #tpu.dot_dimension_numbers<[1], [0], [0], [1], [0, 0, 1, 1], [], []>} : vector<36x32xf32>, vector<32x8xf32>, vector<36x8xf32> -> vector<36x8xf32>
    %c1080 = arith.constant 1080 : index
    %c0_133 = arith.constant 0 : index
    %281 = vector.load %arg2[%c1080, %c0_133] : memref<1720x128xf32, #tpu.memory_space<vmem>>, vector<1x8xf32>
    %282 = vector.broadcast %281 : vector<1x8xf32> to vector<36x8xf32>
    %283 = arith.addf %280, %282 : vector<36x8xf32>
    %cst_134 = arith.constant dense<0.000000e+00> : vector<36x36xf32>
    %284 = tpu.matmul %273, %278, %cst_134 {dimension_numbers = #tpu.dot_dimension_numbers<[1], [1], [0], [0], [0, 0, 1, 0], [], []>} : vector<36x8xf32>, vector<36x8xf32>, vector<36x36xf32> -> vector<36x36xf32>
    %285 = arith.addf %284, %19 : vector<36x36xf32>
    %cst_135 = arith.constant dense<0xFF800000> : vector<36xf32>
    %286 = vector.multi_reduction <maximumf>, %285, %cst_135 [1] : vector<36x36xf32> to vector<36xf32>
    %287 = vector.shape_cast %286 : vector<36xf32> to vector<36x1xf32>
    %288 = vector.broadcast %287 : vector<36x1xf32> to vector<36x36xf32>
    %289 = arith.subf %285, %288 : vector<36x36xf32>
    %290 = math.exp %289 : vector<36x36xf32>
    %cst_136 = arith.constant dense<0.000000e+00> : vector<36xf32>
    %291 = vector.multi_reduction <add>, %290, %cst_136 [1] : vector<36x36xf32> to vector<36xf32>
    %292 = vector.shape_cast %291 : vector<36xf32> to vector<36x1xf32>
    %293 = tpu.reciprocal %292 {approx = true} : vector<36x1xf32> -> vector<36x1xf32>
    %294 = vector.broadcast %293 : vector<36x1xf32> to vector<36x36xf32>
    %295 = arith.mulf %290, %294 : vector<36x36xf32>
    %cst_137 = arith.constant dense<0.000000e+00> : vector<36x8xf32>
    %296 = tpu.matmul %295, %283, %cst_137 {dimension_numbers = #tpu.dot_dimension_numbers<[1], [0], [0], [1], [0, 0, 1, 1], [], []>} : vector<36x36xf32>, vector<36x8xf32>, vector<36x8xf32> -> vector<36x8xf32>
    %c1088 = arith.constant 1088 : index
    %c0_138 = arith.constant 0 : index
    %297 = vector.load %arg2[%c1088, %c0_138] : memref<1720x128xf32, #tpu.memory_space<vmem>>, vector<8x32xf32>
    %cst_139 = arith.constant dense<0.000000e+00> : vector<36x32xf32>
    %298 = tpu.matmul %296, %297, %cst_139 {dimension_numbers = #tpu.dot_dimension_numbers<[1], [0], [0], [1], [0, 0, 1, 1], [], []>} : vector<36x8xf32>, vector<8x32xf32>, vector<36x32xf32> -> vector<36x32xf32>
    %299 = arith.addf %268, %298 : vector<36x32xf32>
    %c1096 = arith.constant 1096 : index
    %c0_140 = arith.constant 0 : index
    %300 = vector.load %arg2[%c1096, %c0_140] : memref<1720x128xf32, #tpu.memory_space<vmem>>, vector<32x8xf32>
    %cst_141 = arith.constant dense<0.000000e+00> : vector<36x8xf32>
    %301 = tpu.matmul %207, %300, %cst_141 {dimension_numbers = #tpu.dot_dimension_numbers<[1], [0], [0], [1], [0, 0, 1, 1], [], []>} : vector<36x32xf32>, vector<32x8xf32>, vector<36x8xf32> -> vector<36x8xf32>
    %c1128 = arith.constant 1128 : index
    %c0_142 = arith.constant 0 : index
    %302 = vector.load %arg2[%c1128, %c0_142] : memref<1720x128xf32, #tpu.memory_space<vmem>>, vector<1x8xf32>
    %303 = vector.broadcast %302 : vector<1x8xf32> to vector<36x8xf32>
    %304 = arith.addf %301, %303 : vector<36x8xf32>
    %c1136 = arith.constant 1136 : index
    %c0_143 = arith.constant 0 : index
    %305 = vector.load %arg2[%c1136, %c0_143] : memref<1720x128xf32, #tpu.memory_space<vmem>>, vector<32x8xf32>
    %cst_144 = arith.constant dense<0.000000e+00> : vector<36x8xf32>
    %306 = tpu.matmul %207, %305, %cst_144 {dimension_numbers = #tpu.dot_dimension_numbers<[1], [0], [0], [1], [0, 0, 1, 1], [], []>} : vector<36x32xf32>, vector<32x8xf32>, vector<36x8xf32> -> vector<36x8xf32>
    %c1168 = arith.constant 1168 : index
    %c0_145 = arith.constant 0 : index
    %307 = vector.load %arg2[%c1168, %c0_145] : memref<1720x128xf32, #tpu.memory_space<vmem>>, vector<1x8xf32>
    %308 = vector.broadcast %307 : vector<1x8xf32> to vector<36x8xf32>
    %309 = arith.addf %306, %308 : vector<36x8xf32>
    %c1176 = arith.constant 1176 : index
    %c0_146 = arith.constant 0 : index
    %310 = vector.load %arg2[%c1176, %c0_146] : memref<1720x128xf32, #tpu.memory_space<vmem>>, vector<32x8xf32>
    %cst_147 = arith.constant dense<0.000000e+00> : vector<36x8xf32>
    %311 = tpu.matmul %207, %310, %cst_147 {dimension_numbers = #tpu.dot_dimension_numbers<[1], [0], [0], [1], [0, 0, 1, 1], [], []>} : vector<36x32xf32>, vector<32x8xf32>, vector<36x8xf32> -> vector<36x8xf32>
    %c1208 = arith.constant 1208 : index
    %c0_148 = arith.constant 0 : index
    %312 = vector.load %arg2[%c1208, %c0_148] : memref<1720x128xf32, #tpu.memory_space<vmem>>, vector<1x8xf32>
    %313 = vector.broadcast %312 : vector<1x8xf32> to vector<36x8xf32>
    %314 = arith.addf %311, %313 : vector<36x8xf32>
    %cst_149 = arith.constant dense<0.000000e+00> : vector<36x36xf32>
    %315 = tpu.matmul %304, %309, %cst_149 {dimension_numbers = #tpu.dot_dimension_numbers<[1], [1], [0], [0], [0, 0, 1, 0], [], []>} : vector<36x8xf32>, vector<36x8xf32>, vector<36x36xf32> -> vector<36x36xf32>
    %316 = arith.addf %315, %19 : vector<36x36xf32>
    %cst_150 = arith.constant dense<0xFF800000> : vector<36xf32>
    %317 = vector.multi_reduction <maximumf>, %316, %cst_150 [1] : vector<36x36xf32> to vector<36xf32>
    %318 = vector.shape_cast %317 : vector<36xf32> to vector<36x1xf32>
    %319 = vector.broadcast %318 : vector<36x1xf32> to vector<36x36xf32>
    %320 = arith.subf %316, %319 : vector<36x36xf32>
    %321 = math.exp %320 : vector<36x36xf32>
    %cst_151 = arith.constant dense<0.000000e+00> : vector<36xf32>
    %322 = vector.multi_reduction <add>, %321, %cst_151 [1] : vector<36x36xf32> to vector<36xf32>
    %323 = vector.shape_cast %322 : vector<36xf32> to vector<36x1xf32>
    %324 = tpu.reciprocal %323 {approx = true} : vector<36x1xf32> -> vector<36x1xf32>
    %325 = vector.broadcast %324 : vector<36x1xf32> to vector<36x36xf32>
    %326 = arith.mulf %321, %325 : vector<36x36xf32>
    %cst_152 = arith.constant dense<0.000000e+00> : vector<36x8xf32>
    %327 = tpu.matmul %326, %314, %cst_152 {dimension_numbers = #tpu.dot_dimension_numbers<[1], [0], [0], [1], [0, 0, 1, 1], [], []>} : vector<36x36xf32>, vector<36x8xf32>, vector<36x8xf32> -> vector<36x8xf32>
    %c1216 = arith.constant 1216 : index
    %c0_153 = arith.constant 0 : index
    %328 = vector.load %arg2[%c1216, %c0_153] : memref<1720x128xf32, #tpu.memory_space<vmem>>, vector<8x32xf32>
    %cst_154 = arith.constant dense<0.000000e+00> : vector<36x32xf32>
    %329 = tpu.matmul %327, %328, %cst_154 {dimension_numbers = #tpu.dot_dimension_numbers<[1], [0], [0], [1], [0, 0, 1, 1], [], []>} : vector<36x8xf32>, vector<8x32xf32>, vector<36x32xf32> -> vector<36x32xf32>
    %330 = arith.addf %299, %329 : vector<36x32xf32>
    %c1224 = arith.constant 1224 : index
    %c0_155 = arith.constant 0 : index
    %331 = vector.load %arg2[%c1224, %c0_155] : memref<1720x128xf32, #tpu.memory_space<vmem>>, vector<1x32xf32>
    %332 = vector.broadcast %331 : vector<1x32xf32> to vector<36x32xf32>
    %333 = arith.addf %330, %332 : vector<36x32xf32>
    %334 = arith.addf %207, %333 : vector<36x32xf32>
    %c1344 = arith.constant 1344 : index
    %c0_156 = arith.constant 0 : index
    %335 = vector.load %arg2[%c1344, %c0_156] : memref<1720x128xf32, #tpu.memory_space<vmem>>, vector<1x32xf32>
    %c1352 = arith.constant 1352 : index
    %c0_157 = arith.constant 0 : index
    %336 = vector.load %arg2[%c1352, %c0_157] : memref<1720x128xf32, #tpu.memory_space<vmem>>, vector<1x32xf32>
    %cst_158 = arith.constant dense<0.000000e+00> : vector<36xf32>
    %337 = vector.multi_reduction <add>, %334, %cst_158 [1] : vector<36x32xf32> to vector<36xf32>
    %338 = vector.shape_cast %337 : vector<36xf32> to vector<36x1xf32>
    %cst_159 = arith.constant 3.200000e+01 : f32
    %339 = vector.broadcast %cst_159 : f32 to vector<36x1xf32>
    %340 = arith.divf %338, %339 : vector<36x1xf32>
    %341 = vector.broadcast %340 : vector<36x1xf32> to vector<36x32xf32>
    %342 = arith.subf %334, %341 : vector<36x32xf32>
    %343 = arith.mulf %342, %342 : vector<36x32xf32>
    %cst_160 = arith.constant dense<0.000000e+00> : vector<36xf32>
    %344 = vector.multi_reduction <add>, %343, %cst_160 [1] : vector<36x32xf32> to vector<36xf32>
    %345 = vector.shape_cast %344 : vector<36xf32> to vector<36x1xf32>
    %cst_161 = arith.constant 3.200000e+01 : f32
    %346 = vector.broadcast %cst_161 : f32 to vector<36x1xf32>
    %347 = arith.divf %345, %346 : vector<36x1xf32>
    %348 = vector.broadcast %340 : vector<36x1xf32> to vector<36x32xf32>
    %349 = arith.subf %334, %348 : vector<36x32xf32>
    %cst_162 = arith.constant 9.99999974E-6 : f32
    %350 = vector.broadcast %cst_162 : f32 to vector<36x1xf32>
    %351 = arith.addf %347, %350 : vector<36x1xf32>
    %352 = math.rsqrt %351 : vector<36x1xf32>
    %353 = vector.broadcast %352 : vector<36x1xf32> to vector<36x32xf32>
    %354 = arith.mulf %349, %353 : vector<36x32xf32>
    %355 = vector.broadcast %335 : vector<1x32xf32> to vector<36x32xf32>
    %356 = arith.mulf %354, %355 : vector<36x32xf32>
    %357 = vector.broadcast %336 : vector<1x32xf32> to vector<36x32xf32>
    %358 = arith.addf %356, %357 : vector<36x32xf32>
    %c1232 = arith.constant 1232 : index
    %c0_163 = arith.constant 0 : index
    %359 = vector.load %arg2[%c1232, %c0_163] : memref<1720x128xf32, #tpu.memory_space<vmem>>, vector<32x64xf32>
    %cst_164 = arith.constant dense<0.000000e+00> : vector<36x64xf32>
    %360 = tpu.matmul %358, %359, %cst_164 {dimension_numbers = #tpu.dot_dimension_numbers<[1], [0], [0], [1], [0, 0, 1, 1], [], []>} : vector<36x32xf32>, vector<32x64xf32>, vector<36x64xf32> -> vector<36x64xf32>
    %c1264 = arith.constant 1264 : index
    %c0_165 = arith.constant 0 : index
    %361 = vector.load %arg2[%c1264, %c0_165] : memref<1720x128xf32, #tpu.memory_space<vmem>>, vector<1x64xf32>
    %362 = vector.broadcast %361 : vector<1x64xf32> to vector<36x64xf32>
    %363 = arith.addf %360, %362 : vector<36x64xf32>
    %cst_166 = arith.constant 0.000000e+00 : f32
    %364 = vector.broadcast %cst_166 : f32 to vector<36x64xf32>
    %365 = arith.maximumf %363, %364 : vector<36x64xf32>
    %c1272 = arith.constant 1272 : index
    %c0_167 = arith.constant 0 : index
    %366 = vector.load %arg2[%c1272, %c0_167] : memref<1720x128xf32, #tpu.memory_space<vmem>>, vector<64x32xf32>
    %cst_168 = arith.constant dense<0.000000e+00> : vector<36x32xf32>
    %367 = tpu.matmul %365, %366, %cst_168 {dimension_numbers = #tpu.dot_dimension_numbers<[1], [0], [0], [1], [0, 0, 1, 1], [], []>} : vector<36x64xf32>, vector<64x32xf32>, vector<36x32xf32> -> vector<36x32xf32>
    %c1336 = arith.constant 1336 : index
    %c0_169 = arith.constant 0 : index
    %368 = vector.load %arg2[%c1336, %c0_169] : memref<1720x128xf32, #tpu.memory_space<vmem>>, vector<1x32xf32>
    %369 = vector.broadcast %368 : vector<1x32xf32> to vector<36x32xf32>
    %370 = arith.addf %367, %369 : vector<36x32xf32>
    %371 = arith.addf %358, %370 : vector<36x32xf32>
    %c1360 = arith.constant 1360 : index
    %c0_170 = arith.constant 0 : index
    %372 = vector.load %arg2[%c1360, %c0_170] : memref<1720x128xf32, #tpu.memory_space<vmem>>, vector<1x32xf32>
    %c1368 = arith.constant 1368 : index
    %c0_171 = arith.constant 0 : index
    %373 = vector.load %arg2[%c1368, %c0_171] : memref<1720x128xf32, #tpu.memory_space<vmem>>, vector<1x32xf32>
    %cst_172 = arith.constant dense<0.000000e+00> : vector<36xf32>
    %374 = vector.multi_reduction <add>, %371, %cst_172 [1] : vector<36x32xf32> to vector<36xf32>
    %375 = vector.shape_cast %374 : vector<36xf32> to vector<36x1xf32>
    %cst_173 = arith.constant 3.200000e+01 : f32
    %376 = vector.broadcast %cst_173 : f32 to vector<36x1xf32>
    %377 = arith.divf %375, %376 : vector<36x1xf32>
    %378 = vector.broadcast %377 : vector<36x1xf32> to vector<36x32xf32>
    %379 = arith.subf %371, %378 : vector<36x32xf32>
    %380 = arith.mulf %379, %379 : vector<36x32xf32>
    %cst_174 = arith.constant dense<0.000000e+00> : vector<36xf32>
    %381 = vector.multi_reduction <add>, %380, %cst_174 [1] : vector<36x32xf32> to vector<36xf32>
    %382 = vector.shape_cast %381 : vector<36xf32> to vector<36x1xf32>
    %cst_175 = arith.constant 3.200000e+01 : f32
    %383 = vector.broadcast %cst_175 : f32 to vector<36x1xf32>
    %384 = arith.divf %382, %383 : vector<36x1xf32>
    %385 = vector.broadcast %377 : vector<36x1xf32> to vector<36x32xf32>
    %386 = arith.subf %371, %385 : vector<36x32xf32>
    %cst_176 = arith.constant 9.99999974E-6 : f32
    %387 = vector.broadcast %cst_176 : f32 to vector<36x1xf32>
    %388 = arith.addf %384, %387 : vector<36x1xf32>
    %389 = math.rsqrt %388 : vector<36x1xf32>
    %390 = vector.broadcast %389 : vector<36x1xf32> to vector<36x32xf32>
    %391 = arith.mulf %386, %390 : vector<36x32xf32>
    %392 = vector.broadcast %372 : vector<1x32xf32> to vector<36x32xf32>
    %393 = arith.mulf %391, %392 : vector<36x32xf32>
    %394 = vector.broadcast %373 : vector<1x32xf32> to vector<36x32xf32>
    %395 = arith.addf %393, %394 : vector<36x32xf32>
    %396 = vector.extract_strided_slice %395 {offsets = [0, 0], sizes = [6, 32], strides = [1, 1]} : vector<36x32xf32> to vector<6x32xf32>
    %c1704 = arith.constant 1704 : index
    %c0_177 = arith.constant 0 : index
    %397 = vector.load %arg2[%c1704, %c0_177] : memref<1720x128xf32, #tpu.memory_space<vmem>>, vector<8x6xf32>
    %cst_178 = arith.constant dense<0.000000e+00> : vector<8x32xf32>
    %398 = tpu.matmul %397, %396, %cst_178 {dimension_numbers = #tpu.dot_dimension_numbers<[1], [0], [0], [1], [0, 0, 1, 1], [], []>} : vector<8x6xf32>, vector<6x32xf32>, vector<8x32xf32> -> vector<8x32xf32>
    %c1712 = arith.constant 1712 : index
    %c0_179 = arith.constant 0 : index
    %399 = vector.load %arg2[%c1712, %c0_179] : memref<1720x128xf32, #tpu.memory_space<vmem>>, vector<2x8xf32>
    %cst_180 = arith.constant dense<0.000000e+00> : vector<2x32xf32>
    %400 = tpu.matmul %399, %398, %cst_180 {dimension_numbers = #tpu.dot_dimension_numbers<[1], [0], [0], [1], [0, 0, 1, 1], [], []>} : vector<2x8xf32>, vector<8x32xf32>, vector<2x32xf32> -> vector<2x32xf32>
    %c1552 = arith.constant 1552 : index
    %c0_181 = arith.constant 0 : index
    %401 = vector.load %arg2[%c1552, %c0_181] : memref<1720x128xf32, #tpu.memory_space<vmem>>, vector<32x16xf32>
    %cst_182 = arith.constant dense<0.000000e+00> : vector<2x16xf32>
    %402 = tpu.matmul %400, %401, %cst_182 {dimension_numbers = #tpu.dot_dimension_numbers<[1], [0], [0], [1], [0, 0, 1, 1], [], []>} : vector<2x32xf32>, vector<32x16xf32>, vector<2x16xf32> -> vector<2x16xf32>
    %c1584 = arith.constant 1584 : index
    %c0_183 = arith.constant 0 : index
    %403 = vector.load %arg2[%c1584, %c0_183] : memref<1720x128xf32, #tpu.memory_space<vmem>>, vector<1x16xf32>
    %404 = vector.broadcast %403 : vector<1x16xf32> to vector<2x16xf32>
    %405 = arith.addf %402, %404 : vector<2x16xf32>
    %c1592 = arith.constant 1592 : index
    %c0_184 = arith.constant 0 : index
    %406 = vector.load %arg2[%c1592, %c0_184] : memref<1720x128xf32, #tpu.memory_space<vmem>>, vector<1x16xf32>
    %c1600 = arith.constant 1600 : index
    %c0_185 = arith.constant 0 : index
    %407 = vector.load %arg2[%c1600, %c0_185] : memref<1720x128xf32, #tpu.memory_space<vmem>>, vector<1x16xf32>
    %cst_186 = arith.constant dense<0.000000e+00> : vector<2xf32>
    %408 = vector.multi_reduction <add>, %405, %cst_186 [1] : vector<2x16xf32> to vector<2xf32>
    %409 = vector.shape_cast %408 : vector<2xf32> to vector<2x1xf32>
    %cst_187 = arith.constant 1.600000e+01 : f32
    %410 = vector.broadcast %cst_187 : f32 to vector<2x1xf32>
    %411 = arith.divf %409, %410 : vector<2x1xf32>
    %412 = vector.broadcast %411 : vector<2x1xf32> to vector<2x16xf32>
    %413 = arith.subf %405, %412 : vector<2x16xf32>
    %414 = arith.mulf %413, %413 : vector<2x16xf32>
    %cst_188 = arith.constant dense<0.000000e+00> : vector<2xf32>
    %415 = vector.multi_reduction <add>, %414, %cst_188 [1] : vector<2x16xf32> to vector<2xf32>
    %416 = vector.shape_cast %415 : vector<2xf32> to vector<2x1xf32>
    %cst_189 = arith.constant 1.600000e+01 : f32
    %417 = vector.broadcast %cst_189 : f32 to vector<2x1xf32>
    %418 = arith.divf %416, %417 : vector<2x1xf32>
    %419 = vector.broadcast %411 : vector<2x1xf32> to vector<2x16xf32>
    %420 = arith.subf %405, %419 : vector<2x16xf32>
    %cst_190 = arith.constant 9.99999974E-6 : f32
    %421 = vector.broadcast %cst_190 : f32 to vector<2x1xf32>
    %422 = arith.addf %418, %421 : vector<2x1xf32>
    %423 = math.rsqrt %422 : vector<2x1xf32>
    %424 = vector.broadcast %423 : vector<2x1xf32> to vector<2x16xf32>
    %425 = arith.mulf %420, %424 : vector<2x16xf32>
    %426 = vector.broadcast %406 : vector<1x16xf32> to vector<2x16xf32>
    %427 = arith.mulf %425, %426 : vector<2x16xf32>
    %428 = vector.broadcast %407 : vector<1x16xf32> to vector<2x16xf32>
    %429 = arith.addf %427, %428 : vector<2x16xf32>
    %cst_191 = arith.constant 0.000000e+00 : f32
    %430 = vector.broadcast %cst_191 : f32 to vector<2x16xf32>
    %431 = arith.maximumf %429, %430 : vector<2x16xf32>
    %c1608 = arith.constant 1608 : index
    %c0_192 = arith.constant 0 : index
    %432 = vector.load %arg2[%c1608, %c0_192] : memref<1720x128xf32, #tpu.memory_space<vmem>>, vector<16x1xf32>
    %cst_193 = arith.constant dense<0.000000e+00> : vector<2x1xf32>
    %433 = tpu.matmul %431, %432, %cst_193 {dimension_numbers = #tpu.dot_dimension_numbers<[1], [0], [0], [1], [0, 0, 1, 1], [], []>} : vector<2x16xf32>, vector<16x1xf32>, vector<2x1xf32> -> vector<2x1xf32>
    %c1624 = arith.constant 1624 : index
    %c0_194 = arith.constant 0 : index
    %434 = vector.load %arg2[%c1624, %c0_194] : memref<1720x128xf32, #tpu.memory_space<vmem>>, vector<1x1xf32>
    %435 = vector.broadcast %434 : vector<1x1xf32> to vector<2x1xf32>
    %436 = arith.addf %433, %435 : vector<2x1xf32>
    %c0_195 = arith.constant 0 : index
    %c0_196 = arith.constant 0 : index
    %437 = vector.load %arg4[%c0_195, %c0_196] : memref<2x1xf32, #tpu.memory_space<vmem>>, vector<2x1xf32>
    tpu.vector_store %arg4[%c0_195, %c0_196], %436 {strides = array<i32>} : memref<2x1xf32, #tpu.memory_space<vmem>>, vector<2x1xf32>,
    %c1376 = arith.constant 1376 : index
    %c0_197 = arith.constant 0 : index
    %438 = vector.load %arg2[%c1376, %c0_197] : memref<1720x128xf32, #tpu.memory_space<vmem>>, vector<32x24xf32>
    %cst_198 = arith.constant dense<0.000000e+00> : vector<8x24xf32>
    %439 = tpu.matmul %398, %438, %cst_198 {dimension_numbers = #tpu.dot_dimension_numbers<[1], [0], [0], [1], [0, 0, 1, 1], [], []>} : vector<8x32xf32>, vector<32x24xf32>, vector<8x24xf32> -> vector<8x24xf32>
    %c1408 = arith.constant 1408 : index
    %c0_199 = arith.constant 0 : index
    %440 = vector.load %arg2[%c1408, %c0_199] : memref<1720x128xf32, #tpu.memory_space<vmem>>, vector<1x24xf32>
    %441 = vector.broadcast %440 : vector<1x24xf32> to vector<8x24xf32>
    %442 = arith.addf %439, %441 : vector<8x24xf32>
    %c1416 = arith.constant 1416 : index
    %c0_200 = arith.constant 0 : index
    %443 = vector.load %arg2[%c1416, %c0_200] : memref<1720x128xf32, #tpu.memory_space<vmem>>, vector<1x24xf32>
    %c1424 = arith.constant 1424 : index
    %c0_201 = arith.constant 0 : index
    %444 = vector.load %arg2[%c1424, %c0_201] : memref<1720x128xf32, #tpu.memory_space<vmem>>, vector<1x24xf32>
    %cst_202 = arith.constant dense<0.000000e+00> : vector<8xf32>
    %445 = vector.multi_reduction <add>, %442, %cst_202 [1] : vector<8x24xf32> to vector<8xf32>
    %446 = vector.shape_cast %445 : vector<8xf32> to vector<8x1xf32>
    %cst_203 = arith.constant 2.400000e+01 : f32
    %447 = vector.broadcast %cst_203 : f32 to vector<8x1xf32>
    %448 = arith.divf %446, %447 : vector<8x1xf32>
    %449 = vector.broadcast %448 : vector<8x1xf32> to vector<8x24xf32>
    %450 = arith.subf %442, %449 : vector<8x24xf32>
    %451 = arith.mulf %450, %450 : vector<8x24xf32>
    %cst_204 = arith.constant dense<0.000000e+00> : vector<8xf32>
    %452 = vector.multi_reduction <add>, %451, %cst_204 [1] : vector<8x24xf32> to vector<8xf32>
    %453 = vector.shape_cast %452 : vector<8xf32> to vector<8x1xf32>
    %cst_205 = arith.constant 2.400000e+01 : f32
    %454 = vector.broadcast %cst_205 : f32 to vector<8x1xf32>
    %455 = arith.divf %453, %454 : vector<8x1xf32>
    %456 = vector.broadcast %448 : vector<8x1xf32> to vector<8x24xf32>
    %457 = arith.subf %442, %456 : vector<8x24xf32>
    %cst_206 = arith.constant 9.99999974E-6 : f32
    %458 = vector.broadcast %cst_206 : f32 to vector<8x1xf32>
    %459 = arith.addf %455, %458 : vector<8x1xf32>
    %460 = math.rsqrt %459 : vector<8x1xf32>
    %461 = vector.broadcast %460 : vector<8x1xf32> to vector<8x24xf32>
    %462 = arith.mulf %457, %461 : vector<8x24xf32>
    %463 = vector.broadcast %443 : vector<1x24xf32> to vector<8x24xf32>
    %464 = arith.mulf %462, %463 : vector<8x24xf32>
    %465 = vector.broadcast %444 : vector<1x24xf32> to vector<8x24xf32>
    %466 = arith.addf %464, %465 : vector<8x24xf32>
    %cst_207 = arith.constant 0.000000e+00 : f32
    %467 = vector.broadcast %cst_207 : f32 to vector<8x24xf32>
    %468 = arith.maximumf %466, %467 : vector<8x24xf32>
    %c1432 = arith.constant 1432 : index
    %c0_208 = arith.constant 0 : index
    %469 = vector.load %arg2[%c1432, %c0_208] : memref<1720x128xf32, #tpu.memory_space<vmem>>, vector<24x16xf32>
    %cst_209 = arith.constant dense<0.000000e+00> : vector<8x16xf32>
    %470 = tpu.matmul %468, %469, %cst_209 {dimension_numbers = #tpu.dot_dimension_numbers<[1], [0], [0], [1], [0, 0, 1, 1], [], []>} : vector<8x24xf32>, vector<24x16xf32>, vector<8x16xf32> -> vector<8x16xf32>
    %c1456 = arith.constant 1456 : index
    %c0_210 = arith.constant 0 : index
    %471 = vector.load %arg2[%c1456, %c0_210] : memref<1720x128xf32, #tpu.memory_space<vmem>>, vector<1x16xf32>
    %472 = vector.broadcast %471 : vector<1x16xf32> to vector<8x16xf32>
    %473 = arith.addf %470, %472 : vector<8x16xf32>
    %c1464 = arith.constant 1464 : index
    %c0_211 = arith.constant 0 : index
    %474 = vector.load %arg2[%c1464, %c0_211] : memref<1720x128xf32, #tpu.memory_space<vmem>>, vector<32x24xf32>
    %cst_212 = arith.constant dense<0.000000e+00> : vector<8x24xf32>
    %475 = tpu.matmul %398, %474, %cst_212 {dimension_numbers = #tpu.dot_dimension_numbers<[1], [0], [0], [1], [0, 0, 1, 1], [], []>} : vector<8x32xf32>, vector<32x24xf32>, vector<8x24xf32> -> vector<8x24xf32>
    %c1496 = arith.constant 1496 : index
    %c0_213 = arith.constant 0 : index
    %476 = vector.load %arg2[%c1496, %c0_213] : memref<1720x128xf32, #tpu.memory_space<vmem>>, vector<1x24xf32>
    %477 = vector.broadcast %476 : vector<1x24xf32> to vector<8x24xf32>
    %478 = arith.addf %475, %477 : vector<8x24xf32>
    %c1504 = arith.constant 1504 : index
    %c0_214 = arith.constant 0 : index
    %479 = vector.load %arg2[%c1504, %c0_214] : memref<1720x128xf32, #tpu.memory_space<vmem>>, vector<1x24xf32>
    %c1512 = arith.constant 1512 : index
    %c0_215 = arith.constant 0 : index
    %480 = vector.load %arg2[%c1512, %c0_215] : memref<1720x128xf32, #tpu.memory_space<vmem>>, vector<1x24xf32>
    %cst_216 = arith.constant dense<0.000000e+00> : vector<8xf32>
    %481 = vector.multi_reduction <add>, %478, %cst_216 [1] : vector<8x24xf32> to vector<8xf32>
    %482 = vector.shape_cast %481 : vector<8xf32> to vector<8x1xf32>
    %cst_217 = arith.constant 2.400000e+01 : f32
    %483 = vector.broadcast %cst_217 : f32 to vector<8x1xf32>
    %484 = arith.divf %482, %483 : vector<8x1xf32>
    %485 = vector.broadcast %484 : vector<8x1xf32> to vector<8x24xf32>
    %486 = arith.subf %478, %485 : vector<8x24xf32>
    %487 = arith.mulf %486, %486 : vector<8x24xf32>
    %cst_218 = arith.constant dense<0.000000e+00> : vector<8xf32>
    %488 = vector.multi_reduction <add>, %487, %cst_218 [1] : vector<8x24xf32> to vector<8xf32>
    %489 = vector.shape_cast %488 : vector<8xf32> to vector<8x1xf32>
    %cst_219 = arith.constant 2.400000e+01 : f32
    %490 = vector.broadcast %cst_219 : f32 to vector<8x1xf32>
    %491 = arith.divf %489, %490 : vector<8x1xf32>
    %492 = vector.broadcast %484 : vector<8x1xf32> to vector<8x24xf32>
    %493 = arith.subf %478, %492 : vector<8x24xf32>
    %cst_220 = arith.constant 9.99999974E-6 : f32
    %494 = vector.broadcast %cst_220 : f32 to vector<8x1xf32>
    %495 = arith.addf %491, %494 : vector<8x1xf32>
    %496 = math.rsqrt %495 : vector<8x1xf32>
    %497 = vector.broadcast %496 : vector<8x1xf32> to vector<8x24xf32>
    %498 = arith.mulf %493, %497 : vector<8x24xf32>
    %499 = vector.broadcast %479 : vector<1x24xf32> to vector<8x24xf32>
    %500 = arith.mulf %498, %499 : vector<8x24xf32>
    %501 = vector.broadcast %480 : vector<1x24xf32> to vector<8x24xf32>
    %502 = arith.addf %500, %501 : vector<8x24xf32>
    %cst_221 = arith.constant 0.000000e+00 : f32
    %503 = vector.broadcast %cst_221 : f32 to vector<8x24xf32>
    %504 = arith.maximumf %502, %503 : vector<8x24xf32>
    %c1520 = arith.constant 1520 : index
    %c0_222 = arith.constant 0 : index
    %505 = vector.load %arg2[%c1520, %c0_222] : memref<1720x128xf32, #tpu.memory_space<vmem>>, vector<24x16xf32>
    %cst_223 = arith.constant dense<0.000000e+00> : vector<8x16xf32>
    %506 = tpu.matmul %504, %505, %cst_223 {dimension_numbers = #tpu.dot_dimension_numbers<[1], [0], [0], [1], [0, 0, 1, 1], [], []>} : vector<8x24xf32>, vector<24x16xf32>, vector<8x16xf32> -> vector<8x16xf32>
    %c1544 = arith.constant 1544 : index
    %c0_224 = arith.constant 0 : index
    %507 = vector.load %arg2[%c1544, %c0_224] : memref<1720x128xf32, #tpu.memory_space<vmem>>, vector<1x16xf32>
    %508 = vector.broadcast %507 : vector<1x16xf32> to vector<8x16xf32>
    %509 = arith.addf %506, %508 : vector<8x16xf32>
    %510 = vector.extract_strided_slice %473 {offsets = [0, 0], sizes = [4, 16], strides = [1, 1]} : vector<8x16xf32> to vector<4x16xf32>
    %511 = vector.extract_strided_slice %509 {offsets = [0, 0], sizes = [4, 16], strides = [1, 1]} : vector<8x16xf32> to vector<4x16xf32>
    %cst_225 = arith.constant dense<0.000000e+00> : vector<4x4xf32>
    %512 = tpu.matmul %510, %511, %cst_225 {dimension_numbers = #tpu.dot_dimension_numbers<[1], [1], [0], [0], [0, 0, 1, 0], [], []>} : vector<4x16xf32>, vector<4x16xf32>, vector<4x4xf32> -> vector<4x4xf32>
    %c0_226 = arith.constant 0 : index
    %c0_227 = arith.constant 0 : index
    %513 = vector.load %arg3[%c0_226, %c0_227] : memref<8x4xf32, #tpu.memory_space<vmem>>, vector<4x4xf32>
    tpu.vector_store %arg3[%c0_226, %c0_227], %512 {strides = array<i32>} : memref<8x4xf32, #tpu.memory_space<vmem>>, vector<4x4xf32>,
    %514 = vector.extract_strided_slice %473 {offsets = [4, 0], sizes = [4, 16], strides = [1, 1]} : vector<8x16xf32> to vector<4x16xf32>
    %515 = vector.extract_strided_slice %509 {offsets = [4, 0], sizes = [4, 16], strides = [1, 1]} : vector<8x16xf32> to vector<4x16xf32>
    %cst_228 = arith.constant dense<0.000000e+00> : vector<4x4xf32>
    %516 = tpu.matmul %514, %515, %cst_228 {dimension_numbers = #tpu.dot_dimension_numbers<[1], [1], [0], [0], [0, 0, 1, 0], [], []>} : vector<4x16xf32>, vector<4x16xf32>, vector<4x4xf32> -> vector<4x4xf32>
    %c4 = arith.constant 4 : index
    %c0_229 = arith.constant 0 : index
    %517 = vector.load %arg3[%c4, %c0_229] : memref<8x4xf32, #tpu.memory_space<vmem>>, vector<4x4xf32>
    tpu.vector_store %arg3[%c4, %c0_229], %516 {strides = array<i32>} : memref<8x4xf32, #tpu.memory_space<vmem>>, vector<4x4xf32>,
    return
  }
}

</mosaic_0001>

<bundles_post_ra>
// kernel: forward.1
= control target key start
LH: loop header
LB: loop body
LE: loop exit
PB: predicated region body
PF: predicated region fallthrough
CT: control target
= control target key end

     0   :  { %10 = vsyncpa [#allocation3], 0  ;;  %s12068_s0 = inlined_call_operand.vmem [shape: f32[6,8], index: 0, kind: input, shape index: {}]   ;;  %s12069_s1 = inlined_call_operand.vmem [shape: f32[30,16], index: 1, kind: input, shape index: {}]   ;;  %s12070_s2 = inlined_call_operand.hbm [shape: f32[1720,128], index: 2, kind: input, shape index: {}]   ;;  %s12071_s3 = inlined_call_operand.hbm [shape: f32[8,4], index: 3, kind: output, shape index: {0}]   ;;  %s12072_s4 = inlined_call_operand.vmem [shape: f32[2,1], index: 4, kind: output, shape index: {1}]  }
   0x1   :  { %11 = vsyncpa [#allocation4], 0  ;;  %s10383_s15 = smov [#allocation2]   ;;  %s10335_s19 = scalar_lea.hbm %s12070_s2, 27520 }
   0x2   :  { %s21_s16 = sshll.u32 %s10383_s15, 4  ;;  %p10336_p0 = scmp.ne.s32.totalorder %s12070_s2, %s10335_s19  ;;  %s22_s16 = int_to_ptr.vmem [resolvable:$true] %s21_s16 }
   0x3   :  { %p10339_p1 = scmp.lt.u32.totalorder %s10335_s19, %s12070_s2 }
   0x5   :  { %p10341_p2 = pnand %p10339_p1, %p10336_p0 }
   0x7   :  { %10344 = shalt.err (!%p10341_p2)
}
   0x8   :  { %s10345_s24 = scalar_lea.vmem %s22_s16, 27520  ;;  %p10350_p4 = scmp.lt.s32.totalorder %s22_s16, %s22_s16 }
   0x9   :  { %p10346_p3 = scmp.ne.s32.totalorder %s22_s16, %s10345_s24  ;;  %p10351_p5 = scmp.lt.s32.totalorder %s10345_s24, %s10345_s24 }
   0xb   :  { %p10352_p6 = por %p10351_p5, %p10350_p4 }
   0xd   :  { %p10353_p7 = pnand %p10352_p6, %p10346_p3 }
   0xf   :  { %10356 = shalt.err (!%p10353_p7)
}
  0x10   :  { %s10384_s25 = smov 128   ;;  %s10385_s26 = smov 8  }
  0x11   :  { %27 = dma.hbm_to_vmem [thread:$0]  %s12070_s2, 27520, %s22_s16, [#allocation3], %s10384_s25, %s10384_s25, %s10385_s26  }
  0x12   :  { %10379 = dma.done.wait [#allocation3], 27520  }
  0x13   :  { %10380 = vsyncadd [#allocation3], 4294939776  ;;  %v10386_v0 = vmov 0.0   ;;  %vm10387_vm0 = vmmov 0   ;;  %vm38_vm1 = vcmask 64512   ;;  %v32_v1 = vld [vmem:[#allocation2] sm:$0xff] }
  0x14   :  { %8494 = vmatprep.subr.mxu0 %v10386_v0  ;;  %8496 = vmatprep.mubr.msk.f32.mxu0 %vm10387_vm0, %v10386_v0  ;;  %v31_v2 = vld [vmem:[%s12068_s0] sm:$0x3f]  ;;  %v221_v3 = vld [vmem:[#allocation2 + $0x688] sm:$0xff]  ;;  %vm225_vm2 = vcmask 48128   ;;  %v116_v4 = vld [vmem:[#allocation2 + $0x10] sm:$0xff]  ;;  %vm123_vm3 = vcmask 130048  }
  0x15   :  { %8495 = vmatpush3.msra.mxu0 %v32_v1  ;;  %v117_v5 = vld [vmem:[#allocation2 + $0x18] sm:$0xff]  ;;  %v112_v6 = vld [vmem:[%s12069_s1] sm:$0xff]  ;;  %v113_v8 = vld [vmem:[%s12069_s1 + $0x8] sm:$0xff]  ;;  %vm238_vm4 = vcmask 1045504   ;;  %v10388_v21 = vmov 0.0|0.0   ;;  %vm383_vm5 = vcmask 261120  }
  0x16   :  { %8497 = vmatmul.mubr.msk.f32.vlgmr.msra.gmra.mrb[0].mxu0 %vm38_vm1, %v31_v2  ;;  %v9791_v7 = vpack.c.bf16 %v117_v5, %v116_v4  ;;  %8503 = vmatprep.mubr.msk.f32.mxu1 %vm123_vm3, %v112_v6  ;;  %v114_v9 = vld [vmem:[%s12069_s1 + $0x10] sm:$0xff]  ;;  %v115_v10 = vld [vmem:[%s12069_s1 + $0x18] sm:$0x3f]  ;;  %v7595_v11 = vld [vmem:[#allocation2 + $0x8] ss:$0 sm:$0xff]  ;;  %s10389_s1 = smov 16  }
  0x17   :  { %8511 = vmatprep.mubr.msk.f32.mxu0 %vm225_vm2, %v221_v3  ;;  %v222_v15 = vld [vmem:[#allocation2 + $0x690] sm:$0xff]  ;;  %v223_v16 = vld [vmem:[#allocation2 + $0x698] sm:$0xff]  ;;  %v224_v17 = vld [vmem:[#allocation2 + $0x6a0] sm:$0x3f]  ;;  %vm875_vm7 = vcmask 1043456   ;;  %vm803_vm8 = vcmask 293888  }
  0x18   :  { %9792 = vmatprep.subr.bf16.mxu1 %v9791_v7  ;;  %v374_v18 = vld [vmem:[#allocation2 + $0x30] sm:$0xff]  ;;  %v375_v19 = vld [vmem:[#allocation2 + $0x38] sm:$0xff]  ;;  %v486_v24 = vld [vmem:[#allocation2 + $0x60] sm:$0xff]  ;;  %vm816_vm9 = vcmask 289792   ;;  %vm3172_vm10 = vcmask 257024   ;;  %vm3377_vm11 = vcmask 523264  }
  0x19   :  { %9794 = vmatpush3.bf16.msra.mxu1 %v9791_v7  ;;  %v9796_v22 = vpack.c.bf16 %v375_v19, %v374_v18  ;;  %v485_v23 = vld [vmem:[#allocation2 + $0x58] sm:$0xff]  ;;  %v376_v27 = vld [vmem:[#allocation2 + $0x40] sm:$0xff]  ;;  %v377_v28 = vld [vmem:[#allocation2 + $0x48] sm:$0xff]  ;;  %vm6936_vm12 = vcmask 123904   ;;  %vm7042_vm13 = vcmask 1024   ;;  %vm7128_vm14 = vcmask 195584  }
  0x1a   :  { %9795 = vmatprep.subr.bf16.mxu1 %v10388_v21  ;;  %v9802_v26 = vpack.c.bf16 %v486_v24, %v485_v23  ;;  %v487_v29 = vld [vmem:[#allocation2 + $0x68] sm:$0xff]  ;;  %v9799_v30 = vpack.c.bf16 %v377_v28, %v376_v27  ;;  %v488_v31 = vld [vmem:[#allocation2 + $0x70] sm:$0xff]  ;;  %v7597_v39 = vld [vmem:[#allocation2 + $0x20] ss:$0 sm:$0xff]  ;;  %vm7497_vm15 = vcmask 27648  }
  0x1b   :  { %v9805_v33 = vpack.c.bf16 %v488_v31, %v487_v29  ;;  %v584_v42 = vld [vmem:[#allocation2 + $0x80] sm:$0xff]  ;;  %v585_v43 = vld [vmem:[#allocation2 + $0x88] sm:$0xff]  ;;  %v586_v53 = vld [vmem:[#allocation2 + $0x90] sm:$0xff] }
  0x1c   :  { %8504 = vmatmul.mubr.msk.f32.vlgmr.msra.gmra.mrb[0].mxu1 %vm123_vm3, %v113_v8  ;;  %v7607_v44 = vld [vmem:[#allocation2 + $0x28] ss:$0 sm:$0xff]  ;;  %v9808_v49 = vpack.c.bf16 %v585_v43, %v584_v42  ;;  %v587_v54 = vld [vmem:[#allocation2 + $0x98] sm:$0xff]  ;;  %vm10550_vm6 = vmpackc.low %vm38_vm1, %vm38_vm1 }
  0x1d   :  { %8506 = vmatprep.mubr.msk.f32.mxu1 %vm123_vm3, %v114_v9  ;;  %9797 = vmatpush3.bf16.msra.mxu1 %v9796_v22  ;;  %v9811_v60 = vpack.c.bf16 %v587_v54, %v586_v53  ;;  %v7614_v8 = vld [vmem:[#allocation2 + $0x78] ss:$0 sm:$0xff] }
  0x1e   :  { %9798 = vmatprep.subr.bf16.mxu1 %v10388_v21 }
  0x20   :  { %8507 = vmatmul.mubr.msk.f32.gmra.mrb[2].mxu1 %vm123_vm3, %v115_v10 }
  0x21   :  { %8525 = vmatprep.mubr.msk.f32.mxu1 %vm10387_vm0, %v10386_v0  ;;  %9800 = vmatpush3.bf16.msra.mxu1 %v9799_v30 }
  0x22   :  { %9807 = vmatprep.subr.bf16.mxu1 %v10388_v21 }
  0xe9   :  { %v108_v12 = vpop.f32.mrb[0].mxu0 }
  0xea   :  { %v109_v13 = vadd.f32 %v7595_v11, %v108_v12  ;;  %v8498_v14 = vpop.f32.mrb[1].mxu0 }
  0xec   :  { %8509 = vmatprep.subr.msk.mxu0 %vm238_vm4, %v109_v13 }
  0xed   :  { %8510 = vmatpush3.msk.msra.mxu0 %vm238_vm4, %v109_v13 }
  0xee   :  { %8512 = vmatmul.mubr.msk.f32.vlgmr.msra.gmra.mrb[2].mxu0 %vm225_vm2, %v222_v15  ;;  %9801 = vmatprep.subr.bf16.mxu0 %v10388_v21 }
  0xef   :  { %8514 = vmatprep.mubr.msk.f32.mxu0 %vm225_vm2, %v223_v16  ;;  %v8505_v20 = vpop.f32.mrb[0].mxu1  ;;  %9803 = vmatpush3.bf16.msra.mxu0 %v9802_v26 }
  0xf0   :  { %v202_v25 = vpop.f32.mrb[1].mxu1  ;;  %9804 = vmatprep.subr.bf16.mxu0 %v10388_v21  ;;  %v208_v48 = vadd.f32 %v8505_v20, %v7597_v39 }
  0xf1   :  { %v203_v40 = vadd.f32 %v7597_v39, %v202_v25 }
  0xf2   :  { %8515 = vmatmul.mubr.msk.f32.gmra.mrb[4].mxu0 %vm225_vm2, %v224_v17 }
  0xf3   :  { %8548 = vmatprep.mubr.msk.f32.mxu0 %vm10387_vm0, %v10386_v0  ;;  %v8508_v32 = vpop.f32.mrb[2].mxu1  ;;  %9806 = vmatpush3.bf16.msra.mxu0 %v9805_v33 }
  0xf4   :  { %v212_v34 = vpop.f32.mrb[3].mxu1  ;;  %9813 = vmatprep.subr.bf16.mxu0 %v10388_v21  ;;  %v218_v55 = vadd.f32 %v8508_v32, %v7597_v39 }
  0xf5   :  { %v213_v46 = vadd.f32 %v7597_v39, %v212_v34  ;;  %v971_v39 = vld [vmem:[#allocation2 + $0xb8] sm:$0xff] }
 0x1c1   :  { %v8513_v35 = vpop.f32.mrb[2].mxu0 }
 0x1c2   :  { %v308_v36 = vpop.f32.mrb[3].mxu0 }
 0x1c3   :  { %331 = vrot.lane.b32.xlu0 %v308_v36, %s10389_s1  ;;  %v7608_v36 = vld [vmem:[#allocation2 + $0x50] ss:$0 sm:$0xff] }
 0x1c5   :  { %v8516_v37 = vpop.f32.mrb[4].mxu0 }
 0x1c6   :  { %v318_v38 = vpop.f32.mrb[5].mxu0 }
 0x1c7   :  { %333 = vrot.lane.b32.xlu0 %v8513_v35, %s10389_s1  ;;  %335 = vrot.lane.b32.xlu1 %v318_v38, %s10389_s1  ;;  %v7620_v35 = vld [vmem:[#allocation2 + $0xa0] ss:$0 sm:$0xff]  ;;  %v970_v38 = vld [vmem:[#allocation2 + $0xb0] sm:$0xff] }
 0x1cb   :  { %337 = vrot.lane.b32.xlu1 %v8516_v37, %s10389_s1 }
 0x235   :  { %v332_v41 = vpop.permute.xlu0 %331 }
 0x236   :  { %v343_v45 = vsel %vm123_vm3, %v203_v40, %v332_v41 }
 0x237   :  { %v356_v47 = vrot.slane %v343_v45, 2  ;;  %v9828_v45 = vpack.c.bf16 %v971_v39, %v970_v38 }
 0x239   :  { %v10469_v50 = vsel %vm238_vm4, %v7607_v44, %v356_v47  ;;  %v334_v51 = vpop.permute.xlu0 %333  ;;  %v336_v52 = vpop.permute.xlu1 %335 }
 0x23a   :  { %v344_v56 = vsel %vm123_vm3, %v208_v48, %v334_v51  ;;  %v345_v57 = vsel %vm123_vm3, %v213_v46, %v336_v52  ;;  %8526 = vmatmul.mubr.msk.f32.vlgmr.msra.gmra.mrb[4].mxu1 %vm383_vm5, %v10469_v50  ;;  %8549 = vmatmul.mubr.msk.f32.vlgmr.msra.gmra.mrb[6].mxu0 %vm383_vm5, %v10469_v50  ;;  %v973_v48 = vld [vmem:[#allocation2 + $0xc8] sm:$0xff] }
 0x23b   :  { %v357_v58 = vrot.slane %v344_v56, 2  ;;  %v359_v59 = vrot.slane %v345_v57, 2  ;;  %8528 = vmatprep.mubr.msk.f32.mxu1 %vm10387_vm0, %v10386_v0  ;;  %8551 = vmatprep.mubr.msk.f32.mxu0 %vm10387_vm0, %v10386_v0 }
 0x23c   :  { %9809 = vmatpush3.bf16.msra.mxu1 %v9808_v49 }
 0x23d   :  { %v10482_v61 = vsel %vm238_vm4, %v356_v47, %v357_v58  ;;  %v10485_v62 = vsel %vm238_vm4, %v357_v58, %v359_v59  ;;  %v338_v63 = vpop.permute.xlu1 %337  ;;  %9810 = vmatprep.subr.bf16.mxu1 %v10388_v21  ;;  %v972_v47 = vld [vmem:[#allocation2 + $0xc0] sm:$0xff] }
 0x23e   :  { %v346_v1 = vsel %vm123_vm3, %v218_v55, %v338_v63  ;;  %8529 = vmatmul.mubr.msk.f32.gmra.mrb[6].mxu1 %vm383_vm5, %v10482_v61  ;;  %8552 = vmatmul.mubr.msk.f32.gmra.mrb[8].mxu0 %vm383_vm5, %v10482_v61  ;;  %v9831_v53 = vpack.c.bf16 %v973_v48, %v972_v47 }
 0x23f   :  { %8531 = vmatprep.mubr.msk.f32.mxu1 %vm10387_vm0, %v10386_v0  ;;  %8554 = vmatprep.mubr.msk.f32.mxu0 %vm10387_vm0, %v10386_v0  ;;  %v10497_v2 = vrot.slane %v346_v1, 2 }
 0x240   :  { %9812 = vmatpush3.bf16.msra.mxu1 %v9811_v60 }
 0x241   :  { %9821 = vmatprep.subr.bf16.mxu1 %v10388_v21  ;;  %v10510_v3 = vsel %vm238_vm4, %v359_v59, %v10497_v2 }
 0x242   :  { %8532 = vmatmul.mubr.msk.f32.gmra.mrb[8].mxu1 %vm383_vm5, %v10485_v62  ;;  %8555 = vmatmul.mubr.msk.f32.gmra.mrb[10].mxu0 %vm383_vm5, %v10485_v62 }
 0x243   :  { %8534 = vmatprep.mubr.msk.f32.mxu1 %vm10387_vm0, %v10386_v0  ;;  %8557 = vmatprep.mubr.msk.f32.mxu0 %vm10387_vm0, %v10386_v0 }
 0x246   :  { %8535 = vmatmul.mubr.msk.f32.gmra.mrb[10].mxu1 %vm383_vm5, %v10510_v3  ;;  %8558 = vmatmul.mubr.msk.f32.gmra.mrb[12].mxu0 %vm383_vm5, %v10510_v3 }
 0x247   :  { %8537 = vmatprep.mubr.msk.f32.mxu1 %vm10387_vm0, %v10386_v0  ;;  %8560 = vmatprep.mubr.msk.f32.mxu0 %vm10387_vm0, %v10386_v0 }
 0x24a   :  { %8538 = vmatmul.mubr.msk.f32.gmra.mrb[12].mxu1 %vm383_vm5, %v10497_v2  ;;  %8561 = vmatmul.mubr.msk.f32.gmra.mrb[14].mxu0 %vm383_vm5, %v10497_v2 }
 0x24b   :  { %8571 = vmatprep.mubr.msk.f32.mxu1 %vm10387_vm0, %v10386_v0  ;;  %8596 = vmatprep.mubr.msk.f32.mxu0 %vm10387_vm0, %v10386_v0 }
 0x24e   :  { %8572 = vmatmul.mubr.msk.f32.vlgmr.msra.gmra.mrb[14].mxu1 %vm383_vm5, %v10469_v50 }
 0x24f   :  { %8574 = vmatprep.mubr.msk.f32.mxu1 %vm10387_vm0, %v10386_v0 }
 0x252   :  { %8575 = vmatmul.mubr.msk.f32.gmra.mrb[16].mxu1 %vm383_vm5, %v10482_v61 }
 0x253   :  { %8577 = vmatprep.mubr.msk.f32.mxu1 %vm10387_vm0, %v10386_v0 }
 0x256   :  { %8578 = vmatmul.mubr.msk.f32.gmra.mrb[18].mxu1 %vm383_vm5, %v10485_v62 }
 0x257   :  { %8580 = vmatprep.mubr.msk.f32.mxu1 %vm10387_vm0, %v10386_v0 }
 0x25a   :  { %8581 = vmatmul.mubr.msk.f32.gmra.mrb[20].mxu1 %vm383_vm5, %v10510_v3 }
 0x25b   :  { %8583 = vmatprep.mubr.msk.f32.mxu1 %vm10387_vm0, %v10386_v0 }
 0x25e   :  { %8584 = vmatmul.mubr.msk.f32.gmra.mrb[22].mxu1 %vm383_vm5, %v10497_v2 }
 0x25f   :  { %8621 = vmatprep.mubr.msk.f32.mxu1 %vm10387_vm0, %v10386_v0 }
 0x30d   :  { %v461_v4 = vpop.f32.mrb[4].mxu1  ;;  %v560_v5 = vpop.f32.mrb[6].mxu0 }
 0x30e   :  { %v8527_v6 = vpop.f32.mrb[5].mxu1  ;;  %v8550_v7 = vpop.f32.mrb[7].mxu0  ;;  %v561_v11 = vadd.f32 %v7614_v8, %v560_v5  ;;  %v462_v44 = vadd.f32 %v7608_v36, %v461_v4 }
 0x30f   :  { %v1168_v6 = vld [vmem:[#allocation2 + $0x100] sm:$0xff]  ;;  %v1169_v7 = vld [vmem:[#allocation2 + $0x108] sm:$0xff] }
 0x311   :  { %v466_v9 = vpop.f32.mrb[6].mxu1  ;;  %v565_v10 = vpop.f32.mrb[8].mxu0 }
 0x312   :  { %v566_v12 = vadd.f32 %v7614_v8, %v565_v10  ;;  %v8530_v13 = vpop.f32.mrb[7].mxu1  ;;  %v8553_v14 = vpop.f32.mrb[9].mxu0  ;;  %v467_v52 = vadd.f32 %v7608_v36, %v466_v9  ;;  %v1170_v9 = vld [vmem:[#allocation2 + $0x110] sm:$0xff]  ;;  %v1171_v10 = vld [vmem:[#allocation2 + $0x118] sm:$0xff] }
 0x314   :  { %v9814_v16 = vpack.c.bf16 %v566_v12, %v561_v11  ;;  %v9843_v11 = vpack.c.bf16 %v1171_v10, %v1170_v9  ;;  %v10625_v12 = vld [vmem:[#allocation2 + $0x660] sm:$0xff] }
 0x315   :  { %v471_v17 = vpop.f32.mrb[8].mxu1  ;;  %v570_v18 = vpop.f32.mrb[10].mxu0 }
 0x316   :  { %v8533_v19 = vpop.f32.mrb[9].mxu1  ;;  %v8556_v20 = vpop.f32.mrb[11].mxu0  ;;  %9816 = vmatpush3.bf16.xpose.msk.msra.mxu0 %vm10550_vm6, %v9814_v16  ;;  %v571_v24 = vadd.f32 %v7614_v8, %v570_v18  ;;  %v472_v58 = vadd.f32 %v7608_v36, %v471_v17  ;;  %v10630_v17 = vld [vmem:[#allocation2 + $0x668] sm:$0xff] }
 0x317   :  { %9817 = vmatprep.subr.bf16.mxu0 %v10388_v21 }
 0x319   :  { %v476_v22 = vpop.f32.mrb[10].mxu1  ;;  %v575_v23 = vpop.f32.mrb[12].mxu0 }
 0x31a   :  { %v576_v25 = vadd.f32 %v7614_v8, %v575_v23  ;;  %v8536_v26 = vpop.f32.mrb[11].mxu1  ;;  %v8559_v27 = vpop.f32.mrb[13].mxu0  ;;  %v477_v1 = vadd.f32 %v7608_v36, %v476_v22  ;;  %v10635_v23 = vld [vmem:[#allocation2 + $0x670] sm:$0xff] }
 0x31c   :  { %v9818_v28 = vpack.c.bf16 %v576_v25, %v571_v24 }
 0x31d   :  { %v481_v29 = vpop.f32.mrb[12].mxu1  ;;  %v580_v30 = vpop.f32.mrb[14].mxu0 }
 0x31e   :  { %v8539_v31 = vpop.f32.mrb[13].mxu1  ;;  %v8562_v32 = vpop.f32.mrb[15].mxu0  ;;  %9820 = vmatpush3.bf16.xpose.msk.msra.mxu0 %vm10550_vm6, %v9818_v28  ;;  %v581_v37 = vadd.f32 %v7614_v8, %v580_v30  ;;  %v482_v5 = vadd.f32 %v7608_v36, %v481_v29  ;;  %v9840_v8 = vpack.c.bf16 %v1169_v7, %v1168_v6  ;;  %v10639_v28 = vld [vmem:[#allocation2 + $0x678] sm:$0xff] }
 0x31f   :  { %8594 = vmatprep.subr.mxu0 %v10386_v0 }
 0x321   :  { %v659_v33 = vpop.f32.mrb[14].mxu1 }
 0x322   :  { %v8573_v34 = vpop.f32.mrb[15].mxu1  ;;  %v660_v41 = vadd.f32 %v7620_v35, %v659_v33  ;;  %v10643_v33 = vld [vmem:[#allocation2 + $0x680] sm:$0xf] }
 0x325   :  { %v664_v40 = vpop.f32.mrb[16].mxu1 }
 0x326   :  { %v665_v42 = vadd.f32 %v7620_v35, %v664_v40  ;;  %v8576_v43 = vpop.f32.mrb[17].mxu1  ;;  %8595 = vmatpush3.xpose.msk.msra.mxu0 %vm38_vm1, %v581_v37 }
 0x327   :  { %9827 = vmatprep.subr.bf16.mxu0 %v10388_v21 }
 0x328   :  { %v9822_v46 = vpack.c.bf16 %v665_v42, %v660_v41 }
 0x329   :  { %v669_v49 = vpop.f32.mrb[18].mxu1  ;;  %8597 = vmatmul.mubr.msk.f32.vlgmr.msra.gmra.mrb[16].mxu0 %vm38_vm1, %v462_v44 }
 0x32a   :  { %v8579_v51 = vpop.f32.mrb[19].mxu1  ;;  %9823 = vmatpush3.bf16.msra.mxu1 %v9822_v46  ;;  %8599 = vmatprep.mubr.msk.f32.mxu0 %vm10387_vm0, %v10386_v0  ;;  %v670_v55 = vadd.f32 %v7620_v35, %v669_v49 }
 0x32b   :  { %9824 = vmatprep.subr.bf16.mxu1 %v10388_v21  ;;  %9829 = vmatpush3.bf16.msra.mxu0 %v9828_v45 }
 0x32c   :  { %9830 = vmatprep.subr.bf16.mxu0 %v10388_v21 }
 0x32d   :  { %v674_v54 = vpop.f32.mrb[20].mxu1  ;;  %8600 = vmatmul.mubr.msk.f32.gmra.mrb[18].mxu0 %vm38_vm1, %v467_v52  ;;  %v7654_v52 = vld [vmem:[#allocation2 + $0x120] ss:$0 sm:$0xff] }
 0x32e   :  { %v675_v56 = vadd.f32 %v7620_v35, %v674_v54  ;;  %v8582_v57 = vpop.f32.mrb[21].mxu1  ;;  %8602 = vmatprep.mubr.msk.f32.mxu0 %vm10387_vm0, %v10386_v0 }
 0x32f   :  { %9832 = vmatpush3.bf16.msra.mxu0 %v9831_v53 }
 0x330   :  { %v9825_v59 = vpack.c.bf16 %v675_v56, %v670_v55  ;;  %9839 = vmatprep.subr.bf16.mxu0 %v10388_v21 }
 0x331   :  { %v679_v60 = vpop.f32.mrb[22].mxu1  ;;  %8603 = vmatmul.mubr.msk.f32.gmra.mrb[20].mxu0 %vm38_vm1, %v472_v58 }
 0x332   :  { %v8585_v63 = vpop.f32.mrb[23].mxu1  ;;  %9826 = vmatpush3.bf16.msra.mxu1 %v9825_v59  ;;  %8605 = vmatprep.mubr.msk.f32.mxu0 %vm10387_vm0, %v10386_v0  ;;  %v680_v4 = vadd.f32 %v7620_v35, %v679_v60 }
 0x333   :  { %8619 = vmatprep.subr.mxu1 %v10386_v0 }
 0x335   :  { %8606 = vmatmul.mubr.msk.f32.gmra.mrb[22].mxu0 %vm38_vm1, %v477_v1 }
 0x336   :  { %8620 = vmatpush3.msk.msra.mxu1 %vm875_vm7, %v680_v4  ;;  %8608 = vmatprep.mubr.msk.f32.mxu0 %vm10387_vm0, %v10386_v0 }
 0x337   :  { %9833 = vmatprep.subr.bf16.mxu1 %v10388_v21 }
 0x339   :  { %8609 = vmatmul.mubr.msk.f32.gmra.mrb[24].mxu0 %vm38_vm1, %v482_v5 }
 0x33a   :  { %8644 = vmatprep.mubr.msk.f32.mxu0 %vm10387_vm0, %v10386_v0 }
 0x33d   :  { %8645 = vmatmul.mubr.msk.f32.vlgmr.msra.gmra.mrb[26].mxu0 %vm383_vm5, %v10469_v50 }
 0x33e   :  { %8647 = vmatprep.mubr.msk.f32.mxu0 %vm10387_vm0, %v10386_v0  ;;  %9841 = vmatpush3.bf16.msra.mxu0 %v9840_v8 }
 0x33f   :  { %9842 = vmatprep.subr.bf16.mxu0 %v10388_v21 }
 0x341   :  { %8648 = vmatmul.mubr.msk.f32.gmra.mrb[28].mxu0 %vm383_vm5, %v10482_v61 }
 0x342   :  { %8650 = vmatprep.mubr.msk.f32.mxu0 %vm10387_vm0, %v10386_v0  ;;  %9844 = vmatpush3.bf16.msra.mxu0 %v9843_v11 }
 0x343   :  { %9853 = vmatprep.subr.bf16.mxu0 %v10388_v21 }
 0x345   :  { %8651 = vmatmul.mubr.msk.f32.gmra.mrb[30].mxu0 %vm383_vm5, %v10485_v62 }
 0x346   :  { %8653 = vmatprep.mubr.msk.f32.mxu0 %vm10387_vm0, %v10386_v0 }
 0x349   :  { %8654 = vmatmul.mubr.msk.f32.gmra.mrb[32].mxu0 %vm383_vm5, %v10510_v3 }
 0x34a   :  { %8656 = vmatprep.mubr.msk.f32.mxu0 %vm10387_vm0, %v10386_v0 }
 0x34d   :  { %8657 = vmatmul.mubr.msk.f32.gmra.mrb[34].mxu0 %vm383_vm5, %v10497_v2 }
 0x34e   :  { %8690 = vmatprep.mubr.msk.f32.mxu0 %vm10387_vm0, %v10386_v0 }
 0x351   :  { %8691 = vmatmul.mubr.msk.f32.vlgmr.msra.gmra.mrb[36].mxu0 %vm383_vm5, %v10469_v50 }
 0x352   :  { %8693 = vmatprep.mubr.msk.f32.mxu0 %vm10387_vm0, %v10386_v0 }
 0x355   :  { %8694 = vmatmul.mubr.msk.f32.gmra.mrb[38].mxu0 %vm383_vm5, %v10482_v61 }
 0x356   :  { %8696 = vmatprep.mubr.msk.f32.mxu0 %vm10387_vm0, %v10386_v0 }
 0x359   :  { %8697 = vmatmul.mubr.msk.f32.gmra.mrb[40].mxu0 %vm383_vm5, %v10485_v62 }
 0x35a   :  { %8699 = vmatprep.mubr.msk.f32.mxu0 %vm10387_vm0, %v10386_v0 }
 0x35d   :  { %8700 = vmatmul.mubr.msk.f32.gmra.mrb[42].mxu0 %vm383_vm5, %v10510_v3 }
 0x35e   :  { %8702 = vmatprep.mubr.msk.f32.mxu0 %vm10387_vm0, %v10386_v0 }
 0x361   :  { %8703 = vmatmul.mubr.msk.f32.gmra.mrb[44].mxu0 %vm383_vm5, %v10497_v2 }
 0x362   :  { %8740 = vmatprep.mubr.msk.f32.mxu0 %vm10387_vm0, %v10386_v0 }
 0x3fc   :  { %v779_v13 = vpop.f32.mrb[16].mxu0 }
 0x3fd   :  { %v8598_v14 = vpop.f32.mrb[17].mxu0  ;;  %v10628_v16 = vadd.f32 %v779_v13, %v10625_v12 }
 0x3ff   :  { %v804_v18 = vsel %vm803_vm8, %v10628_v16, -inf }
 0x400   :  { %805 = vmax.xlane.f32.xlu0 %v804_v18  ;;  %v784_v19 = vpop.f32.mrb[18].mxu0 }
 0x401   :  { %v8601_v20 = vpop.f32.mrb[19].mxu0  ;;  %v785_v22 = vadd.f32 %v784_v19, %v10630_v17 }
 0x403   :  { %v807_v24 = vsel %vm803_vm8, %v785_v22, -inf }
 0x404   :  { %808 = vmax.xlane.f32.xlu1 %v807_v24  ;;  %v789_v25 = vpop.f32.mrb[20].mxu0 }
 0x405   :  { %v790_v26 = vadd.f32 %v789_v25, %v10635_v23  ;;  %v8604_v27 = vpop.f32.mrb[21].mxu0 }
 0x407   :  { %v810_v29 = vsel %vm803_vm8, %v790_v26, -inf }
 0x408   :  { %811 = vmax.xlane.f32.xlu0 %v810_v29  ;;  %v794_v30 = vpop.f32.mrb[22].mxu0 }
 0x409   :  { %v795_v31 = vadd.f32 %v794_v30, %v10639_v28  ;;  %v8607_v32 = vpop.f32.mrb[23].mxu0 }
 0x40b   :  { %v813_v34 = vsel %vm803_vm8, %v795_v31, -inf }
 0x40c   :  { %814 = vmax.xlane.f32.xlu0 %v813_v34  ;;  %v799_v35 = vpop.f32.mrb[24].mxu0 }
 0x40d   :  { %v800_v36 = vadd.f32 %v799_v35, %v10643_v33  ;;  %v8610_v37 = vpop.f32.mrb[25].mxu0 }
 0x40f   :  { %v817_v38 = vsel %vm816_vm9, %v800_v36, -inf }
 0x410   :  { %818 = vmax.xlane.f32.xlu1 %v817_v38  ;;  %v10648_v39 = vpop.f32.mrb[26].mxu0 }
 0x411   :  { %v8646_v40 = vpop.f32.mrb[27].mxu0 }
 0x414   :  { %v10650_v41 = vpop.f32.mrb[28].mxu0 }
 0x415   :  { %v8649_v42 = vpop.f32.mrb[29].mxu0 }
 0x418   :  { %v10652_v43 = vpop.f32.mrb[30].mxu0 }
 0x419   :  { %v8652_v44 = vpop.f32.mrb[31].mxu0 }
 0x41c   :  { %v10654_v45 = vpop.f32.mrb[32].mxu0 }
 0x41d   :  { %v8655_v46 = vpop.f32.mrb[33].mxu0 }
 0x420   :  { %v10656_v47 = vpop.f32.mrb[34].mxu0 }
 0x421   :  { %v8658_v48 = vpop.f32.mrb[35].mxu0 }
 0x424   :  { %v1243_v49 = vpop.f32.mrb[36].mxu0 }
 0x425   :  { %v8692_v51 = vpop.f32.mrb[37].mxu0  ;;  %v1244_v54 = vadd.f32 %v7654_v52, %v1243_v49  ;;  %v1069_v49 = vld [vmem:[#allocation2 + $0xd8] sm:$0xff] }
 0x426   :  { %v1070_v51 = vld [vmem:[#allocation2 + $0xe0] sm:$0xff] }
 0x428   :  { %v1248_v53 = vpop.f32.mrb[38].mxu0 }
 0x429   :  { %v1249_v55 = vadd.f32 %v7654_v52, %v1248_v53  ;;  %v8695_v56 = vpop.f32.mrb[39].mxu0  ;;  %v9834_v53 = vpack.c.bf16 %v1070_v51, %v1069_v49 }
 0x42a   :  { %v1071_v56 = vld [vmem:[#allocation2 + $0xe8] sm:$0xff] }
 0x42b   :  { %v9854_v57 = vpack.c.bf16 %v1249_v55, %v1244_v54 }
 0x42c   :  { %v1253_v58 = vpop.f32.mrb[40].mxu0 }
 0x42d   :  { %v8698_v59 = vpop.f32.mrb[41].mxu0  ;;  %9855 = vmatpush3.bf16.msra.mxu0 %v9854_v57  ;;  %v1254_v63 = vadd.f32 %v7654_v52, %v1253_v58  ;;  %v1072_v57 = vld [vmem:[#allocation2 + $0xf0] sm:$0xff] }
 0x42e   :  { %9856 = vmatprep.subr.bf16.mxu0 %v10388_v21  ;;  %v9837_v59 = vpack.c.bf16 %v1072_v57, %v1071_v56 }
 0x430   :  { %v1258_v60 = vpop.f32.mrb[42].mxu0 }
 0x431   :  { %v1259_v1 = vadd.f32 %v7654_v52, %v1258_v60  ;;  %v8701_v4 = vpop.f32.mrb[43].mxu0 }
 0x433   :  { %v9857_v5 = vpack.c.bf16 %v1259_v1, %v1254_v63 }
 0x434   :  { %v1263_v6 = vpop.f32.mrb[44].mxu0 }
 0x435   :  { %v8704_v7 = vpop.f32.mrb[45].mxu0  ;;  %9858 = vmatpush3.bf16.msra.mxu0 %v9857_v5  ;;  %v1264_v8 = vadd.f32 %v7654_v52, %v1263_v6 }
 0x436   :  { %8738 = vmatprep.subr.mxu0 %v10386_v0 }
 0x439   :  { %8739 = vmatpush3.msk.msra.mxu0 %vm875_vm7, %v1264_v8 }
 0x43a   :  { %8772 = vmatprep.subr.mxu0 %v10386_v0 }
 0x48d   :  { %v806_v9 = vpop.xlane.xlu0 %805 }
 0x48e   :  { %v820_v10 = vsub.f32 %v10628_v16, %v806_v9 }
 0x490   :  { %v825_v11 = vmul.f32 1.442695, %v820_v10 }
 0x491   :  { %v809_v13 = vpop.xlane.xlu1 %808 }
 0x492   :  { %10122 = vpow2.f32 %v825_v11  ;;  %v821_v14 = vsub.f32 %v785_v22, %v809_v13 }
 0x494   :  { %v827_v18 = vmul.f32 1.442695, %v821_v14 }
 0x495   :  { %v812_v19 = vpop.xlane.xlu0 %811 }
 0x496   :  { %10124 = vpow2.f32 %v827_v18  ;;  %v822_v20 = vsub.f32 %v790_v26, %v812_v19 }
 0x498   :  { %v829_v24 = vmul.f32 1.442695, %v822_v20 }
 0x499   :  { %v815_v25 = vpop.xlane.xlu0 %814 }
 0x49a   :  { %10126 = vpow2.f32 %v829_v24  ;;  %v823_v27 = vsub.f32 %v795_v31, %v815_v25 }
 0x49c   :  { %v10123_v29 = vpop.eup %10122  ;;  %v831_v30 = vmul.f32 1.442695, %v823_v27 }
 0x49d   :  { %v819_v32 = vpop.xlane.xlu1 %818  ;;  %v835_v34 = vsel %vm803_vm8, %v10123_v29, 0.0 }
 0x49e   :  { %10128 = vpow2.f32 %v831_v30  ;;  %v824_v35 = vsub.f32 %v800_v36, %v819_v32  ;;  %836 = vadd.xlane.f32.xlu0 %v835_v34  ;;  %v7648_v30 = vld [vmem:[#allocation2 + $0xf8] ss:$0 sm:$0xff] }
 0x4a0   :  { %v10125_v16 = vpop.eup %10124  ;;  %v833_v37 = vmul.f32 1.442695, %v824_v35 }
 0x4a1   :  { %v838_v22 = vsel %vm803_vm8, %v10125_v16, 0.0 }
 0x4a2   :  { %10130 = vpow2.f32 %v833_v37  ;;  %839 = vadd.xlane.f32.xlu1 %v838_v22 }
 0x4a4   :  { %v10127_v38 = vpop.eup %10126 }
 0x4a5   :  { %v841_v26 = vsel %vm803_vm8, %v10127_v38, 0.0 }
 0x4a6   :  { %842 = vadd.xlane.f32.xlu0 %v841_v26 }
 0x4a8   :  { %v10129_v40 = vpop.eup %10128 }
 0x4a9   :  { %v844_v31 = vsel %vm803_vm8, %v10129_v40, 0.0 }
 0x4aa   :  { %845 = vadd.xlane.f32.xlu1 %v844_v31 }
 0x4ac   :  { %v10131_v42 = vpop.eup %10130 }
 0x4ad   :  { %v847_v44 = vsel %vm816_vm9, %v10131_v42, 0.0 }
 0x4ae   :  { %848 = vadd.xlane.f32.xlu0 %v847_v44 }
 0x52b   :  { %v837_v36 = vpop.xlane.xlu0 %836 }
 0x52c   :  { %10132 = vrcp.f32 %v837_v36 }
 0x52f   :  { %v840_v46 = vpop.xlane.xlu1 %839 }
 0x530   :  { %10134 = vrcp.f32 %v840_v46 }
 0x533   :  { %v843_v48 = vpop.xlane.xlu0 %842 }
 0x534   :  { %10136 = vrcp.f32 %v843_v48  ;;  %v7642_v48 = vld [vmem:[#allocation2 + $0xd0] ss:$0 sm:$0xff] }
 0x535   :  { %v1046_v51 = vadd.f32 %v7642_v48, %v10648_v39  ;;  %v1061_v39 = vadd.f32 %v7642_v48, %v10654_v45 }
 0x536   :  { %v10133_v52 = vpop.eup %10132 }
 0x537   :  { %v855_v54 = vmul.f32 %v10133_v52, %v10123_v29  ;;  %v846_v55 = vpop.xlane.xlu1 %845  ;;  %v1051_v52 = vadd.f32 %v7642_v48, %v10650_v41  ;;  %v1066_v41 = vadd.f32 %v7642_v48, %v10656_v47 }
 0x538   :  { %10138 = vrcp.f32 %v846_v55 }
 0x539   :  { %8622 = vmatmul.mubr.msk.f32.vlgmr.msra.gmra.mrb[24].mxu1 %vm803_vm8, %v855_v54 }
 0x53a   :  { %v10135_v58 = vpop.eup %10134  ;;  %8624 = vmatprep.mubr.msk.f32.mxu1 %vm10387_vm0, %v10386_v0  ;;  %9835 = vmatpush3.bf16.msra.mxu1 %v9834_v53  ;;  %v1056_v53 = vadd.f32 %v7642_v48, %v10652_v43 }
 0x53b   :  { %v849_v60 = vpop.xlane.xlu0 %848  ;;  %v856_v63 = vmul.f32 %v10135_v58, %v10125_v16  ;;  %9836 = vmatprep.subr.bf16.mxu1 %v10388_v21 }
 0x53c   :  { %10140 = vrcp.f32 %v849_v60 }
 0x53d   :  { %8625 = vmatmul.mubr.msk.f32.gmra.mrb[26].mxu1 %vm803_vm8, %v856_v63 }
 0x53e   :  { %v10137_v1 = vpop.eup %10136  ;;  %8627 = vmatprep.mubr.msk.f32.mxu1 %vm10387_vm0, %v10386_v0  ;;  %9838 = vmatpush3.bf16.msra.mxu1 %v9837_v59 }
 0x53f   :  { %v857_v4 = vmul.f32 %v10137_v1, %v10127_v38  ;;  %9845 = vmatprep.subr.bf16.mxu1 %v10388_v21 }
 0x541   :  { %8628 = vmatmul.mubr.msk.f32.gmra.mrb[28].mxu1 %vm803_vm8, %v857_v4 }
 0x542   :  { %v10139_v5 = vpop.eup %10138  ;;  %8630 = vmatprep.mubr.msk.f32.mxu1 %vm10387_vm0, %v10386_v0 }
 0x543   :  { %v858_v6 = vmul.f32 %v10139_v5, %v10129_v40 }
 0x545   :  { %8631 = vmatmul.mubr.msk.f32.gmra.mrb[30].mxu1 %vm803_vm8, %v858_v6 }
 0x546   :  { %v10141_v7 = vpop.eup %10140  ;;  %8633 = vmatprep.mubr.msk.f32.mxu1 %vm10387_vm0, %v10386_v0 }
 0x547   :  { %v859_v8 = vmul.f32 %v10141_v7, %v10131_v42 }
 0x549   :  { %8634 = vmatmul.mubr.msk.f32.gmra.mrb[32].mxu1 %vm803_vm8, %v859_v8 }
 0x54a   :  { %8667 = vmatprep.mubr.msk.f32.mxu1 %vm10387_vm0, %v10386_v0 }
 0x54d   :  { %8668 = vmatmul.mubr.msk.f32.vlgmr.msra.gmra.mrb[34].mxu1 %vm383_vm5, %v10469_v50 }
 0x54e   :  { %8670 = vmatprep.mubr.msk.f32.mxu1 %vm10387_vm0, %v10386_v0 }
 0x551   :  { %8671 = vmatmul.mubr.msk.f32.gmra.mrb[36].mxu1 %vm383_vm5, %v10482_v61 }
 0x552   :  { %8673 = vmatprep.mubr.msk.f32.mxu1 %vm10387_vm0, %v10386_v0 }
 0x555   :  { %8674 = vmatmul.mubr.msk.f32.gmra.mrb[38].mxu1 %vm383_vm5, %v10485_v62 }
 0x556   :  { %8676 = vmatprep.mubr.msk.f32.mxu1 %vm10387_vm0, %v10386_v0 }
 0x559   :  { %8677 = vmatmul.mubr.msk.f32.gmra.mrb[40].mxu1 %vm383_vm5, %v10510_v3 }
 0x55a   :  { %8679 = vmatprep.mubr.msk.f32.mxu1 %vm10387_vm0, %v10386_v0 }
 0x55d   :  { %8680 = vmatmul.mubr.msk.f32.gmra.mrb[42].mxu1 %vm383_vm5, %v10497_v2 }
 0x55e   :  { %8715 = vmatprep.mubr.msk.f32.mxu1 %vm10387_vm0, %v10386_v0 }
 0x60c   :  { %v10705_v9 = vpop.f32.mrb[24].mxu1 }
 0x60d   :  { %v8623_v10 = vpop.f32.mrb[25].mxu1 }
 0x610   :  { %v10707_v11 = vpop.f32.mrb[26].mxu1 }
 0x611   :  { %v8626_v13 = vpop.f32.mrb[27].mxu1 }
 0x614   :  { %v10709_v14 = vpop.f32.mrb[28].mxu1 }
 0x615   :  { %v8629_v18 = vpop.f32.mrb[29].mxu1 }
 0x618   :  { %v10711_v19 = vpop.f32.mrb[30].mxu1 }
 0x619   :  { %v8632_v20 = vpop.f32.mrb[31].mxu1 }
 0x61c   :  { %v10713_v24 = vpop.f32.mrb[32].mxu1 }
 0x61d   :  { %v8635_v25 = vpop.f32.mrb[33].mxu1 }
 0x620   :  { %v1144_v27 = vpop.f32.mrb[34].mxu1 }
 0x621   :  { %v8669_v29 = vpop.f32.mrb[35].mxu1  ;;  %v1145_v34 = vadd.f32 %v7648_v30, %v1144_v27 }
 0x624   :  { %v1149_v32 = vpop.f32.mrb[36].mxu1 }
 0x625   :  { %v1150_v35 = vadd.f32 %v7648_v30, %v1149_v32  ;;  %v8672_v16 = vpop.f32.mrb[37].mxu1 }
 0x627   :  { %v9846_v37 = vpack.c.bf16 %v1150_v35, %v1145_v34 }
 0x628   :  { %v1154_v22 = vpop.f32.mrb[38].mxu1 }
 0x629   :  { %v8675_v38 = vpop.f32.mrb[39].mxu1  ;;  %9848 = vmatpush3.bf16.xpose.msk.msra.mxu1 %vm10550_vm6, %v9846_v37  ;;  %v1155_v40 = vadd.f32 %v7648_v30, %v1154_v22 }
 0x62a   :  { %9849 = vmatprep.subr.bf16.mxu1 %v10388_v21 }
 0x62c   :  { %v1159_v26 = vpop.f32.mrb[40].mxu1 }
 0x62d   :  { %v1160_v31 = vadd.f32 %v7648_v30, %v1159_v26  ;;  %v8678_v42 = vpop.f32.mrb[41].mxu1 }
 0x62f   :  { %v9850_v44 = vpack.c.bf16 %v1160_v31, %v1155_v40 }
 0x630   :  { %v1164_v36 = vpop.f32.mrb[42].mxu1 }
 0x631   :  { %v8681_v46 = vpop.f32.mrb[43].mxu1  ;;  %9852 = vmatpush3.bf16.xpose.msk.msra.mxu1 %vm10550_vm6, %v9850_v44  ;;  %v1165_v49 = vadd.f32 %v7648_v30, %v1164_v36 }
 0x632   :  { %8713 = vmatprep.subr.mxu1 %v10386_v0 }
 0x639   :  { %8714 = vmatpush3.xpose.msk.msra.mxu1 %vm38_vm1, %v1165_v49 }
 0x63a   :  { %8755 = vmatprep.subr.mxu1 %v10386_v0 }
 0x63c   :  { %8716 = vmatmul.mubr.msk.f32.vlgmr.msra.gmra.mrb[44].mxu1 %vm38_vm1, %v1046_v51 }
 0x63d   :  { %8718 = vmatprep.mubr.msk.f32.mxu1 %vm10387_vm0, %v10386_v0 }
 0x640   :  { %8719 = vmatmul.mubr.msk.f32.gmra.mrb[46].mxu1 %vm38_vm1, %v1051_v52 }
 0x641   :  { %8721 = vmatprep.mubr.msk.f32.mxu1 %vm10387_vm0, %v10386_v0 }
 0x644   :  { %8722 = vmatmul.mubr.msk.f32.gmra.mrb[48].mxu1 %vm38_vm1, %v1056_v53 }
 0x645   :  { %8724 = vmatprep.mubr.msk.f32.mxu1 %vm10387_vm0, %v10386_v0 }
 0x648   :  { %8725 = vmatmul.mubr.msk.f32.gmra.mrb[50].mxu1 %vm38_vm1, %v1061_v39 }
 0x649   :  { %8727 = vmatprep.mubr.msk.f32.mxu1 %vm10387_vm0, %v10386_v0 }
 0x64c   :  { %8728 = vmatmul.mubr.msk.f32.gmra.mrb[52].mxu1 %vm38_vm1, %v1066_v41 }
 0x64d   :  { %8757 = vmatprep.mubr.msk.f32.mxu1 %vm10387_vm0, %v10386_v0 }
 0x70f   :  { %v1363_v43 = vpop.f32.mrb[44].mxu1 }
 0x710   :  { %v1364_v54 = vadd.f32 %v1363_v43, %v10625_v12  ;;  %v8717_v55 = vpop.f32.mrb[45].mxu1 }
 0x712   :  { %v1387_v56 = vsel %vm803_vm8, %v1364_v54, -inf }
 0x713   :  { %1388 = vmax.xlane.f32.xlu1 %v1387_v56  ;;  %v1368_v45 = vpop.f32.mrb[46].mxu1 }
 0x714   :  { %v1369_v57 = vadd.f32 %v1368_v45, %v10630_v17  ;;  %v8720_v58 = vpop.f32.mrb[47].mxu1 }
 0x716   :  { %v1390_v59 = vsel %vm803_vm8, %v1369_v57, -inf }
 0x717   :  { %1391 = vmax.xlane.f32.xlu0 %v1390_v59  ;;  %v1373_v47 = vpop.f32.mrb[48].mxu1 }
 0x718   :  { %v1374_v60 = vadd.f32 %v1373_v47, %v10635_v23  ;;  %v8723_v63 = vpop.f32.mrb[49].mxu1 }
 0x71a   :  { %v1393_v1 = vsel %vm803_vm8, %v1374_v60, -inf }
 0x71b   :  { %1394 = vmax.xlane.f32.xlu1 %v1393_v1  ;;  %v1378_v4 = vpop.f32.mrb[50].mxu1 }
 0x71c   :  { %v1379_v5 = vadd.f32 %v1378_v4, %v10639_v28  ;;  %v8726_v6 = vpop.f32.mrb[51].mxu1 }
 0x71e   :  { %v1396_v7 = vsel %vm803_vm8, %v1379_v5, -inf }
 0x71f   :  { %1397 = vmax.xlane.f32.xlu0 %v1396_v7  ;;  %v1383_v8 = vpop.f32.mrb[52].mxu1  ;;  %v1860_v7 = vld [vmem:[#allocation2 + $0x158] sm:$0xff] }
 0x720   :  { %v1384_v10 = vadd.f32 %v1383_v8, %v10643_v33  ;;  %v8729_v13 = vpop.f32.mrb[53].mxu1  ;;  %v1861_v8 = vld [vmem:[#allocation2 + $0x160] sm:$0xff] }
 0x721   :  { %v1862_v13 = vld [vmem:[#allocation2 + $0x168] sm:$0xff] }
 0x722   :  { %v1399_v18 = vsel %vm816_vm9, %v1384_v10, -inf }
 0x723   :  { %1400 = vmax.xlane.f32.xlu1 %v1399_v18  ;;  %v1863_v18 = vld [vmem:[#allocation2 + $0x170] sm:$0xff] }
 0x7a0   :  { %v1389_v20 = vpop.xlane.xlu1 %1388 }
 0x7a1   :  { %v1402_v25 = vsub.f32 %v1364_v54, %v1389_v20  ;;  %v9869_v20 = vpack.c.bf16 %v1863_v18, %v1862_v13 }
 0x7a3   :  { %v1407_v27 = vmul.f32 1.442695, %v1402_v25  ;;  %v1764_v25 = vld [vmem:[#allocation2 + $0x148] sm:$0xff] }
 0x7a4   :  { %v1392_v29 = vpop.xlane.xlu0 %1391 }
 0x7a5   :  { %10142 = vpow2.f32 %v1407_v27  ;;  %v1403_v30 = vsub.f32 %v1369_v57, %v1392_v29  ;;  %v969_v57 = vld [vmem:[#allocation2 + $0xa8] sm:$0xff] }
 0x7a7   :  { %v1409_v32 = vmul.f32 1.442695, %v1403_v30 }
 0x7a8   :  { %v1395_v34 = vpop.xlane.xlu1 %1394 }
 0x7a9   :  { %10144 = vpow2.f32 %v1409_v32  ;;  %v1404_v35 = vsub.f32 %v1374_v60, %v1395_v34 }
 0x7ab   :  { %v1411_v16 = vmul.f32 1.442695, %v1404_v35 }
 0x7ac   :  { %v1398_v37 = vpop.xlane.xlu0 %1397 }
 0x7ad   :  { %10146 = vpow2.f32 %v1411_v16  ;;  %v1405_v22 = vsub.f32 %v1379_v5, %v1398_v37 }
 0x7af   :  { %v10143_v38 = vpop.eup %10142  ;;  %v1413_v26 = vmul.f32 1.442695, %v1405_v22 }
 0x7b0   :  { %v1401_v40 = vpop.xlane.xlu1 %1400  ;;  %v1417_v31 = vsel %vm803_vm8, %v10143_v38, 0.0 }
 0x7b1   :  { %10148 = vpow2.f32 %v1413_v26  ;;  %v1406_v42 = vsub.f32 %v1384_v10, %v1401_v40  ;;  %1418 = vadd.xlane.f32.xlu0 %v1417_v31  ;;  %v9866_v10 = vpack.c.bf16 %v1861_v8, %v1860_v7  ;;  %v1960_v26 = vld [vmem:[#allocation2 + $0x188] sm:$0xff] }
 0x7b3   :  { %v10145_v44 = vpop.eup %10144  ;;  %v1415_v36 = vmul.f32 1.442695, %v1406_v42 }
 0x7b4   :  { %v1420_v46 = vsel %vm803_vm8, %v10145_v44, 0.0 }
 0x7b5   :  { %10150 = vpow2.f32 %v1415_v36  ;;  %1421 = vadd.xlane.f32.xlu1 %v1420_v46  ;;  %v1962_v36 = vld [vmem:[#allocation2 + $0x198] sm:$0xff] }
 0x7b7   :  { %v10147_v48 = vpop.eup %10146 }
 0x7b8   :  { %v1423_v49 = vsel %vm803_vm8, %v10147_v48, 0.0 }
 0x7b9   :  { %1424 = vadd.xlane.f32.xlu0 %v1423_v49 }
 0x7bb   :  { %v10149_v51 = vpop.eup %10148 }
 0x7bc   :  { %v1426_v52 = vsel %vm803_vm8, %v10149_v51, 0.0 }
 0x7bd   :  { %1427 = vadd.xlane.f32.xlu1 %v1426_v52 }
 0x7bf   :  { %v10151_v53 = vpop.eup %10150 }
 0x7c0   :  { %v1429_v39 = vsel %vm816_vm9, %v10151_v53, 0.0 }
 0x7c1   :  { %1430 = vadd.xlane.f32.xlu0 %v1429_v39 }
 0x83e   :  { %v1419_v41 = vpop.xlane.xlu0 %1418 }
 0x83f   :  { %10152 = vrcp.f32 %v1419_v41 }
 0x842   :  { %v1422_v43 = vpop.xlane.xlu1 %1421 }
 0x843   :  { %10154 = vrcp.f32 %v1422_v43 }
 0x846   :  { %v1425_v54 = vpop.xlane.xlu0 %1424 }
 0x847   :  { %10156 = vrcp.f32 %v1425_v54 }
 0x849   :  { %v10153_v55 = vpop.eup %10152 }
 0x84a   :  { %v1437_v56 = vmul.f32 %v10153_v55, %v10143_v38  ;;  %v1428_v45 = vpop.xlane.xlu1 %1427  ;;  %v1959_v38 = vld [vmem:[#allocation2 + $0x180] sm:$0xff] }
 0x84b   :  { %10158 = vrcp.f32 %v1428_v45  ;;  %v9872_v42 = vpack.c.bf16 %v1960_v26, %v1959_v38  ;;  %v7686_v38 = vld [vmem:[#allocation2 + $0x150] ss:$0 sm:$0xff] }
 0x84c   :  { %8741 = vmatmul.mubr.msk.f32.vlgmr.msra.gmra.mrb[46].mxu0 %vm803_vm8, %v1437_v56 }
 0x84d   :  { %v10155_v58 = vpop.eup %10154  ;;  %8743 = vmatprep.mubr.msk.f32.mxu0 %vm10387_vm0, %v10386_v0  ;;  %8773 = vmatpush3.msra.mxu0 %v969_v57  ;;  %v7692_v57 = vld [vmem:[#allocation2 + $0x178] ss:$0 sm:$0xff] }
 0x84e   :  { %v1431_v59 = vpop.xlane.xlu0 %1430  ;;  %v1438_v47 = vmul.f32 %v10155_v58, %v10145_v44  ;;  %9865 = vmatprep.subr.bf16.mxu0 %v10388_v21  ;;  %v1961_v44 = vld [vmem:[#allocation2 + $0x190] sm:$0xff] }
 0x84f   :  { %10160 = vrcp.f32 %v1431_v59  ;;  %v9875_v49 = vpack.c.bf16 %v1962_v36, %v1961_v44 }
 0x850   :  { %8744 = vmatmul.mubr.msk.f32.gmra.mrb[48].mxu0 %vm803_vm8, %v1438_v47 }
 0x851   :  { %v10157_v60 = vpop.eup %10156  ;;  %8746 = vmatprep.mubr.msk.f32.mxu0 %vm10387_vm0, %v10386_v0 }
 0x852   :  { %v1439_v63 = vmul.f32 %v10157_v60, %v10147_v48 }
 0x854   :  { %8747 = vmatmul.mubr.msk.f32.gmra.mrb[50].mxu0 %vm803_vm8, %v1439_v63 }
 0x855   :  { %v10159_v1 = vpop.eup %10158  ;;  %8749 = vmatprep.mubr.msk.f32.mxu0 %vm10387_vm0, %v10386_v0 }
 0x856   :  { %v1440_v4 = vmul.f32 %v10159_v1, %v10149_v51 }
 0x858   :  { %8750 = vmatmul.mubr.msk.f32.gmra.mrb[52].mxu0 %vm803_vm8, %v1440_v4 }
 0x859   :  { %v10161_v5 = vpop.eup %10160  ;;  %8752 = vmatprep.mubr.msk.f32.mxu0 %vm10387_vm0, %v10386_v0 }
 0x85a   :  { %v1441_v6 = vmul.f32 %v10161_v5, %v10151_v53 }
 0x85c   :  { %8753 = vmatmul.mubr.msk.f32.gmra.mrb[54].mxu0 %vm803_vm8, %v1441_v6 }
 0x85d   :  { %8774 = vmatprep.mubr.msk.f32.mxu0 %vm10387_vm0, %v10386_v0 }
 0x860   :  { %8775 = vmatmul.mubr.msk.f32.vlgmr.msra.gmra.mrb[56].mxu0 %vm38_vm1, %v10705_v9  ;;  %v1550_v9 = vld [vmem:[#allocation2 + $0x128] sm:$0xff] }
 0x861   :  { %8777 = vmatprep.mubr.msk.f32.mxu0 %vm10387_vm0, %v10386_v0  ;;  %9867 = vmatpush3.bf16.msra.mxu0 %v9866_v10 }
 0x862   :  { %9868 = vmatprep.subr.bf16.mxu0 %v10388_v21  ;;  %8756 = vmatpush3.msra.mxu1 %v1550_v9 }
 0x863   :  { %9859 = vmatprep.subr.bf16.mxu1 %v10388_v21 }
 0x864   :  { %8778 = vmatmul.mubr.msk.f32.gmra.mrb[58].mxu0 %vm38_vm1, %v10707_v11  ;;  %v1761_v11 = vld [vmem:[#allocation2 + $0x130] sm:$0xff] }
 0x865   :  { %8780 = vmatprep.mubr.msk.f32.mxu0 %vm10387_vm0, %v10386_v0  ;;  %9870 = vmatpush3.bf16.msra.mxu0 %v9869_v20 }
 0x866   :  { %9877 = vmatprep.subr.bf16.mxu0 %v10388_v21 }
 0x868   :  { %8781 = vmatmul.mubr.msk.f32.gmra.mrb[60].mxu0 %vm38_vm1, %v10709_v14  ;;  %v1762_v14 = vld [vmem:[#allocation2 + $0x138] sm:$0xff] }
 0x869   :  { %8783 = vmatprep.mubr.msk.f32.mxu0 %vm10387_vm0, %v10386_v0 }
 0x86c   :  { %8784 = vmatmul.mubr.msk.f32.gmra.mrb[62].mxu0 %vm38_vm1, %v10711_v19  ;;  %v9860_v19 = vpack.c.bf16 %v1762_v14, %v1761_v11 }
 0x86d   :  { %8786 = vmatprep.mubr.msk.f32.mxu0 %vm10387_vm0, %v10386_v0 }
 0x870   :  { %8787 = vmatmul.mubr.msk.f32.gmra.mrb[64].mxu0 %vm38_vm1, %v10713_v24  ;;  %v1763_v24 = vld [vmem:[#allocation2 + $0x140] sm:$0xff] }
 0x871   :  { %8820 = vmatprep.mubr.msk.f32.mxu0 %vm10387_vm0, %v10386_v0  ;;  %v9863_v30 = vpack.c.bf16 %v1764_v25, %v1763_v24 }
 0x874   :  { %8821 = vmatmul.mubr.msk.f32.vlgmr.msra.gmra.mrb[66].mxu0 %vm383_vm5, %v10469_v50 }
 0x875   :  { %8823 = vmatprep.mubr.msk.f32.mxu0 %vm10387_vm0, %v10386_v0 }
 0x878   :  { %8824 = vmatmul.mubr.msk.f32.gmra.mrb[68].mxu0 %vm383_vm5, %v10482_v61 }
 0x879   :  { %8826 = vmatprep.mubr.msk.f32.mxu0 %vm10387_vm0, %v10386_v0 }
 0x87c   :  { %8827 = vmatmul.mubr.msk.f32.gmra.mrb[70].mxu0 %vm383_vm5, %v10485_v62 }
 0x87d   :  { %8829 = vmatprep.mubr.msk.f32.mxu0 %vm10387_vm0, %v10386_v0 }
 0x880   :  { %8830 = vmatmul.mubr.msk.f32.gmra.mrb[72].mxu0 %vm383_vm5, %v10510_v3 }
 0x881   :  { %8832 = vmatprep.mubr.msk.f32.mxu0 %vm10387_vm0, %v10386_v0 }
 0x884   :  { %8833 = vmatmul.mubr.msk.f32.gmra.mrb[74].mxu0 %vm383_vm5, %v10497_v2 }
 0x885   :  { %8868 = vmatprep.mubr.msk.f32.mxu0 %vm10387_vm0, %v10386_v0 }
 0x91f   :  { %v1526_v27 = vpop.f32.mrb[46].mxu0 }
 0x920   :  { %v8742_v29 = vpop.f32.mrb[47].mxu0  ;;  %8758 = vmatmul.mubr.msk.f32.vlgmr.msra.gmra.mrb[54].mxu1 %vm38_vm1, %v1526_v27 }
 0x921   :  { %8760 = vmatprep.mubr.msk.f32.mxu1 %vm10387_vm0, %v10386_v0  ;;  %9861 = vmatpush3.bf16.msra.mxu1 %v9860_v19 }
 0x922   :  { %9862 = vmatprep.subr.bf16.mxu1 %v10388_v21 }
 0x923   :  { %v1531_v32 = vpop.f32.mrb[48].mxu0 }
 0x924   :  { %v8745_v34 = vpop.f32.mrb[49].mxu0  ;;  %8761 = vmatmul.mubr.msk.f32.gmra.mrb[56].mxu1 %vm38_vm1, %v1531_v32 }
 0x925   :  { %8763 = vmatprep.mubr.msk.f32.mxu1 %vm10387_vm0, %v10386_v0  ;;  %9864 = vmatpush3.bf16.msra.mxu1 %v9863_v30 }
 0x926   :  { %9871 = vmatprep.subr.bf16.mxu1 %v10388_v21 }
 0x927   :  { %v1536_v35 = vpop.f32.mrb[50].mxu0 }
 0x928   :  { %v8748_v16 = vpop.f32.mrb[51].mxu0  ;;  %8764 = vmatmul.mubr.msk.f32.gmra.mrb[58].mxu1 %vm38_vm1, %v1536_v35 }
 0x929   :  { %8766 = vmatprep.mubr.msk.f32.mxu1 %vm10387_vm0, %v10386_v0 }
 0x92b   :  { %v1541_v37 = vpop.f32.mrb[52].mxu0 }
 0x92c   :  { %v8751_v22 = vpop.f32.mrb[53].mxu0  ;;  %8767 = vmatmul.mubr.msk.f32.gmra.mrb[60].mxu1 %vm38_vm1, %v1541_v37 }
 0x92d   :  { %8769 = vmatprep.mubr.msk.f32.mxu1 %vm10387_vm0, %v10386_v0 }
 0x92f   :  { %v1546_v40 = vpop.f32.mrb[54].mxu0 }
 0x930   :  { %v8754_v31 = vpop.f32.mrb[55].mxu0  ;;  %8770 = vmatmul.mubr.msk.f32.gmra.mrb[62].mxu1 %vm38_vm1, %v1546_v40 }
 0x931   :  { %8797 = vmatprep.mubr.msk.f32.mxu1 %vm10387_vm0, %v10386_v0 }
 0x933   :  { %v1737_v46 = vpop.f32.mrb[56].mxu0 }
 0x934   :  { %v8776_v48 = vpop.f32.mrb[57].mxu0  ;;  %8798 = vmatmul.mubr.msk.f32.vlgmr.msra.gmra.mrb[64].mxu1 %vm383_vm5, %v10469_v50 }
 0x935   :  { %8800 = vmatprep.mubr.msk.f32.mxu1 %vm10387_vm0, %v10386_v0  ;;  %9873 = vmatpush3.bf16.msra.mxu1 %v9872_v42 }
 0x936   :  { %9874 = vmatprep.subr.bf16.mxu1 %v10388_v21 }
 0x937   :  { %v1742_v51 = vpop.f32.mrb[58].mxu0 }
 0x938   :  { %v8779_v52 = vpop.f32.mrb[59].mxu0  ;;  %8801 = vmatmul.mubr.msk.f32.gmra.mrb[66].mxu1 %vm383_vm5, %v10482_v61 }
 0x939   :  { %8803 = vmatprep.mubr.msk.f32.mxu1 %vm10387_vm0, %v10386_v0  ;;  %9876 = vmatpush3.bf16.msra.mxu1 %v9875_v49 }
 0x93a   :  { %9885 = vmatprep.subr.bf16.mxu1 %v10388_v21 }
 0x93b   :  { %v1747_v53 = vpop.f32.mrb[60].mxu0 }
 0x93c   :  { %v8782_v39 = vpop.f32.mrb[61].mxu0  ;;  %8804 = vmatmul.mubr.msk.f32.gmra.mrb[68].mxu1 %vm383_vm5, %v10485_v62 }
 0x93d   :  { %8806 = vmatprep.mubr.msk.f32.mxu1 %vm10387_vm0, %v10386_v0 }
 0x93f   :  { %v1752_v41 = vpop.f32.mrb[62].mxu0 }
 0x940   :  { %v8785_v43 = vpop.f32.mrb[63].mxu0  ;;  %8807 = vmatmul.mubr.msk.f32.gmra.mrb[70].mxu1 %vm383_vm5, %v10510_v3 }
 0x941   :  { %8809 = vmatprep.mubr.msk.f32.mxu1 %vm10387_vm0, %v10386_v0 }
 0x943   :  { %v1757_v54 = vpop.f32.mrb[64].mxu0 }
 0x944   :  { %v8788_v55 = vpop.f32.mrb[65].mxu0  ;;  %8810 = vmatmul.mubr.msk.f32.gmra.mrb[72].mxu1 %vm383_vm5, %v10497_v2 }
 0x945   :  { %8843 = vmatprep.mubr.msk.f32.mxu1 %vm10387_vm0, %v10386_v0 }
 0x947   :  { %v1935_v56 = vpop.f32.mrb[66].mxu0 }
 0x948   :  { %v8822_v45 = vpop.f32.mrb[67].mxu0  ;;  %8844 = vmatmul.mubr.msk.f32.vlgmr.msra.gmra.mrb[74].mxu1 %vm383_vm5, %v10469_v50  ;;  %v1936_v59 = vadd.f32 %v7692_v57, %v1935_v56  ;;  %v7698_v56 = vld [vmem:[#allocation2 + $0x1a0] ss:$0 sm:$0xff] }
 0x949   :  { %8846 = vmatprep.mubr.msk.f32.mxu1 %vm10387_vm0, %v10386_v0 }
 0x94b   :  { %v1940_v58 = vpop.f32.mrb[68].mxu0 }
 0x94c   :  { %v1941_v47 = vadd.f32 %v7692_v57, %v1940_v58  ;;  %v8825_v60 = vpop.f32.mrb[69].mxu0  ;;  %8847 = vmatmul.mubr.msk.f32.gmra.mrb[76].mxu1 %vm383_vm5, %v10482_v61 }
 0x94d   :  { %8849 = vmatprep.mubr.msk.f32.mxu1 %vm10387_vm0, %v10386_v0 }
 0x94e   :  { %v9878_v63 = vpack.c.bf16 %v1941_v47, %v1936_v59 }
 0x94f   :  { %v1945_v1 = vpop.f32.mrb[70].mxu0 }
 0x950   :  { %v8828_v4 = vpop.f32.mrb[71].mxu0  ;;  %8850 = vmatmul.mubr.msk.f32.gmra.mrb[78].mxu1 %vm383_vm5, %v10485_v62  ;;  %9880 = vmatpush3.bf16.xpose.msk.msra.mxu0 %vm10550_vm6, %v9878_v63  ;;  %v1946_v6 = vadd.f32 %v7692_v57, %v1945_v1 }
 0x951   :  { %8852 = vmatprep.mubr.msk.f32.mxu1 %vm10387_vm0, %v10386_v0  ;;  %9881 = vmatprep.subr.bf16.mxu0 %v10388_v21 }
 0x953   :  { %v1950_v5 = vpop.f32.mrb[72].mxu0 }
 0x954   :  { %v1951_v7 = vadd.f32 %v7692_v57, %v1950_v5  ;;  %v8831_v8 = vpop.f32.mrb[73].mxu0  ;;  %8853 = vmatmul.mubr.msk.f32.gmra.mrb[80].mxu1 %vm383_vm5, %v10510_v3 }
 0x955   :  { %8855 = vmatprep.mubr.msk.f32.mxu1 %vm10387_vm0, %v10386_v0 }
 0x956   :  { %v9882_v10 = vpack.c.bf16 %v1951_v7, %v1946_v6 }
 0x957   :  { %v1955_v13 = vpop.f32.mrb[74].mxu0 }
 0x958   :  { %v8834_v18 = vpop.f32.mrb[75].mxu0  ;;  %8856 = vmatmul.mubr.msk.f32.gmra.mrb[82].mxu1 %vm383_vm5, %v10497_v2  ;;  %9884 = vmatpush3.bf16.xpose.msk.msra.mxu0 %vm10550_vm6, %v9882_v10  ;;  %v1956_v20 = vadd.f32 %v7692_v57, %v1955_v13 }
 0x959   :  { %8866 = vmatprep.subr.mxu0 %v10386_v0  ;;  %8893 = vmatprep.mubr.msk.f32.mxu1 %vm10387_vm0, %v10386_v0 }
 0x960   :  { %8867 = vmatpush3.xpose.msk.msra.mxu0 %vm38_vm1, %v1956_v20 }
 0x961   :  { %8908 = vmatprep.subr.mxu0 %v10386_v0 }
 0x9f3   :  { %v1632_v9 = vpop.f32.mrb[54].mxu1 }
 0x9f4   :  { %v10884_v11 = vadd.f32 %v1737_v46, %v1632_v9  ;;  %v8759_v14 = vpop.f32.mrb[55].mxu1 }
 0x9f7   :  { %v1637_v19 = vpop.f32.mrb[56].mxu1 }
 0x9f8   :  { %v10886_v24 = vadd.f32 %v1742_v51, %v1637_v19  ;;  %v8762_v25 = vpop.f32.mrb[57].mxu1 }
 0x9fb   :  { %v1642_v27 = vpop.f32.mrb[58].mxu1 }
 0x9fc   :  { %v10888_v29 = vadd.f32 %v1747_v53, %v1642_v27  ;;  %v8765_v30 = vpop.f32.mrb[59].mxu1 }
 0x9ff   :  { %v1647_v32 = vpop.f32.mrb[60].mxu1 }
 0xa00   :  { %v10890_v34 = vadd.f32 %v1752_v41, %v1647_v32  ;;  %v8768_v35 = vpop.f32.mrb[61].mxu1 }
 0xa03   :  { %v1652_v16 = vpop.f32.mrb[62].mxu1 }
 0xa04   :  { %v10892_v37 = vadd.f32 %v1757_v54, %v1652_v16  ;;  %v8771_v22 = vpop.f32.mrb[63].mxu1 }
 0xa07   :  { %v1836_v26 = vpop.f32.mrb[64].mxu1 }
 0xa08   :  { %v1837_v40 = vadd.f32 %v7686_v38, %v1836_v26  ;;  %v8799_v31 = vpop.f32.mrb[65].mxu1 }
 0xa0a   :  { %8869 = vmatmul.mubr.msk.f32.vlgmr.msra.gmra.mrb[76].mxu0 %vm38_vm1, %v1837_v40 }
 0xa0b   :  { %v1841_v42 = vpop.f32.mrb[66].mxu1  ;;  %8871 = vmatprep.mubr.msk.f32.mxu0 %vm10387_vm0, %v10386_v0 }
 0xa0c   :  { %v1842_v44 = vadd.f32 %v7686_v38, %v1841_v42  ;;  %v8802_v36 = vpop.f32.mrb[67].mxu1 }
 0xa0e   :  { %8872 = vmatmul.mubr.msk.f32.gmra.mrb[78].mxu0 %vm38_vm1, %v1842_v44 }
 0xa0f   :  { %v1846_v46 = vpop.f32.mrb[68].mxu1  ;;  %8874 = vmatprep.mubr.msk.f32.mxu0 %vm10387_vm0, %v10386_v0 }
 0xa10   :  { %v1847_v48 = vadd.f32 %v7686_v38, %v1846_v46  ;;  %v8805_v49 = vpop.f32.mrb[69].mxu1 }
 0xa12   :  { %8875 = vmatmul.mubr.msk.f32.gmra.mrb[80].mxu0 %vm38_vm1, %v1847_v48 }
 0xa13   :  { %v1851_v51 = vpop.f32.mrb[70].mxu1  ;;  %8877 = vmatprep.mubr.msk.f32.mxu0 %vm10387_vm0, %v10386_v0 }
 0xa14   :  { %v1852_v52 = vadd.f32 %v7686_v38, %v1851_v51  ;;  %v8808_v53 = vpop.f32.mrb[71].mxu1 }
 0xa16   :  { %8878 = vmatmul.mubr.msk.f32.gmra.mrb[82].mxu0 %vm38_vm1, %v1852_v52 }
 0xa17   :  { %v1856_v39 = vpop.f32.mrb[72].mxu1  ;;  %8880 = vmatprep.mubr.msk.f32.mxu0 %vm10387_vm0, %v10386_v0 }
 0xa18   :  { %v1857_v41 = vadd.f32 %v7686_v38, %v1856_v39  ;;  %v8811_v43 = vpop.f32.mrb[73].mxu1 }
 0xa1a   :  { %8881 = vmatmul.mubr.msk.f32.gmra.mrb[84].mxu0 %vm38_vm1, %v1857_v41 }
 0xa1b   :  { %v2034_v54 = vpop.f32.mrb[74].mxu1  ;;  %8910 = vmatprep.mubr.msk.f32.mxu0 %vm10387_vm0, %v10386_v0 }
 0xa1c   :  { %v8845_v55 = vpop.f32.mrb[75].mxu1  ;;  %v2035_v57 = vadd.f32 %v7698_v56, %v2034_v54 }
 0xa1f   :  { %v2039_v45 = vpop.f32.mrb[76].mxu1 }
 0xa20   :  { %v2040_v58 = vadd.f32 %v7698_v56, %v2039_v45  ;;  %v8848_v59 = vpop.f32.mrb[77].mxu1 }
 0xa22   :  { %v9886_v47 = vpack.c.bf16 %v2040_v58, %v2035_v57 }
 0xa23   :  { %v2044_v60 = vpop.f32.mrb[78].mxu1 }
 0xa24   :  { %v8851_v63 = vpop.f32.mrb[79].mxu1  ;;  %9887 = vmatpush3.bf16.msra.mxu1 %v9886_v47  ;;  %v2045_v4 = vadd.f32 %v7698_v56, %v2044_v60 }
 0xa25   :  { %9888 = vmatprep.subr.bf16.mxu1 %v10388_v21 }
 0xa27   :  { %v2049_v1 = vpop.f32.mrb[80].mxu1 }
 0xa28   :  { %v2050_v5 = vadd.f32 %v7698_v56, %v2049_v1  ;;  %v8854_v6 = vpop.f32.mrb[81].mxu1 }
 0xa2a   :  { %v9889_v7 = vpack.c.bf16 %v2050_v5, %v2045_v4 }
 0xa2b   :  { %v2054_v8 = vpop.f32.mrb[82].mxu1 }
 0xa2c   :  { %v8857_v10 = vpop.f32.mrb[83].mxu1  ;;  %9890 = vmatpush3.bf16.msra.mxu1 %v9889_v7  ;;  %v2055_v13 = vadd.f32 %v7698_v56, %v2054_v8  ;;  %v2452_v8 = vld [vmem:[#allocation2 + $0x1b0] sm:$0xff] }
 0xa2d   :  { %8891 = vmatprep.subr.mxu1 %v10386_v0  ;;  %v2453_v10 = vld [vmem:[#allocation2 + $0x1b8] sm:$0xff] }
 0xa30   :  { %8892 = vmatpush3.msk.msra.mxu1 %vm875_vm7, %v2055_v13 }
 0xa31   :  { %9891 = vmatprep.subr.bf16.mxu1 %v10388_v21 }
 0xadd   :  { %v2154_v18 = vpop.f32.mrb[76].mxu0 }
 0xade   :  { %v2155_v20 = vadd.f32 %v2154_v18, %v10625_v12  ;;  %v8870_v9 = vpop.f32.mrb[77].mxu0  ;;  %v9892_v18 = vpack.c.bf16 %v2453_v10, %v2452_v8 }
 0xae0   :  { %v2178_v14 = vsel %vm803_vm8, %v2155_v20, -inf }
 0xae1   :  { %2179 = vmax.xlane.f32.xlu1 %v2178_v14  ;;  %v2159_v19 = vpop.f32.mrb[78].mxu0  ;;  %v2454_v14 = vld [vmem:[#allocation2 + $0x1c0] sm:$0xff] }
 0xae2   :  { %v2160_v25 = vadd.f32 %v2159_v19, %v10630_v17  ;;  %v8873_v27 = vpop.f32.mrb[79].mxu0  ;;  %v2455_v19 = vld [vmem:[#allocation2 + $0x1c8] sm:$0xff] }
 0xae3   :  { %v9895_v27 = vpack.c.bf16 %v2455_v19, %v2454_v14 }
 0xae4   :  { %v2181_v30 = vsel %vm803_vm8, %v2160_v25, -inf }
 0xae5   :  { %2182 = vmax.xlane.f32.xlu0 %v2181_v30  ;;  %v2164_v32 = vpop.f32.mrb[80].mxu0 }
 0xae6   :  { %v2165_v35 = vadd.f32 %v2164_v32, %v10635_v23  ;;  %v8876_v16 = vpop.f32.mrb[81].mxu0 }
 0xae8   :  { %v2184_v22 = vsel %vm803_vm8, %v2165_v35, -inf }
 0xae9   :  { %2185 = vmax.xlane.f32.xlu1 %v2184_v22  ;;  %v2169_v38 = vpop.f32.mrb[82].mxu0 }
 0xaea   :  { %v2170_v12 = vadd.f32 %v2169_v38, %v10639_v28  ;;  %v8879_v26 = vpop.f32.mrb[83].mxu0 }
 0xaec   :  { %v2187_v40 = vsel %vm803_vm8, %v2170_v12, -inf }
 0xaed   :  { %2188 = vmax.xlane.f32.xlu0 %v2187_v40  ;;  %v2174_v31 = vpop.f32.mrb[84].mxu0  ;;  %v2650_v40 = vld [vmem:[#allocation2 + $0x200] sm:$0xff] }
 0xaee   :  { %v2175_v17 = vadd.f32 %v2174_v31, %v10643_v33  ;;  %v8882_v42 = vpop.f32.mrb[85].mxu0  ;;  %v2651_v31 = vld [vmem:[#allocation2 + $0x208] sm:$0xff] }
 0xaef   :  { %v2652_v42 = vld [vmem:[#allocation2 + $0x210] sm:$0xff] }
 0xaf0   :  { %v2190_v44 = vsel %vm816_vm9, %v2175_v17, -inf }
 0xaf1   :  { %2191 = vmax.xlane.f32.xlu1 %v2190_v44  ;;  %v2653_v44 = vld [vmem:[#allocation2 + $0x218] sm:$0xff] }
 0xb6e   :  { %v2180_v36 = vpop.xlane.xlu1 %2179 }
 0xb6f   :  { %v2193_v23 = vsub.f32 %v2155_v20, %v2180_v36  ;;  %v9907_v36 = vpack.c.bf16 %v2653_v44, %v2652_v42 }
 0xb71   :  { %v2198_v46 = vmul.f32 1.442695, %v2193_v23  ;;  %v2341_v23 = vld [vmem:[#allocation2 + $0x1a8] sm:$0xff] }
 0xb72   :  { %v2183_v48 = vpop.xlane.xlu0 %2182  ;;  %8909 = vmatpush3.msra.mxu0 %v2341_v23 }
 0xb73   :  { %10162 = vpow2.f32 %v2198_v46  ;;  %v2194_v49 = vsub.f32 %v2160_v25, %v2183_v48  ;;  %9897 = vmatprep.subr.bf16.mxu0 %v10388_v21  ;;  %v2551_v46 = vld [vmem:[#allocation2 + $0x1d8] sm:$0xff]  ;;  %v2552_v48 = vld [vmem:[#allocation2 + $0x1e0] sm:$0xff] }
 0xb75   :  { %v2200_v51 = vmul.f32 1.442695, %v2194_v49  ;;  %v9898_v49 = vpack.c.bf16 %v2552_v48, %v2551_v46 }
 0xb76   :  { %v2186_v52 = vpop.xlane.xlu1 %2185 }
 0xb77   :  { %10164 = vpow2.f32 %v2200_v51  ;;  %v2195_v28 = vsub.f32 %v2165_v35, %v2186_v52  ;;  %v2553_v51 = vld [vmem:[#allocation2 + $0x1e8] sm:$0xff]  ;;  %v2554_v52 = vld [vmem:[#allocation2 + $0x1f0] sm:$0xff] }
 0xb79   :  { %v2202_v53 = vmul.f32 1.442695, %v2195_v28 }
 0xb7a   :  { %v2189_v39 = vpop.xlane.xlu0 %2188 }
 0xb7b   :  { %10166 = vpow2.f32 %v2202_v53  ;;  %v2196_v41 = vsub.f32 %v2170_v12, %v2189_v39  ;;  %v9901_v39 = vpack.c.bf16 %v2554_v52, %v2553_v51 }
 0xb7d   :  { %v10163_v43 = vpop.eup %10162  ;;  %v2204_v33 = vmul.f32 1.442695, %v2196_v41 }
 0xb7e   :  { %v2192_v54 = vpop.xlane.xlu1 %2191  ;;  %v2208_v55 = vsel %vm803_vm8, %v10163_v43, 0.0 }
 0xb7f   :  { %10168 = vpow2.f32 %v2204_v33  ;;  %v2197_v56 = vsub.f32 %v2175_v17, %v2192_v54  ;;  %2209 = vadd.xlane.f32.xlu0 %v2208_v55  ;;  %v9904_v17 = vpack.c.bf16 %v2651_v31, %v2650_v40 }
 0xb81   :  { %v10165_v45 = vpop.eup %10164  ;;  %v2206_v57 = vmul.f32 1.442695, %v2197_v56 }
 0xb82   :  { %v2211_v58 = vsel %vm803_vm8, %v10165_v45, 0.0 }
 0xb83   :  { %10170 = vpow2.f32 %v2206_v57  ;;  %2212 = vadd.xlane.f32.xlu1 %v2211_v58 }
 0xb85   :  { %v10167_v59 = vpop.eup %10166 }
 0xb86   :  { %v2214_v47 = vsel %vm803_vm8, %v10167_v59, 0.0 }
 0xb87   :  { %2215 = vadd.xlane.f32.xlu0 %v2214_v47 }
 0xb89   :  { %v10169_v60 = vpop.eup %10168 }
 0xb8a   :  { %v2217_v63 = vsel %vm803_vm8, %v10169_v60, 0.0 }
 0xb8b   :  { %2218 = vadd.xlane.f32.xlu1 %v2217_v63 }
 0xb8d   :  { %v10171_v1 = vpop.eup %10170 }
 0xb8e   :  { %v2220_v4 = vsel %vm816_vm9, %v10171_v1, 0.0 }
 0xb8f   :  { %2221 = vadd.xlane.f32.xlu0 %v2220_v4 }
 0xc0c   :  { %v2210_v5 = vpop.xlane.xlu0 %2209 }
 0xc0d   :  { %10172 = vrcp.f32 %v2210_v5 }
 0xc10   :  { %v2213_v6 = vpop.xlane.xlu1 %2212 }
 0xc11   :  { %10174 = vrcp.f32 %v2213_v6 }
 0xc14   :  { %v2216_v7 = vpop.xlane.xlu0 %2215 }
 0xc15   :  { %10176 = vrcp.f32 %v2216_v7 }
 0xc17   :  { %v10173_v13 = vpop.eup %10172 }
 0xc18   :  { %v2228_v20 = vmul.f32 %v10173_v13, %v10163_v43  ;;  %v2219_v9 = vpop.xlane.xlu1 %2218  ;;  %v7737_v13 = vld [vmem:[#allocation2 + $0x220] ss:$0 sm:$0xff] }
 0xc19   :  { %10178 = vrcp.f32 %v2219_v9 }
 0xc1a   :  { %8894 = vmatmul.mubr.msk.f32.vlgmr.msra.gmra.mrb[84].mxu1 %vm803_vm8, %v2228_v20 }
 0xc1b   :  { %v10175_v25 = vpop.eup %10174  ;;  %8896 = vmatprep.mubr.msk.f32.mxu1 %vm10387_vm0, %v10386_v0  ;;  %9893 = vmatpush3.bf16.msra.mxu1 %v9892_v18 }
 0xc1c   :  { %v2222_v30 = vpop.xlane.xlu0 %2221  ;;  %v2229_v32 = vmul.f32 %v10175_v25, %v10165_v45  ;;  %9894 = vmatprep.subr.bf16.mxu1 %v10388_v21 }
 0xc1d   :  { %10180 = vrcp.f32 %v2222_v30 }
 0xc1e   :  { %8897 = vmatmul.mubr.msk.f32.gmra.mrb[86].mxu1 %vm803_vm8, %v2229_v32 }
 0xc1f   :  { %v10177_v35 = vpop.eup %10176  ;;  %8899 = vmatprep.mubr.msk.f32.mxu1 %vm10387_vm0, %v10386_v0  ;;  %9896 = vmatpush3.bf16.msra.mxu1 %v9895_v27 }
 0xc20   :  { %v2230_v16 = vmul.f32 %v10177_v35, %v10167_v59  ;;  %9903 = vmatprep.subr.bf16.mxu1 %v10388_v21 }
 0xc22   :  { %8900 = vmatmul.mubr.msk.f32.gmra.mrb[88].mxu1 %vm803_vm8, %v2230_v16 }
 0xc23   :  { %v10179_v22 = vpop.eup %10178  ;;  %8902 = vmatprep.mubr.msk.f32.mxu1 %vm10387_vm0, %v10386_v0 }
 0xc24   :  { %v2231_v38 = vmul.f32 %v10179_v22, %v10169_v60 }
 0xc26   :  { %8903 = vmatmul.mubr.msk.f32.gmra.mrb[90].mxu1 %vm803_vm8, %v2231_v38 }
 0xc27   :  { %v10181_v12 = vpop.eup %10180  ;;  %8905 = vmatprep.mubr.msk.f32.mxu1 %vm10387_vm0, %v10386_v0 }
 0xc28   :  { %v2232_v26 = vmul.f32 %v10181_v12, %v10171_v1 }
 0xc2a   :  { %8906 = vmatmul.mubr.msk.f32.gmra.mrb[92].mxu1 %vm803_vm8, %v2232_v26 }
 0xc2b   :  { %8933 = vmatprep.mubr.msk.f32.mxu1 %vm10387_vm0, %v10386_v0 }
 0xc2e   :  { %8934 = vmatmul.mubr.msk.f32.vlgmr.msra.gmra.mrb[94].mxu1 %vm383_vm5, %v10469_v50 }
 0xc2f   :  { %8936 = vmatprep.mubr.msk.f32.mxu1 %vm10387_vm0, %v10386_v0  ;;  %9905 = vmatpush3.bf16.msra.mxu1 %v9904_v17 }
 0xc30   :  { %9906 = vmatprep.subr.bf16.mxu1 %v10388_v21 }
 0xc32   :  { %8937 = vmatmul.mubr.msk.f32.gmra.mrb[96].mxu1 %vm383_vm5, %v10482_v61 }
 0xc33   :  { %8939 = vmatprep.mubr.msk.f32.mxu1 %vm10387_vm0, %v10386_v0  ;;  %9908 = vmatpush3.bf16.msra.mxu1 %v9907_v36 }
 0xc34   :  { %9917 = vmatprep.subr.bf16.mxu1 %v10388_v21 }
 0xc36   :  { %8940 = vmatmul.mubr.msk.f32.gmra.mrb[98].mxu1 %vm383_vm5, %v10485_v62 }
 0xc37   :  { %8942 = vmatprep.mubr.msk.f32.mxu1 %vm10387_vm0, %v10386_v0 }
 0xc3a   :  { %8943 = vmatmul.mubr.msk.f32.gmra.mrb[100].mxu1 %vm383_vm5, %v10510_v3 }
 0xc3b   :  { %8945 = vmatprep.mubr.msk.f32.mxu1 %vm10387_vm0, %v10386_v0 }
 0xc3e   :  { %8946 = vmatmul.mubr.msk.f32.gmra.mrb[102].mxu1 %vm383_vm5, %v10497_v2 }
 0xc3f   :  { %8979 = vmatprep.mubr.msk.f32.mxu1 %vm10387_vm0, %v10386_v0 }
 0xc42   :  { %8980 = vmatmul.mubr.msk.f32.vlgmr.msra.gmra.mrb[104].mxu1 %vm383_vm5, %v10469_v50 }
 0xc43   :  { %8982 = vmatprep.mubr.msk.f32.mxu1 %vm10387_vm0, %v10386_v0 }
 0xc46   :  { %8983 = vmatmul.mubr.msk.f32.gmra.mrb[106].mxu1 %vm383_vm5, %v10482_v61 }
 0xc47   :  { %8985 = vmatprep.mubr.msk.f32.mxu1 %vm10387_vm0, %v10386_v0 }
 0xc4a   :  { %8986 = vmatmul.mubr.msk.f32.gmra.mrb[108].mxu1 %vm383_vm5, %v10485_v62 }
 0xc4b   :  { %8988 = vmatprep.mubr.msk.f32.mxu1 %vm10387_vm0, %v10386_v0 }
 0xc4e   :  { %8989 = vmatmul.mubr.msk.f32.gmra.mrb[110].mxu1 %vm383_vm5, %v10510_v3 }
 0xc4f   :  { %8991 = vmatprep.mubr.msk.f32.mxu1 %vm10387_vm0, %v10386_v0 }
 0xc52   :  { %8992 = vmatmul.mubr.msk.f32.gmra.mrb[112].mxu1 %vm383_vm5, %v10497_v2 }
 0xc53   :  { %9029 = vmatprep.mubr.msk.f32.mxu1 %vm10387_vm0, %v10386_v0 }
 0xced   :  { %v2317_v28 = vpop.f32.mrb[84].mxu1 }
 0xcee   :  { %v8895_v53 = vpop.f32.mrb[85].mxu1  ;;  %8911 = vmatmul.mubr.msk.f32.vlgmr.msra.gmra.mrb[86].mxu0 %vm38_vm1, %v2317_v28 }
 0xcef   :  { %8913 = vmatprep.mubr.msk.f32.mxu0 %vm10387_vm0, %v10386_v0  ;;  %9899 = vmatpush3.bf16.msra.mxu0 %v9898_v49 }
 0xcf0   :  { %9900 = vmatprep.subr.bf16.mxu0 %v10388_v21 }
 0xcf1   :  { %v2322_v41 = vpop.f32.mrb[86].mxu1 }
 0xcf2   :  { %v8898_v43 = vpop.f32.mrb[87].mxu1  ;;  %8914 = vmatmul.mubr.msk.f32.gmra.mrb[88].mxu0 %vm38_vm1, %v2322_v41 }
 0xcf3   :  { %8916 = vmatprep.mubr.msk.f32.mxu0 %vm10387_vm0, %v10386_v0  ;;  %9902 = vmatpush3.bf16.msra.mxu0 %v9901_v39 }
 0xcf4   :  { %9909 = vmatprep.subr.bf16.mxu0 %v10388_v21 }
 0xcf5   :  { %v2327_v33 = vpop.f32.mrb[88].mxu1 }
 0xcf6   :  { %v8901_v54 = vpop.f32.mrb[89].mxu1  ;;  %8917 = vmatmul.mubr.msk.f32.gmra.mrb[90].mxu0 %vm38_vm1, %v2327_v33 }
 0xcf7   :  { %8919 = vmatprep.mubr.msk.f32.mxu0 %vm10387_vm0, %v10386_v0 }
 0xcf9   :  { %v2332_v55 = vpop.f32.mrb[90].mxu1 }
 0xcfa   :  { %v8904_v56 = vpop.f32.mrb[91].mxu1  ;;  %8920 = vmatmul.mubr.msk.f32.gmra.mrb[92].mxu0 %vm38_vm1, %v2332_v55 }
 0xcfb   :  { %8922 = vmatprep.mubr.msk.f32.mxu0 %vm10387_vm0, %v10386_v0 }
 0xcfd   :  { %v2337_v45 = vpop.f32.mrb[92].mxu1 }
 0xcfe   :  { %v8907_v57 = vpop.f32.mrb[93].mxu1  ;;  %8923 = vmatmul.mubr.msk.f32.gmra.mrb[94].mxu0 %vm38_vm1, %v2337_v45 }
 0xcff   :  { %8956 = vmatprep.mubr.msk.f32.mxu0 %vm10387_vm0, %v10386_v0 }
 0xd01   :  { %v11005_v58 = vpop.f32.mrb[94].mxu1 }
 0xd02   :  { %v8935_v59 = vpop.f32.mrb[95].mxu1  ;;  %8957 = vmatmul.mubr.msk.f32.vlgmr.msra.gmra.mrb[96].mxu0 %vm383_vm5, %v10469_v50 }
 0xd03   :  { %8959 = vmatprep.mubr.msk.f32.mxu0 %vm10387_vm0, %v10386_v0 }
 0xd05   :  { %v11011_v47 = vpop.f32.mrb[96].mxu1 }
 0xd06   :  { %v8938_v60 = vpop.f32.mrb[97].mxu1  ;;  %8960 = vmatmul.mubr.msk.f32.gmra.mrb[98].mxu0 %vm383_vm5, %v10482_v61 }
 0xd07   :  { %8962 = vmatprep.mubr.msk.f32.mxu0 %vm10387_vm0, %v10386_v0 }
 0xd09   :  { %v11017_v63 = vpop.f32.mrb[98].mxu1 }
 0xd0a   :  { %v8941_v1 = vpop.f32.mrb[99].mxu1  ;;  %8963 = vmatmul.mubr.msk.f32.gmra.mrb[100].mxu0 %vm383_vm5, %v10485_v62 }
 0xd0b   :  { %8965 = vmatprep.mubr.msk.f32.mxu0 %vm10387_vm0, %v10386_v0 }
 0xd0d   :  { %v11023_v4 = vpop.f32.mrb[100].mxu1 }
 0xd0e   :  { %v8944_v5 = vpop.f32.mrb[101].mxu1  ;;  %8966 = vmatmul.mubr.msk.f32.gmra.mrb[102].mxu0 %vm383_vm5, %v10510_v3 }
 0xd0f   :  { %8968 = vmatprep.mubr.msk.f32.mxu0 %vm10387_vm0, %v10386_v0 }
 0xd11   :  { %v11029_v6 = vpop.f32.mrb[102].mxu1 }
 0xd12   :  { %v8947_v7 = vpop.f32.mrb[103].mxu1  ;;  %8969 = vmatmul.mubr.msk.f32.gmra.mrb[104].mxu0 %vm383_vm5, %v10497_v2 }
 0xd13   :  { %9004 = vmatprep.mubr.msk.f32.mxu0 %vm10387_vm0, %v10386_v0  ;;  %v7725_v7 = vld [vmem:[#allocation2 + $0x1d0] ss:$0 sm:$0xff] }
 0xd15   :  { %v2725_v8 = vpop.f32.mrb[104].mxu1 }
 0xd16   :  { %v8981_v10 = vpop.f32.mrb[105].mxu1  ;;  %v2726_v20 = vadd.f32 %v7737_v13, %v2725_v8 }
 0xd17   :  { %v2528_v10 = vadd.f32 %v7725_v7, %v11005_v58  ;;  %v2543_v58 = vadd.f32 %v7725_v7, %v11023_v4 }
 0xd19   :  { %v2730_v18 = vpop.f32.mrb[106].mxu1 }
 0xd1a   :  { %v2731_v9 = vadd.f32 %v7737_v13, %v2730_v18  ;;  %v8984_v14 = vpop.f32.mrb[107].mxu1  ;;  %v2538_v18 = vadd.f32 %v7725_v7, %v11017_v63 }
 0xd1c   :  { %v9918_v19 = vpack.c.bf16 %v2731_v9, %v2726_v20  ;;  %v10320_v20 = vld [vmem:[#allocation2 + $0x660] sm:$0xff] }
 0xd1d   :  { %v2735_v25 = vpop.f32.mrb[108].mxu1 }
 0xd1e   :  { %v8987_v27 = vpop.f32.mrb[109].mxu1  ;;  %9919 = vmatpush3.bf16.msra.mxu1 %v9918_v19  ;;  %v2736_v32 = vadd.f32 %v7737_v13, %v2735_v25  ;;  %v10321_v25 = vld [vmem:[#allocation2 + $0x668] sm:$0xff] }
 0xd1f   :  { %9920 = vmatprep.subr.bf16.mxu1 %v10388_v21 }
 0xd21   :  { %v2740_v30 = vpop.f32.mrb[110].mxu1 }
 0xd22   :  { %v2741_v35 = vadd.f32 %v7737_v13, %v2740_v30  ;;  %v8990_v16 = vpop.f32.mrb[111].mxu1 }
 0xd24   :  { %v9921_v22 = vpack.c.bf16 %v2741_v35, %v2736_v32  ;;  %v10322_v35 = vld [vmem:[#allocation2 + $0x670] sm:$0xff] }
 0xd25   :  { %v2745_v38 = vpop.f32.mrb[112].mxu1 }
 0xd26   :  { %v8993_v12 = vpop.f32.mrb[113].mxu1  ;;  %9922 = vmatpush3.bf16.msra.mxu1 %v9921_v22  ;;  %v2746_v26 = vadd.f32 %v7737_v13, %v2745_v38  ;;  %v2533_v13 = vadd.f32 %v7725_v7, %v11011_v47  ;;  %v2548_v47 = vadd.f32 %v7725_v7, %v11029_v6 }
 0xd27   :  { %9027 = vmatprep.subr.mxu1 %v10386_v0 }
 0xd2a   :  { %9028 = vmatpush3.msk.msra.mxu1 %vm875_vm7, %v2746_v26  ;;  %v10323_v26 = vld [vmem:[#allocation2 + $0x678] sm:$0xff] }
 0xd2b   :  { %9923 = vmatprep.subr.bf16.mxu1 %v10388_v21 }
 0xdc1   :  { %v2423_v40 = vpop.f32.mrb[86].mxu0 }
 0xdc2   :  { %v11040_v31 = vadd.f32 %v2423_v40, %v10884_v11  ;;  %v8912_v17 = vpop.f32.mrb[87].mxu0 }
 0xdc5   :  { %v2428_v42 = vpop.f32.mrb[88].mxu0 }
 0xdc6   :  { %v11043_v44 = vadd.f32 %v2428_v42, %v10886_v24  ;;  %v8915_v36 = vpop.f32.mrb[89].mxu0  ;;  %v7731_v24 = vld [vmem:[#allocation2 + $0x1f8] ss:$0 sm:$0xff] }
 0xdc9   :  { %v2433_v23 = vpop.f32.mrb[90].mxu0 }
 0xdca   :  { %v11046_v46 = vadd.f32 %v2433_v23, %v10888_v29  ;;  %v8918_v48 = vpop.f32.mrb[91].mxu0  ;;  %v10324_v23 = vld [vmem:[#allocation2 + $0x680] sm:$0xf] }
 0xdcd   :  { %v2438_v49 = vpop.f32.mrb[92].mxu0 }
 0xdce   :  { %v11049_v51 = vadd.f32 %v2438_v49, %v10890_v34  ;;  %v8921_v52 = vpop.f32.mrb[93].mxu0 }
 0xdd1   :  { %v2443_v28 = vpop.f32.mrb[94].mxu0 }
 0xdd2   :  { %v11052_v11 = vadd.f32 %v2443_v28, %v10892_v37  ;;  %v8924_v53 = vpop.f32.mrb[95].mxu0 }
 0xdd5   :  { %v2626_v39 = vpop.f32.mrb[96].mxu0 }
 0xdd6   :  { %v8958_v41 = vpop.f32.mrb[97].mxu0  ;;  %v2627_v33 = vadd.f32 %v7731_v24, %v2626_v39 }
 0xdd9   :  { %v2631_v43 = vpop.f32.mrb[98].mxu0 }
 0xdda   :  { %v2632_v54 = vadd.f32 %v7731_v24, %v2631_v43  ;;  %v8961_v55 = vpop.f32.mrb[99].mxu0 }
 0xddc   :  { %v9910_v29 = vpack.c.bf16 %v2632_v54, %v2627_v33 }
 0xddd   :  { %v2636_v56 = vpop.f32.mrb[100].mxu0 }
 0xdde   :  { %v8964_v45 = vpop.f32.mrb[101].mxu0  ;;  %9912 = vmatpush3.bf16.xpose.msk.msra.mxu0 %vm10550_vm6, %v9910_v29  ;;  %v2637_v57 = vadd.f32 %v7731_v24, %v2636_v56 }
 0xddf   :  { %9913 = vmatprep.subr.bf16.mxu0 %v10388_v21 }
 0xde1   :  { %v2641_v34 = vpop.f32.mrb[102].mxu0 }
 0xde2   :  { %v2642_v37 = vadd.f32 %v7731_v24, %v2641_v34  ;;  %v8967_v59 = vpop.f32.mrb[103].mxu0 }
 0xde4   :  { %v9914_v60 = vpack.c.bf16 %v2642_v37, %v2637_v57 }
 0xde5   :  { %v2646_v1 = vpop.f32.mrb[104].mxu0 }
 0xde6   :  { %v8970_v5 = vpop.f32.mrb[105].mxu0  ;;  %9916 = vmatpush3.bf16.xpose.msk.msra.mxu0 %vm10550_vm6, %v9914_v60  ;;  %v2647_v8 = vadd.f32 %v7731_v24, %v2646_v1 }
 0xde7   :  { %9002 = vmatprep.subr.mxu0 %v10386_v0 }
 0xdee   :  { %9003 = vmatpush3.xpose.msk.msra.mxu0 %vm38_vm1, %v2647_v8 }
 0xdef   :  { %9044 = vmatprep.subr.mxu0 %v10386_v0 }
 0xdf1   :  { %9005 = vmatmul.mubr.msk.f32.vlgmr.msra.gmra.mrb[106].mxu0 %vm38_vm1, %v2528_v10 }
 0xdf2   :  { %9007 = vmatprep.mubr.msk.f32.mxu0 %vm10387_vm0, %v10386_v0 }
 0xdf5   :  { %9008 = vmatmul.mubr.msk.f32.gmra.mrb[108].mxu0 %vm38_vm1, %v2533_v13 }
 0xdf6   :  { %9010 = vmatprep.mubr.msk.f32.mxu0 %vm10387_vm0, %v10386_v0 }
 0xdf9   :  { %9011 = vmatmul.mubr.msk.f32.gmra.mrb[110].mxu0 %vm38_vm1, %v2538_v18 }
 0xdfa   :  { %9013 = vmatprep.mubr.msk.f32.mxu0 %vm10387_vm0, %v10386_v0 }
 0xdfd   :  { %9014 = vmatmul.mubr.msk.f32.gmra.mrb[112].mxu0 %vm38_vm1, %v2543_v58 }
 0xdfe   :  { %9016 = vmatprep.mubr.msk.f32.mxu0 %vm10387_vm0, %v10386_v0 }
 0xe01   :  { %9017 = vmatmul.mubr.msk.f32.gmra.mrb[114].mxu0 %vm38_vm1, %v2548_v47 }
 0xe02   :  { %9046 = vmatprep.mubr.msk.f32.mxu0 %vm10387_vm0, %v10386_v0 }
 0xec4   :  { %v2845_v63 = vpop.f32.mrb[106].mxu0 }
 0xec5   :  { %v2846_v9 = vadd.f32 %v10320_v20, %v2845_v63  ;;  %v9006_v14 = vpop.f32.mrb[107].mxu0 }
 0xec7   :  { %v2869_v19 = vsel %vm803_vm8, %v2846_v9, -inf }
 0xec8   :  { %2870 = vmax.xlane.f32.xlu1 %v2869_v19  ;;  %v2850_v4 = vpop.f32.mrb[108].mxu0 }
 0xec9   :  { %v2851_v27 = vadd.f32 %v10321_v25, %v2850_v4  ;;  %v9009_v30 = vpop.f32.mrb[109].mxu0 }
 0xecb   :  { %v2872_v32 = vsel %vm803_vm8, %v2851_v27, -inf }
 0xecc   :  { %2873 = vmax.xlane.f32.xlu0 %v2872_v32  ;;  %v2855_v6 = vpop.f32.mrb[110].mxu0 }
 0xecd   :  { %v2856_v16 = vadd.f32 %v10322_v35, %v2855_v6  ;;  %v9012_v22 = vpop.f32.mrb[111].mxu0 }
 0xecf   :  { %v2875_v38 = vsel %vm803_vm8, %v2856_v16, -inf }
 0xed0   :  { %2876 = vmax.xlane.f32.xlu1 %v2875_v38  ;;  %v2860_v12 = vpop.f32.mrb[112].mxu0  ;;  %v3032_v38 = vld [vmem:[#allocation2 + $0x228] sm:$0xff] }
 0xed1   :  { %v2861_v40 = vadd.f32 %v10323_v26, %v2860_v12  ;;  %v9015_v17 = vpop.f32.mrb[113].mxu0  ;;  %9045 = vmatpush3.msra.mxu0 %v3032_v38 }
 0xed2   :  { %9929 = vmatprep.subr.bf16.mxu0 %v10388_v21 }
 0xed3   :  { %v2878_v42 = vsel %vm803_vm8, %v2861_v40, -inf }
 0xed4   :  { %2879 = vmax.xlane.f32.xlu0 %v2878_v42  ;;  %v2865_v36 = vpop.f32.mrb[114].mxu0 }
 0xed5   :  { %v2866_v48 = vadd.f32 %v10324_v23, %v2865_v36  ;;  %v9018_v49 = vpop.f32.mrb[115].mxu0 }
 0xed7   :  { %v2881_v52 = vsel %vm816_vm9, %v2866_v48, -inf }
 0xed8   :  { %2882 = vmax.xlane.f32.xlu1 %v2881_v52 }
 0xf55   :  { %v2871_v28 = vpop.xlane.xlu1 %2870 }
 0xf56   :  { %v2884_v53 = vsub.f32 %v2846_v9, %v2871_v28 }
 0xf58   :  { %v2889_v39 = vmul.f32 1.442695, %v2884_v53  ;;  %v7764_v53 = vld [vmem:[#allocation2 + $0x230] ss:$0 sm:$0xff] }
 0xf59   :  { %v2874_v41 = vpop.xlane.xlu0 %2873 }
 0xf5a   :  { %10182 = vpow2.f32 %v2889_v39  ;;  %v2885_v24 = vsub.f32 %v2851_v27, %v2874_v41 }
 0xf5c   :  { %v2891_v43 = vmul.f32 1.442695, %v2885_v24 }
 0xf5d   :  { %v2877_v33 = vpop.xlane.xlu1 %2876 }
 0xf5e   :  { %10184 = vpow2.f32 %v2891_v43  ;;  %v2886_v54 = vsub.f32 %v2856_v16, %v2877_v33 }
 0xf60   :  { %v2893_v55 = vmul.f32 1.442695, %v2886_v54 }
 0xf61   :  { %v2880_v29 = vpop.xlane.xlu0 %2879 }
 0xf62   :  { %10186 = vpow2.f32 %v2893_v55  ;;  %v2887_v56 = vsub.f32 %v2861_v40, %v2880_v29 }
 0xf64   :  { %v10183_v45 = vpop.eup %10182  ;;  %v2895_v34 = vmul.f32 1.442695, %v2887_v56 }
 0xf65   :  { %v2883_v57 = vpop.xlane.xlu1 %2882  ;;  %v2899_v37 = vsel %vm803_vm8, %v10183_v45, 0.0 }
 0xf66   :  { %10188 = vpow2.f32 %v2895_v34  ;;  %v2888_v59 = vsub.f32 %v2866_v48, %v2883_v57  ;;  %2900 = vadd.xlane.f32.xlu0 %v2899_v37 }
 0xf68   :  { %v10185_v60 = vpop.eup %10184  ;;  %v2897_v1 = vmul.f32 1.442695, %v2888_v59 }
 0xf69   :  { %v2902_v5 = vsel %vm803_vm8, %v10185_v60, 0.0 }
 0xf6a   :  { %10190 = vpow2.f32 %v2897_v1  ;;  %2903 = vadd.xlane.f32.xlu1 %v2902_v5 }
 0xf6c   :  { %v10187_v7 = vpop.eup %10186 }
 0xf6d   :  { %v2905_v8 = vsel %vm803_vm8, %v10187_v7, 0.0 }
 0xf6e   :  { %2906 = vadd.xlane.f32.xlu0 %v2905_v8 }
 0xf70   :  { %v10189_v10 = vpop.eup %10188 }
 0xf71   :  { %v2908_v13 = vsel %vm803_vm8, %v10189_v10, 0.0 }
 0xf72   :  { %2909 = vadd.xlane.f32.xlu1 %v2908_v13 }
 0xf74   :  { %v10191_v18 = vpop.eup %10190 }
 0xf75   :  { %v2911_v58 = vsel %vm816_vm9, %v10191_v18, 0.0 }
 0xf76   :  { %2912 = vadd.xlane.f32.xlu0 %v2911_v58 }
 0xff3   :  { %v2901_v47 = vpop.xlane.xlu0 %2900 }
 0xff4   :  { %10192 = vrcp.f32 %v2901_v47 }
 0xff7   :  { %v2904_v63 = vpop.xlane.xlu1 %2903 }
 0xff8   :  { %10194 = vrcp.f32 %v2904_v63 }
 0xffb   :  { %v2907_v20 = vpop.xlane.xlu0 %2906 }
 0xffc   :  { %10196 = vrcp.f32 %v2907_v20 }
 0xffe   :  { %v10193_v9 = vpop.eup %10192 }
 0xfff   :  { %v2919_v14 = vmul.f32 %v10193_v9, %v10183_v45  ;;  %v2910_v19 = vpop.xlane.xlu1 %2909 }
0x1000   :  { %10198 = vrcp.f32 %v2910_v19 }
0x1001   :  { %9030 = vmatmul.mubr.msk.f32.vlgmr.msra.gmra.mrb[114].mxu1 %vm803_vm8, %v2919_v14 }
0x1002   :  { %v10195_v4 = vpop.eup %10194  ;;  %9032 = vmatprep.mubr.msk.f32.mxu1 %vm10387_vm0, %v10386_v0 }
0x1003   :  { %v2913_v25 = vpop.xlane.xlu0 %2912  ;;  %v2920_v27 = vmul.f32 %v10195_v4, %v10185_v60 }
0x1004   :  { %10200 = vrcp.f32 %v2913_v25 }
0x1005   :  { %9033 = vmatmul.mubr.msk.f32.gmra.mrb[116].mxu1 %vm803_vm8, %v2920_v27 }
0x1006   :  { %v10197_v30 = vpop.eup %10196  ;;  %9035 = vmatprep.mubr.msk.f32.mxu1 %vm10387_vm0, %v10386_v0 }
0x1007   :  { %v2921_v32 = vmul.f32 %v10197_v30, %v10187_v7 }
0x1009   :  { %9036 = vmatmul.mubr.msk.f32.gmra.mrb[118].mxu1 %vm803_vm8, %v2921_v32 }
0x100a   :  { %v10199_v6 = vpop.eup %10198  ;;  %9038 = vmatprep.mubr.msk.f32.mxu1 %vm10387_vm0, %v10386_v0 }
0x100b   :  { %v2922_v35 = vmul.f32 %v10199_v6, %v10189_v10 }
0x100d   :  { %9039 = vmatmul.mubr.msk.f32.gmra.mrb[120].mxu1 %vm803_vm8, %v2922_v35 }
0x100e   :  { %v10201_v16 = vpop.eup %10200  ;;  %9041 = vmatprep.mubr.msk.f32.mxu1 %vm10387_vm0, %v10386_v0 }
0x100f   :  { %v2923_v22 = vmul.f32 %v10201_v16, %v10191_v18 }
0x1011   :  { %9042 = vmatmul.mubr.msk.f32.gmra.mrb[122].mxu1 %vm803_vm8, %v2923_v22 }
0x1012   :  { %9069 = vmatprep.mubr.msk.f32.mxu1 %vm10387_vm0, %v10386_v0 }
0x10d4   :  { %v3008_v12 = vpop.f32.mrb[114].mxu1 }
0x10d5   :  { %v9031_v26 = vpop.f32.mrb[115].mxu1  ;;  %9047 = vmatmul.mubr.msk.f32.vlgmr.msra.gmra.mrb[116].mxu0 %vm38_vm1, %v3008_v12 }
0x10d6   :  { %9049 = vmatprep.mubr.msk.f32.mxu0 %vm10387_vm0, %v10386_v0 }
0x10d8   :  { %v3013_v40 = vpop.f32.mrb[116].mxu1 }
0x10d9   :  { %v9034_v17 = vpop.f32.mrb[117].mxu1  ;;  %9050 = vmatmul.mubr.msk.f32.gmra.mrb[118].mxu0 %vm38_vm1, %v3013_v40 }
0x10da   :  { %9052 = vmatprep.mubr.msk.f32.mxu0 %vm10387_vm0, %v10386_v0 }
0x10dc   :  { %v3018_v42 = vpop.f32.mrb[118].mxu1 }
0x10dd   :  { %v9037_v36 = vpop.f32.mrb[119].mxu1  ;;  %9053 = vmatmul.mubr.msk.f32.gmra.mrb[120].mxu0 %vm38_vm1, %v3018_v42 }
0x10de   :  { %9055 = vmatprep.mubr.msk.f32.mxu0 %vm10387_vm0, %v10386_v0  ;;  %v3245_v36 = vld [vmem:[#allocation2 + $0x238] sm:$0xff] }
0x10e0   :  { %v3023_v23 = vpop.f32.mrb[120].mxu1 }
0x10e1   :  { %v9040_v48 = vpop.f32.mrb[121].mxu1  ;;  %9056 = vmatmul.mubr.msk.f32.gmra.mrb[122].mxu0 %vm38_vm1, %v3023_v23  ;;  %v3246_v23 = vld [vmem:[#allocation2 + $0x240] sm:$0xff] }
0x10e2   :  { %9058 = vmatprep.mubr.msk.f32.mxu0 %vm10387_vm0, %v10386_v0  ;;  %v9924_v48 = vpack.c.bf16 %v3246_v23, %v3245_v36 }
0x10e4   :  { %v3028_v49 = vpop.f32.mrb[122].mxu1  ;;  %9925 = vmatpush3.bf16.msra.mxu1 %v9924_v48 }
0x10e5   :  { %v9043_v52 = vpop.f32.mrb[123].mxu1  ;;  %9059 = vmatmul.mubr.msk.f32.gmra.mrb[124].mxu0 %vm38_vm1, %v3028_v49  ;;  %9926 = vmatprep.subr.bf16.mxu1 %v10388_v21  ;;  %v3247_v49 = vld [vmem:[#allocation2 + $0x248] sm:$0xff] }
0x10e6   :  { %9100 = vmatprep.mubr.msk.f32.mxu0 %vm10387_vm0, %v10386_v0  ;;  %v3248_v52 = vld [vmem:[#allocation2 + $0x250] sm:$0xff] }
0x11a8   :  { %v3114_v28 = vpop.f32.mrb[116].mxu0 }
0x11a9   :  { %v3138_v39 = vadd.f32 %v3114_v28, %v11040_v31  ;;  %v9048_v41 = vpop.f32.mrb[117].mxu0  ;;  %v9927_v28 = vpack.c.bf16 %v3248_v52, %v3247_v49 }
0x11aa   :  { %v3366_v41 = vld [vmem:[#allocation2 + $0x270] sm:$0xff] }
0x11ab   :  { %v3148_v24 = vadd.f32 %v7764_v53, %v3138_v39  ;;  %9928 = vmatpush3.bf16.msra.mxu1 %v9927_v28  ;;  %v3365_v39 = vld [vmem:[#allocation2 + $0x268] sm:$0xff] }
0x11ac   :  { %v3119_v43 = vpop.f32.mrb[118].mxu0  ;;  %9941 = vmatprep.subr.bf16.mxu1 %v10388_v21 }
0x11ad   :  { %v3139_v33 = vadd.f32 %v3119_v43, %v11043_v44  ;;  %v9051_v54 = vpop.f32.mrb[119].mxu0  ;;  %v3153_v55 = vadd.f32 %v3148_v24, %v10469_v50  ;;  %v3367_v43 = vld [vmem:[#allocation2 + $0x278] sm:$0xff] }
0x11ae   :  { %v3368_v54 = vld [vmem:[#allocation2 + $0x280] sm:$0xff] }
0x11af   :  { %v3149_v29 = vadd.f32 %v7764_v53, %v3139_v33  ;;  %v3160_v56 = vsel %vm383_vm5, %v3153_v55, 0.0  ;;  %v9933_v33 = vpack.c.bf16 %v3367_v43, %v3366_v41 }
0x11b0   :  { %3161 = vadd.xlane.f32.xlu1 %v3160_v56  ;;  %v3124_v45 = vpop.f32.mrb[120].mxu0 }
0x11b1   :  { %v3140_v34 = vadd.f32 %v3124_v45, %v11046_v46  ;;  %v9054_v57 = vpop.f32.mrb[121].mxu0  ;;  %v3154_v37 = vadd.f32 %v3149_v29, %v10482_v61 }
0x11b3   :  { %v3150_v59 = vadd.f32 %v7764_v53, %v3140_v34  ;;  %v3163_v31 = vsel %vm383_vm5, %v3154_v37, 0.0 }
0x11b4   :  { %3164 = vadd.xlane.f32.xlu0 %v3163_v31  ;;  %v3129_v60 = vpop.f32.mrb[122].mxu0 }
0x11b5   :  { %v3141_v44 = vadd.f32 %v3129_v60, %v11049_v51  ;;  %v9057_v1 = vpop.f32.mrb[123].mxu0  ;;  %v3155_v50 = vadd.f32 %v3150_v59, %v10485_v62 }
0x11b7   :  { %v3151_v5 = vadd.f32 %v7764_v53, %v3141_v44  ;;  %v3166_v7 = vsel %vm383_vm5, %v3155_v50, 0.0 }
0x11b8   :  { %3167 = vadd.xlane.f32.xlu1 %v3166_v7  ;;  %v3134_v8 = vpop.f32.mrb[124].mxu0  ;;  %v7765_v7 = vld [vmem:[#allocation2 + $0x2a8] ss:$0 sm:$0xff] }
0x11b9   :  { %v3142_v46 = vadd.f32 %v3134_v8, %v11052_v11  ;;  %v9060_v10 = vpop.f32.mrb[125].mxu0  ;;  %v3156_v61 = vadd.f32 %v3151_v5, %v10510_v3 }
0x11bb   :  { %v3152_v13 = vadd.f32 %v7764_v53, %v3142_v46  ;;  %v3169_v18 = vsel %vm383_vm5, %v3156_v61, 0.0  ;;  %v3364_v53 = vld [vmem:[#allocation2 + $0x260] sm:$0xff] }
0x11bc   :  { %3170 = vadd.xlane.f32.xlu0 %v3169_v18  ;;  %v9930_v24 = vpack.c.bf16 %v3365_v39, %v3364_v53 }
0x11bd   :  { %v3157_v51 = vadd.f32 %v3152_v13, %v10497_v2 }
0x11be   :  { %9931 = vmatpush3.bf16.msra.mxu0 %v9930_v24 }
0x11bf   :  { %v3173_v58 = vsel %vm3172_vm10, %v3157_v51, 0.0  ;;  %9932 = vmatprep.subr.bf16.mxu0 %v10388_v21 }
0x11c0   :  { %3174 = vadd.xlane.f32.xlu1 %v3173_v58 }
0x11c2   :  { %9934 = vmatpush3.bf16.msra.mxu0 %v9933_v33 }
0x11c3   :  { %9935 = vmatprep.subr.bf16.mxu0 %v10388_v21 }
0x123d   :  { %v3162_v62 = vpop.xlane.xlu1 %3161 }
0x123e   :  { %v3177_v47 = vmul.f32 0.03125, %v3162_v62 }
0x1240   :  { %v11138_v63 = vsub.f32 %v3153_v55, %v3177_v47  ;;  %v3369_v55 = vld [vmem:[#allocation2 + $0x288] sm:$0xff] }
0x1241   :  { %v3165_v20 = vpop.xlane.xlu0 %3164  ;;  %v9936_v29 = vpack.c.bf16 %v3369_v55, %v3368_v54 }
0x1242   :  { %v3178_v9 = vmul.f32 0.03125, %v3165_v20  ;;  %v3187_v11 = vmul.f32 %v11138_v63, %v11138_v63 }
0x1243   :  { %9937 = vmatpush3.bf16.msra.mxu0 %v9936_v29 }
0x1244   :  { %v11142_v3 = vsub.f32 %v3154_v37, %v3178_v9  ;;  %v3192_v14 = vsel %vm383_vm5, %v3187_v11, 0.0  ;;  %9938 = vmatprep.subr.bf16.mxu0 %v10388_v21 }
0x1245   :  { %v3168_v19 = vpop.xlane.xlu1 %3167  ;;  %3193 = vadd.xlane.f32.xlu0 %v3192_v14 }
0x1246   :  { %v3179_v4 = vmul.f32 0.03125, %v3168_v19  ;;  %v3188_v2 = vmul.f32 %v11142_v3, %v11142_v3 }
0x1248   :  { %v11147_v25 = vsub.f32 %v3155_v50, %v3179_v4  ;;  %v3195_v27 = vsel %vm383_vm5, %v3188_v2, 0.0 }
0x1249   :  { %v3171_v30 = vpop.xlane.xlu0 %3170  ;;  %3196 = vadd.xlane.f32.xlu1 %v3195_v27 }
0x124a   :  { %v3180_v32 = vmul.f32 0.03125, %v3171_v30  ;;  %v3189_v6 = vmul.f32 %v11147_v25, %v11147_v25 }
0x124c   :  { %v11152_v35 = vsub.f32 %v3156_v61, %v3180_v32  ;;  %v3198_v16 = vsel %vm383_vm5, %v3189_v6, 0.0  ;;  %v7766_v61 = vld [vmem:[#allocation2 + $0x2b0] ss:$0 sm:$0xff] }
0x124d   :  { %3199 = vadd.xlane.f32.xlu0 %v3198_v16  ;;  %v3175_v22 = vpop.xlane.xlu1 %3174  ;;  %v3371_v16 = vld [vmem:[#allocation2 + $0x298] sm:$0xff] }
0x124e   :  { %v3181_v38 = vmul.f32 0.03125, %v3175_v22  ;;  %v3190_v12 = vmul.f32 %v11152_v35, %v11152_v35 }
0x1250   :  { %v11157_v26 = vsub.f32 %v3157_v51, %v3181_v38  ;;  %v3201_v40 = vsel %vm383_vm5, %v3190_v12, 0.0  ;;  %v7767_v38 = vld [vmem:[#allocation2 + $0x258] ss:$0 sm:$0xff] }
0x1251   :  { %3202 = vadd.xlane.f32.xlu1 %v3201_v40 }
0x1252   :  { %v3191_v17 = vmul.f32 %v11157_v26, %v11157_v26 }
0x1254   :  { %v3204_v42 = vsel %vm3172_vm10, %v3191_v17, 0.0 }
0x1255   :  { %3205 = vadd.xlane.f32.xlu0 %v3204_v42 }
0x12d2   :  { %v3194_v56 = vpop.xlane.xlu0 %3193 }
0x12d3   :  { %v3207_v45 = vmul.f32 0.03125, %v3194_v56  ;;  %v7773_v56 = vld [vmem:[#allocation2 + $0x2a0] ss:$0 sm:$0xff] }
0x12d5   :  { %v3212_v34 = vadd.f32 1e-05, %v3207_v45 }
0x12d6   :  { %v3197_v57 = vpop.xlane.xlu1 %3196 }
0x12d7   :  { %10202 = vrsqrt.f32 %v3212_v34  ;;  %v3208_v37 = vmul.f32 0.03125, %v3197_v57 }
0x12d9   :  { %v3213_v59 = vadd.f32 1e-05, %v3208_v37 }
0x12da   :  { %v3200_v31 = vpop.xlane.xlu0 %3199 }
0x12db   :  { %10204 = vrsqrt.f32 %v3213_v59  ;;  %v3209_v60 = vmul.f32 0.03125, %v3200_v31 }
0x12dd   :  { %v3214_v44 = vadd.f32 1e-05, %v3209_v60 }
0x12de   :  { %v3203_v1 = vpop.xlane.xlu1 %3202 }
0x12df   :  { %10206 = vrsqrt.f32 %v3214_v44  ;;  %v3210_v50 = vmul.f32 0.03125, %v3203_v1 }
0x12e1   :  { %v10203_v5 = vpop.eup %10202  ;;  %v3215_v8 = vadd.f32 1e-05, %v3210_v50 }
0x12e2   :  { %v3222_v46 = vmul.f32 %v10203_v5, %v11138_v63  ;;  %v3206_v10 = vpop.xlane.xlu0 %3205 }
0x12e3   :  { %10208 = vrsqrt.f32 %v3215_v8  ;;  %v3211_v13 = vmul.f32 0.03125, %v3206_v10 }
0x12e4   :  { %v3231_v18 = vmul.f32 %v7765_v7, %v3222_v46 }
0x12e5   :  { %v10205_v51 = vpop.eup %10204  ;;  %v3216_v58 = vadd.f32 1e-05, %v3211_v13 }
0x12e6   :  { %v11169_v62 = vadd.f32 %v7766_v61, %v3231_v18  ;;  %v3223_v47 = vmul.f32 %v10205_v51, %v11142_v3 }
0x12e7   :  { %10210 = vrsqrt.f32 %v3216_v58 }
0x12e8   :  { %9070 = vmatmul.mubr.msk.f32.vlgmr.msra.gmra.mrb[124].mxu1 %vm383_vm5, %v11169_v62  ;;  %v3232_v20 = vmul.f32 %v7765_v7, %v3223_v47 }
0x12e9   :  { %v10207_v9 = vpop.eup %10206  ;;  %9072 = vmatprep.mubr.msk.f32.mxu1 %vm10387_vm0, %v10386_v0 }
0x12ea   :  { %v11176_v63 = vadd.f32 %v7766_v61, %v3232_v20  ;;  %v3224_v11 = vmul.f32 %v10207_v9, %v11147_v25 }
0x12ec   :  { %9073 = vmatmul.mubr.msk.f32.gmra.mrb[126].mxu1 %vm383_vm5, %v11176_v63  ;;  %v3233_v14 = vmul.f32 %v7765_v7, %v3224_v11 }
0x12ed   :  { %v10209_v19 = vpop.eup %10208  ;;  %9075 = vmatprep.mubr.msk.f32.mxu1 %vm10387_vm0, %v10386_v0 }
0x12ee   :  { %v11183_v3 = vadd.f32 %v7766_v61, %v3233_v14  ;;  %v3225_v4 = vmul.f32 %v10209_v19, %v11152_v35  ;;  %v3370_v35 = vld [vmem:[#allocation2 + $0x290] sm:$0xff] }
0x12ef   :  { %v9939_v22 = vpack.c.bf16 %v3371_v16, %v3370_v35 }
0x12f0   :  { %9076 = vmatmul.mubr.msk.f32.gmra.mrb[128].mxu1 %vm383_vm5, %v11183_v3  ;;  %v3234_v2 = vmul.f32 %v7765_v7, %v3225_v4 }
0x12f1   :  { %v10211_v27 = vpop.eup %10210  ;;  %9078 = vmatprep.mubr.msk.f32.mxu1 %vm10387_vm0, %v10386_v0  ;;  %9940 = vmatpush3.bf16.msra.mxu0 %v9939_v22 }
0x12f2   :  { %v11190_v25 = vadd.f32 %v7766_v61, %v3234_v2  ;;  %v3226_v30 = vmul.f32 %v10211_v27, %v11157_v26  ;;  %9947 = vmatprep.subr.bf16.mxu0 %v10388_v21 }
0x12f4   :  { %9079 = vmatmul.mubr.msk.f32.gmra.mrb[130].mxu1 %vm383_vm5, %v11190_v25  ;;  %v3235_v32 = vmul.f32 %v7765_v7, %v3226_v30 }
0x12f5   :  { %9081 = vmatprep.mubr.msk.f32.mxu1 %vm10387_vm0, %v10386_v0 }
0x12f6   :  { %v11197_v6 = vadd.f32 %v7766_v61, %v3235_v32 }
0x12f8   :  { %9082 = vmatmul.mubr.msk.f32.gmra.mrb[132].mxu1 %vm383_vm5, %v11197_v6 }
0x12f9   :  { %9123 = vmatprep.mubr.msk.f32.mxu1 %vm10387_vm0, %v10386_v0 }
0x13bb   :  { %v3335_v12 = vpop.f32.mrb[124].mxu1 }
0x13bc   :  { %v3336_v26 = vadd.f32 %v7767_v38, %v3335_v12  ;;  %v9071_v40 = vpop.f32.mrb[125].mxu1 }
0x13be   :  { %v3359_v17 = vmax.f32 %v3336_v26, 0.0 }
0x13bf   :  { %v3340_v42 = vpop.f32.mrb[126].mxu1 }
0x13c0   :  { %v3341_v36 = vadd.f32 %v7767_v38, %v3340_v42  ;;  %v9074_v23 = vpop.f32.mrb[127].mxu1  ;;  %9101 = vmatmul.mubr.msk.f32.vlgmr.msra.gmra.mrb[126].mxu0 %vm3377_vm11, %v3359_v17 }
0x13c1   :  { %9103 = vmatprep.mubr.msk.f32.mxu0 %vm10387_vm0, %v10386_v0 }
0x13c2   :  { %v3360_v48 = vmax.f32 %v3341_v36, 0.0 }
0x13c3   :  { %v3345_v49 = vpop.f32.mrb[128].mxu1 }
0x13c4   :  { %v3346_v52 = vadd.f32 %v7767_v38, %v3345_v49  ;;  %v9077_v28 = vpop.f32.mrb[129].mxu1  ;;  %9104 = vmatmul.mubr.msk.f32.gmra.mrb[128].mxu0 %vm3377_vm11, %v3360_v48 }
0x13c5   :  { %9106 = vmatprep.mubr.msk.f32.mxu0 %vm10387_vm0, %v10386_v0  ;;  %v3573_v28 = vld [vmem:[#allocation2 + $0x2c8] sm:$0xff] }
0x13c6   :  { %v3361_v53 = vmax.f32 %v3346_v52, 0.0 }
0x13c7   :  { %v3350_v39 = vpop.f32.mrb[130].mxu1 }
0x13c8   :  { %v3351_v41 = vadd.f32 %v7767_v38, %v3350_v39  ;;  %v9080_v24 = vpop.f32.mrb[131].mxu1  ;;  %9107 = vmatmul.mubr.msk.f32.gmra.mrb[130].mxu0 %vm3377_vm11, %v3361_v53  ;;  %v3574_v53 = vld [vmem:[#allocation2 + $0x2d0] sm:$0xff] }
0x13c9   :  { %9109 = vmatprep.mubr.msk.f32.mxu0 %vm10387_vm0, %v10386_v0  ;;  %v3687_v39 = vld [vmem:[#allocation2 + $0x2f0] sm:$0xff]  ;;  %v3688_v24 = vld [vmem:[#allocation2 + $0x2f8] sm:$0xff] }
0x13ca   :  { %v3362_v43 = vmax.f32 %v3351_v41, 0.0  ;;  %v9942_v41 = vpack.c.bf16 %v3574_v53, %v3573_v28 }
0x13cb   :  { %v3355_v33 = vpop.f32.mrb[132].mxu1 }
0x13cc   :  { %v3356_v54 = vadd.f32 %v7767_v38, %v3355_v33  ;;  %v9083_v55 = vpop.f32.mrb[133].mxu1  ;;  %9110 = vmatmul.mubr.msk.f32.gmra.mrb[132].mxu0 %vm3377_vm11, %v3362_v43  ;;  %v9948_v43 = vpack.c.bf16 %v3688_v24, %v3687_v39  ;;  %9943 = vmatpush3.bf16.msra.mxu1 %v9942_v41  ;;  %v3575_v33 = vld [vmem:[#allocation2 + $0x2d8] sm:$0xff] }
0x13cd   :  { %9112 = vmatprep.mubr.msk.f32.mxu0 %vm10387_vm0, %v10386_v0  ;;  %9944 = vmatprep.subr.bf16.mxu1 %v10388_v21  ;;  %v3689_v55 = vld [vmem:[#allocation2 + $0x300] sm:$0xff] }
0x13ce   :  { %v3363_v29 = vmax.f32 %v3356_v54, 0.0  ;;  %9949 = vmatpush3.bf16.msra.mxu0 %v9948_v43  ;;  %v3576_v54 = vld [vmem:[#allocation2 + $0x2e0] sm:$0xff] }
0x13cf   :  { %9950 = vmatprep.subr.bf16.mxu0 %v10388_v21 }
0x13d0   :  { %9113 = vmatmul.mubr.msk.f32.gmra.mrb[134].mxu0 %vm3377_vm11, %v3363_v29  ;;  %v9945_v29 = vpack.c.bf16 %v3576_v54, %v3575_v33 }
0x13d1   :  { %9146 = vmatprep.mubr.msk.f32.mxu0 %vm10387_vm0, %v10386_v0 }
0x13d2   :  { %9946 = vmatpush3.bf16.msra.mxu1 %v9945_v29 }
0x13d3   :  { %9953 = vmatprep.subr.bf16.mxu1 %v10388_v21 }
0x1493   :  { %v3459_v45 = vpop.f32.mrb[126].mxu0 }
0x1494   :  { %v3460_v34 = vadd.f32 %v7773_v56, %v3459_v45  ;;  %v9102_v57 = vpop.f32.mrb[127].mxu0 }
0x1496   :  { %v3483_v37 = vadd.f32 %v3460_v34, %v11169_v62 }
0x1497   :  { %v3464_v59 = vpop.f32.mrb[128].mxu0 }
0x1498   :  { %v3465_v31 = vadd.f32 %v7773_v56, %v3464_v59  ;;  %v9105_v60 = vpop.f32.mrb[129].mxu0  ;;  %v3490_v44 = vsel %vm383_vm5, %v3483_v37, 0.0 }
0x1499   :  { %3491 = vadd.xlane.f32.xlu1 %v3490_v44 }
0x149a   :  { %v3484_v1 = vadd.f32 %v3465_v31, %v11176_v63 }
0x149b   :  { %v3469_v50 = vpop.f32.mrb[130].mxu0 }
0x149c   :  { %v3470_v5 = vadd.f32 %v7773_v56, %v3469_v50  ;;  %v9108_v7 = vpop.f32.mrb[131].mxu0  ;;  %v3493_v8 = vsel %vm383_vm5, %v3484_v1, 0.0 }
0x149d   :  { %3494 = vadd.xlane.f32.xlu0 %v3493_v8 }
0x149e   :  { %v3485_v46 = vadd.f32 %v3470_v5, %v11183_v3 }
0x149f   :  { %v3474_v10 = vpop.f32.mrb[132].mxu0 }
0x14a0   :  { %v3475_v61 = vadd.f32 %v7773_v56, %v3474_v10  ;;  %v9111_v13 = vpop.f32.mrb[133].mxu0  ;;  %v3496_v18 = vsel %vm383_vm5, %v3485_v46, 0.0 }
0x14a1   :  { %3497 = vadd.xlane.f32.xlu1 %v3496_v18  ;;  %v7780_v18 = vld [vmem:[#allocation2 + $0x2c0] ss:$0 sm:$0xff] }
0x14a2   :  { %v3486_v51 = vadd.f32 %v3475_v61, %v11190_v25 }
0x14a3   :  { %v3479_v58 = vpop.f32.mrb[134].mxu0 }
0x14a4   :  { %v3480_v62 = vadd.f32 %v7773_v56, %v3479_v58  ;;  %v9114_v47 = vpop.f32.mrb[135].mxu0  ;;  %v3499_v20 = vsel %vm383_vm5, %v3486_v51, 0.0  ;;  %v3690_v56 = vld [vmem:[#allocation2 + $0x308] sm:$0xff]  ;;  %v3786_v58 = vld [vmem:[#allocation2 + $0x318] sm:$0xff] }
0x14a5   :  { %3500 = vadd.xlane.f32.xlu0 %v3499_v20  ;;  %v9951_v45 = vpack.c.bf16 %v3690_v56, %v3689_v55 }
0x14a6   :  { %v3487_v9 = vadd.f32 %v3480_v62, %v11197_v6  ;;  %v3787_v62 = vld [vmem:[#allocation2 + $0x320] sm:$0xff] }
0x14a7   :  { %9952 = vmatpush3.bf16.msra.mxu0 %v9951_v45 }
0x14a8   :  { %v3502_v63 = vsel %vm3172_vm10, %v3487_v9, 0.0  ;;  %9959 = vmatprep.subr.bf16.mxu0 %v10388_v21 }
0x14a9   :  { %3503 = vadd.xlane.f32.xlu1 %v3502_v63 }
0x1526   :  { %v3492_v11 = vpop.xlane.xlu1 %3491 }
0x1527   :  { %v3505_v14 = vmul.f32 0.03125, %v3492_v11 }
0x1529   :  { %v11229_v19 = vsub.f32 %v3483_v37, %v3505_v14  ;;  %v9954_v14 = vpack.c.bf16 %v3787_v62, %v3786_v58 }
0x152a   :  { %v3495_v3 = vpop.xlane.xlu0 %3494 }
0x152b   :  { %v3506_v4 = vmul.f32 0.03125, %v3495_v3  ;;  %v3515_v2 = vmul.f32 %v11229_v19, %v11229_v19  ;;  %v3788_v3 = vld [vmem:[#allocation2 + $0x328] sm:$0xff] }
0x152d   :  { %v11233_v27 = vsub.f32 %v3484_v1, %v3506_v4  ;;  %v3520_v25 = vsel %vm383_vm5, %v3515_v2, 0.0  ;;  %v3789_v4 = vld [vmem:[#allocation2 + $0x330] sm:$0xff] }
0x152e   :  { %v3498_v30 = vpop.xlane.xlu1 %3497  ;;  %3521 = vadd.xlane.f32.xlu0 %v3520_v25 }
0x152f   :  { %v3507_v32 = vmul.f32 0.03125, %v3498_v30  ;;  %v3516_v6 = vmul.f32 %v11233_v27, %v11233_v27  ;;  %v9957_v30 = vpack.c.bf16 %v3789_v4, %v3788_v3 }
0x1531   :  { %v11238_v35 = vsub.f32 %v3485_v46, %v3507_v32  ;;  %v3523_v16 = vsel %vm383_vm5, %v3516_v6, 0.0  ;;  %v7779_v46 = vld [vmem:[#allocation2 + $0x2b8] ss:$0 sm:$0xff] }
0x1532   :  { %v3501_v22 = vpop.xlane.xlu0 %3500  ;;  %3524 = vadd.xlane.f32.xlu1 %v3523_v16 }
0x1533   :  { %v3508_v38 = vmul.f32 0.03125, %v3501_v22  ;;  %v3517_v12 = vmul.f32 %v11238_v35, %v11238_v35 }
0x1535   :  { %v11243_v26 = vsub.f32 %v3486_v51, %v3508_v38  ;;  %v3526_v40 = vsel %vm383_vm5, %v3517_v12, 0.0 }
0x1536   :  { %3527 = vadd.xlane.f32.xlu0 %v3526_v40  ;;  %v3504_v17 = vpop.xlane.xlu1 %3503 }
0x1537   :  { %v3509_v42 = vmul.f32 0.03125, %v3504_v17  ;;  %v3518_v36 = vmul.f32 %v11243_v26, %v11243_v26 }
0x1539   :  { %v11248_v23 = vsub.f32 %v3487_v9, %v3509_v42  ;;  %v3529_v48 = vsel %vm383_vm5, %v3518_v36, 0.0 }
0x153a   :  { %3530 = vadd.xlane.f32.xlu1 %v3529_v48 }
0x153b   :  { %v3519_v49 = vmul.f32 %v11248_v23, %v11248_v23 }
0x153d   :  { %v3532_v52 = vsel %vm3172_vm10, %v3519_v49, 0.0  ;;  %v7787_v49 = vld [vmem:[#allocation2 + $0x310] ss:$0 sm:$0xff] }
0x153e   :  { %3533 = vadd.xlane.f32.xlu0 %v3532_v52 }
0x15bb   :  { %v3522_v34 = vpop.xlane.xlu0 %3521 }
0x15bc   :  { %v3535_v57 = vmul.f32 0.03125, %v3522_v34 }
0x15be   :  { %v3540_v37 = vadd.f32 1e-05, %v3535_v57 }
0x15bf   :  { %v3525_v59 = vpop.xlane.xlu1 %3524 }
0x15c0   :  { %10212 = vrsqrt.f32 %v3540_v37  ;;  %v3536_v31 = vmul.f32 0.03125, %v3525_v59 }
0x15c2   :  { %v3541_v60 = vadd.f32 1e-05, %v3536_v31 }
0x15c3   :  { %v3528_v44 = vpop.xlane.xlu0 %3527 }
0x15c4   :  { %10214 = vrsqrt.f32 %v3541_v60  ;;  %v3537_v1 = vmul.f32 0.03125, %v3528_v44 }
0x15c6   :  { %v3542_v50 = vadd.f32 1e-05, %v3537_v1 }
0x15c7   :  { %v3531_v5 = vpop.xlane.xlu1 %3530 }
0x15c8   :  { %10216 = vrsqrt.f32 %v3542_v50  ;;  %v3538_v7 = vmul.f32 0.03125, %v3531_v5 }
0x15ca   :  { %v10213_v8 = vpop.eup %10212  ;;  %v3543_v10 = vadd.f32 1e-05, %v3538_v7 }
0x15cb   :  { %v3550_v61 = vmul.f32 %v10213_v8, %v11229_v19  ;;  %v3534_v13 = vpop.xlane.xlu0 %3533  ;;  %v7793_v8 = vld [vmem:[#allocation2 + $0x338] ss:$0 sm:$0xff] }
0x15cc   :  { %10218 = vrsqrt.f32 %v3543_v10  ;;  %v3539_v51 = vmul.f32 0.03125, %v3534_v13  ;;  %v4170_v13 = vld [vmem:[#allocation2 + $0x350] sm:$0xff] }
0x15cd   :  { %v3559_v47 = vmul.f32 %v7779_v46, %v3550_v61  ;;  %v4169_v61 = vld [vmem:[#allocation2 + $0x348] sm:$0xff] }
0x15ce   :  { %v10215_v20 = vpop.eup %10214  ;;  %v3544_v9 = vadd.f32 1e-05, %v3539_v51 }
0x15cf   :  { %v11259_v63 = vadd.f32 %v7780_v18, %v3559_v47  ;;  %v3551_v11 = vmul.f32 %v10215_v20, %v11233_v27  ;;  %v9974_v20 = vpack.c.bf16 %v4170_v13, %v4169_v61 }
0x15d0   :  { %10220 = vrsqrt.f32 %v3544_v9 }
0x15d1   :  { %v3560_v2 = vmul.f32 %v7779_v46, %v3551_v11  ;;  %9124 = vmatmul.mubr.msk.f32.vlgmr.msra.gmra.mrb[134].mxu1 %vm383_vm5, %v11259_v63  ;;  %9147 = vmatmul.mubr.msk.f32.vlgmr.msra.gmra.mrb[136].mxu0 %vm383_vm5, %v11259_v63  ;;  %v4171_v11 = vld [vmem:[#allocation2 + $0x358] sm:$0xff] }
0x15d2   :  { %v10217_v19 = vpop.eup %10216  ;;  %9126 = vmatprep.mubr.msk.f32.mxu1 %vm10387_vm0, %v10386_v0  ;;  %9149 = vmatprep.mubr.msk.f32.mxu0 %vm10387_vm0, %v10386_v0 }
0x15d3   :  { %v11270_v25 = vadd.f32 %v7780_v18, %v3560_v2  ;;  %v3552_v27 = vmul.f32 %v10217_v19, %v11238_v35  ;;  %9955 = vmatpush3.bf16.msra.mxu1 %v9954_v14  ;;  %v4172_v14 = vld [vmem:[#allocation2 + $0x360] sm:$0xff] }
0x15d4   :  { %9956 = vmatprep.subr.bf16.mxu1 %v10388_v21  ;;  %v9977_v19 = vpack.c.bf16 %v4172_v14, %v4171_v11 }
0x15d5   :  { %v3561_v32 = vmul.f32 %v7779_v46, %v3552_v27  ;;  %9127 = vmatmul.mubr.msk.f32.gmra.mrb[136].mxu1 %vm383_vm5, %v11270_v25  ;;  %9150 = vmatmul.mubr.msk.f32.gmra.mrb[138].mxu0 %vm383_vm5, %v11270_v25 }
0x15d6   :  { %v10219_v6 = vpop.eup %10218  ;;  %9129 = vmatprep.mubr.msk.f32.mxu1 %vm10387_vm0, %v10386_v0  ;;  %9152 = vmatprep.mubr.msk.f32.mxu0 %vm10387_vm0, %v10386_v0 }
0x15d7   :  { %v11282_v16 = vadd.f32 %v7780_v18, %v3561_v32  ;;  %v3553_v35 = vmul.f32 %v10219_v6, %v11243_v26  ;;  %9958 = vmatpush3.bf16.msra.mxu1 %v9957_v30 }
0x15d8   :  { %9967 = vmatprep.subr.bf16.mxu1 %v10388_v21 }
0x15d9   :  { %v3562_v22 = vmul.f32 %v7779_v46, %v3553_v35  ;;  %9130 = vmatmul.mubr.msk.f32.gmra.mrb[138].mxu1 %vm383_vm5, %v11282_v16  ;;  %9153 = vmatmul.mubr.msk.f32.gmra.mrb[140].mxu0 %vm383_vm5, %v11282_v16 }
0x15da   :  { %v10221_v38 = vpop.eup %10220  ;;  %9132 = vmatprep.mubr.msk.f32.mxu1 %vm10387_vm0, %v10386_v0  ;;  %9155 = vmatprep.mubr.msk.f32.mxu0 %vm10387_vm0, %v10386_v0 }
0x15db   :  { %v11294_v12 = vadd.f32 %v7780_v18, %v3562_v22  ;;  %v3554_v26 = vmul.f32 %v10221_v38, %v11248_v23 }
0x15dd   :  { %v3563_v40 = vmul.f32 %v7779_v46, %v3554_v26  ;;  %9133 = vmatmul.mubr.msk.f32.gmra.mrb[140].mxu1 %vm383_vm5, %v11294_v12  ;;  %9156 = vmatmul.mubr.msk.f32.gmra.mrb[142].mxu0 %vm383_vm5, %v11294_v12  ;;  %v7781_v46 = vld [vmem:[#allocation2 + $0x2e8] ss:$0 sm:$0xff] }
0x15de   :  { %9135 = vmatprep.mubr.msk.f32.mxu1 %vm10387_vm0, %v10386_v0  ;;  %9158 = vmatprep.mubr.msk.f32.mxu0 %vm10387_vm0, %v10386_v0 }
0x15df   :  { %v11305_v17 = vadd.f32 %v7780_v18, %v3563_v40 }
0x15e1   :  { %9136 = vmatmul.mubr.msk.f32.gmra.mrb[142].mxu1 %vm383_vm5, %v11305_v17  ;;  %9159 = vmatmul.mubr.msk.f32.gmra.mrb[144].mxu0 %vm383_vm5, %v11305_v17 }
0x15e2   :  { %9169 = vmatprep.mubr.msk.f32.mxu1 %vm10387_vm0, %v10386_v0  ;;  %9194 = vmatprep.mubr.msk.f32.mxu0 %vm10387_vm0, %v10386_v0 }
0x15e5   :  { %9170 = vmatmul.mubr.msk.f32.vlgmr.msra.gmra.mrb[144].mxu1 %vm383_vm5, %v11259_v63 }
0x15e6   :  { %9172 = vmatprep.mubr.msk.f32.mxu1 %vm10387_vm0, %v10386_v0 }
0x15e9   :  { %9173 = vmatmul.mubr.msk.f32.gmra.mrb[146].mxu1 %vm383_vm5, %v11270_v25 }
0x15ea   :  { %9175 = vmatprep.mubr.msk.f32.mxu1 %vm10387_vm0, %v10386_v0 }
0x15ed   :  { %9176 = vmatmul.mubr.msk.f32.gmra.mrb[148].mxu1 %vm383_vm5, %v11282_v16 }
0x15ee   :  { %9178 = vmatprep.mubr.msk.f32.mxu1 %vm10387_vm0, %v10386_v0 }
0x15f1   :  { %9179 = vmatmul.mubr.msk.f32.gmra.mrb[150].mxu1 %vm383_vm5, %v11294_v12 }
0x15f2   :  { %9181 = vmatprep.mubr.msk.f32.mxu1 %vm10387_vm0, %v10386_v0 }
0x15f5   :  { %9182 = vmatmul.mubr.msk.f32.gmra.mrb[152].mxu1 %vm383_vm5, %v11305_v17 }
0x15f6   :  { %9219 = vmatprep.mubr.msk.f32.mxu1 %vm10387_vm0, %v10386_v0 }
0x16a4   :  { %v3663_v42 = vpop.f32.mrb[134].mxu1  ;;  %v3762_v36 = vpop.f32.mrb[136].mxu0 }
0x16a5   :  { %v9125_v23 = vpop.f32.mrb[135].mxu1  ;;  %v9148_v48 = vpop.f32.mrb[137].mxu0  ;;  %v3763_v53 = vadd.f32 %v7787_v49, %v3762_v36  ;;  %v3664_v47 = vadd.f32 %v7781_v46, %v3663_v42 }
0x16a6   :  { %v4367_v23 = vld [vmem:[#allocation2 + $0x398] sm:$0xff]  ;;  %v4368_v48 = vld [vmem:[#allocation2 + $0x3a0] sm:$0xff] }
0x16a8   :  { %v3668_v52 = vpop.f32.mrb[136].mxu1  ;;  %v3767_v28 = vpop.f32.mrb[138].mxu0 }
0x16a9   :  { %v3768_v39 = vadd.f32 %v7787_v49, %v3767_v28  ;;  %v9128_v41 = vpop.f32.mrb[137].mxu1  ;;  %v9151_v24 = vpop.f32.mrb[139].mxu0  ;;  %v3669_v2 = vadd.f32 %v7781_v46, %v3668_v52  ;;  %v4369_v52 = vld [vmem:[#allocation2 + $0x3a8] sm:$0xff]  ;;  %v4370_v28 = vld [vmem:[#allocation2 + $0x3b0] sm:$0xff] }
0x16aa   :  { %v11406_v41 = vld [vmem:[#allocation2 + $0x660] sm:$0xff] }
0x16ab   :  { %v9960_v43 = vpack.c.bf16 %v3768_v39, %v3763_v53  ;;  %v9989_v53 = vpack.c.bf16 %v4370_v28, %v4369_v52 }
0x16ac   :  { %v3673_v33 = vpop.f32.mrb[138].mxu1  ;;  %v3772_v54 = vpop.f32.mrb[140].mxu0 }
0x16ad   :  { %v9131_v55 = vpop.f32.mrb[139].mxu1  ;;  %v9154_v29 = vpop.f32.mrb[141].mxu0  ;;  %9962 = vmatpush3.bf16.xpose.msk.msra.mxu0 %vm10550_vm6, %v9960_v43  ;;  %v3773_v34 = vadd.f32 %v7787_v49, %v3772_v54  ;;  %v3674_v35 = vadd.f32 %v7781_v46, %v3673_v33 }
0x16ae   :  { %9963 = vmatprep.subr.bf16.mxu0 %v10388_v21  ;;  %v11413_v55 = vld [vmem:[#allocation2 + $0x668] sm:$0xff] }
0x16b0   :  { %v3678_v56 = vpop.f32.mrb[140].mxu1  ;;  %v3777_v45 = vpop.f32.mrb[142].mxu0 }
0x16b1   :  { %v3778_v57 = vadd.f32 %v7787_v49, %v3777_v45  ;;  %v9134_v37 = vpop.f32.mrb[141].mxu1  ;;  %v9157_v59 = vpop.f32.mrb[143].mxu0  ;;  %v3679_v40 = vadd.f32 %v7781_v46, %v3678_v56 }
0x16b3   :  { %v9964_v31 = vpack.c.bf16 %v3778_v57, %v3773_v34  ;;  %v11417_v57 = vld [vmem:[#allocation2 + $0x670] sm:$0xff] }
0x16b4   :  { %v3683_v60 = vpop.f32.mrb[142].mxu1  ;;  %v3782_v44 = vpop.f32.mrb[144].mxu0 }
0x16b5   :  { %v9137_v1 = vpop.f32.mrb[143].mxu1  ;;  %v9160_v50 = vpop.f32.mrb[145].mxu0  ;;  %9966 = vmatpush3.bf16.xpose.msk.msra.mxu0 %vm10550_vm6, %v9964_v31  ;;  %v3783_v10 = vadd.f32 %v7787_v49, %v3782_v44  ;;  %v3684_v36 = vadd.f32 %v7781_v46, %v3683_v60  ;;  %v9986_v49 = vpack.c.bf16 %v4368_v48, %v4367_v23  ;;  %v11421_v44 = vld [vmem:[#allocation2 + $0x678] sm:$0xff] }
0x16b6   :  { %9192 = vmatprep.subr.mxu0 %v10386_v0 }
0x16b8   :  { %v3861_v5 = vpop.f32.mrb[144].mxu1 }
0x16b9   :  { %v9171_v7 = vpop.f32.mrb[145].mxu1  ;;  %v3862_v51 = vadd.f32 %v7793_v8, %v3861_v5 }
0x16bc   :  { %v3866_v18 = vpop.f32.mrb[146].mxu1 }
0x16bd   :  { %v3867_v58 = vadd.f32 %v7793_v8, %v3866_v18  ;;  %v9174_v62 = vpop.f32.mrb[147].mxu1  ;;  %9193 = vmatpush3.xpose.msk.msra.mxu0 %vm38_vm1, %v3783_v10 }
0x16be   :  { %9973 = vmatprep.subr.bf16.mxu0 %v10388_v21 }
0x16bf   :  { %v9968_v9 = vpack.c.bf16 %v3867_v58, %v3862_v51 }
0x16c0   :  { %v3871_v3 = vpop.f32.mrb[148].mxu1  ;;  %9195 = vmatmul.mubr.msk.f32.vlgmr.msra.gmra.mrb[146].mxu0 %vm38_vm1, %v3664_v47 }
0x16c1   :  { %v9177_v4 = vpop.f32.mrb[149].mxu1  ;;  %9969 = vmatpush3.bf16.msra.mxu1 %v9968_v9  ;;  %9197 = vmatprep.mubr.msk.f32.mxu0 %vm10387_vm0, %v10386_v0  ;;  %v3872_v30 = vadd.f32 %v7793_v8, %v3871_v3 }
0x16c2   :  { %9970 = vmatprep.subr.bf16.mxu1 %v10388_v21  ;;  %9975 = vmatpush3.bf16.msra.mxu0 %v9974_v20 }
0x16c3   :  { %9976 = vmatprep.subr.bf16.mxu0 %v10388_v21 }
0x16c4   :  { %v3876_v27 = vpop.f32.mrb[150].mxu1  ;;  %9198 = vmatmul.mubr.msk.f32.gmra.mrb[148].mxu0 %vm38_vm1, %v3669_v2  ;;  %v7827_v2 = vld [vmem:[#allocation2 + $0x3b8] ss:$0 sm:$0xff] }
0x16c5   :  { %v3877_v32 = vadd.f32 %v7793_v8, %v3876_v27  ;;  %v9180_v6 = vpop.f32.mrb[151].mxu1  ;;  %9200 = vmatprep.mubr.msk.f32.mxu0 %vm10387_vm0, %v10386_v0 }
0x16c6   :  { %9978 = vmatpush3.bf16.msra.mxu0 %v9977_v19 }
0x16c7   :  { %v9971_v22 = vpack.c.bf16 %v3877_v32, %v3872_v30  ;;  %9985 = vmatprep.subr.bf16.mxu0 %v10388_v21 }
0x16c8   :  { %v3881_v38 = vpop.f32.mrb[152].mxu1  ;;  %9201 = vmatmul.mubr.msk.f32.gmra.mrb[150].mxu0 %vm38_vm1, %v3674_v35 }
0x16c9   :  { %v9183_v26 = vpop.f32.mrb[153].mxu1  ;;  %9972 = vmatpush3.bf16.msra.mxu1 %v9971_v22  ;;  %9203 = vmatprep.mubr.msk.f32.mxu0 %vm10387_vm0, %v10386_v0  ;;  %v3882_v42 = vadd.f32 %v7793_v8, %v3881_v38  ;;  %v11425_v8 = vld [vmem:[#allocation2 + $0x680] sm:$0xf] }
0x16ca   :  { %9217 = vmatprep.subr.mxu1 %v10386_v0 }
0x16cc   :  { %9204 = vmatmul.mubr.msk.f32.gmra.mrb[152].mxu0 %vm38_vm1, %v3679_v40 }
0x16cd   :  { %9218 = vmatpush3.msk.msra.mxu1 %vm875_vm7, %v3882_v42  ;;  %9206 = vmatprep.mubr.msk.f32.mxu0 %vm10387_vm0, %v10386_v0 }
0x16ce   :  { %9979 = vmatprep.subr.bf16.mxu1 %v10388_v21 }
0x16d0   :  { %9207 = vmatmul.mubr.msk.f32.gmra.mrb[154].mxu0 %vm38_vm1, %v3684_v36 }
0x16d1   :  { %9242 = vmatprep.mubr.msk.f32.mxu0 %vm10387_vm0, %v10386_v0 }
0x16d4   :  { %9243 = vmatmul.mubr.msk.f32.vlgmr.msra.gmra.mrb[156].mxu0 %vm383_vm5, %v11259_v63 }
0x16d5   :  { %9245 = vmatprep.mubr.msk.f32.mxu0 %vm10387_vm0, %v10386_v0  ;;  %9987 = vmatpush3.bf16.msra.mxu0 %v9986_v49 }
0x16d6   :  { %9988 = vmatprep.subr.bf16.mxu0 %v10388_v21 }
0x16d8   :  { %9246 = vmatmul.mubr.msk.f32.gmra.mrb[158].mxu0 %vm383_vm5, %v11270_v25 }
0x16d9   :  { %9248 = vmatprep.mubr.msk.f32.mxu0 %vm10387_vm0, %v10386_v0  ;;  %9990 = vmatpush3.bf16.msra.mxu0 %v9989_v53 }
0x16da   :  { %9999 = vmatprep.subr.bf16.mxu0 %v10388_v21 }
0x16dc   :  { %9249 = vmatmul.mubr.msk.f32.gmra.mrb[160].mxu0 %vm383_vm5, %v11282_v16 }
0x16dd   :  { %9251 = vmatprep.mubr.msk.f32.mxu0 %vm10387_vm0, %v10386_v0 }
0x16e0   :  { %9252 = vmatmul.mubr.msk.f32.gmra.mrb[162].mxu0 %vm383_vm5, %v11294_v12 }
0x16e1   :  { %9254 = vmatprep.mubr.msk.f32.mxu0 %vm10387_vm0, %v10386_v0 }
0x16e4   :  { %9255 = vmatmul.mubr.msk.f32.gmra.mrb[164].mxu0 %vm383_vm5, %v11305_v17 }
0x16e5   :  { %9288 = vmatprep.mubr.msk.f32.mxu0 %vm10387_vm0, %v10386_v0 }
0x16e8   :  { %9289 = vmatmul.mubr.msk.f32.vlgmr.msra.gmra.mrb[166].mxu0 %vm383_vm5, %v11259_v63 }
0x16e9   :  { %9291 = vmatprep.mubr.msk.f32.mxu0 %vm10387_vm0, %v10386_v0 }
0x16ec   :  { %9292 = vmatmul.mubr.msk.f32.gmra.mrb[168].mxu0 %vm383_vm5, %v11270_v25 }
0x16ed   :  { %9294 = vmatprep.mubr.msk.f32.mxu0 %vm10387_vm0, %v10386_v0 }
0x16f0   :  { %9295 = vmatmul.mubr.msk.f32.gmra.mrb[170].mxu0 %vm383_vm5, %v11282_v16 }
0x16f1   :  { %9297 = vmatprep.mubr.msk.f32.mxu0 %vm10387_vm0, %v10386_v0 }
0x16f4   :  { %9298 = vmatmul.mubr.msk.f32.gmra.mrb[172].mxu0 %vm383_vm5, %v11294_v12 }
0x16f5   :  { %9300 = vmatprep.mubr.msk.f32.mxu0 %vm10387_vm0, %v10386_v0 }
0x16f8   :  { %9301 = vmatmul.mubr.msk.f32.gmra.mrb[174].mxu0 %vm383_vm5, %v11305_v17 }
0x16f9   :  { %9338 = vmatprep.mubr.msk.f32.mxu0 %vm10387_vm0, %v10386_v0 }
0x1793   :  { %v3981_v39 = vpop.f32.mrb[146].mxu0 }
0x1794   :  { %v11409_v24 = vadd.f32 %v11406_v41, %v3981_v39  ;;  %v9196_v43 = vpop.f32.mrb[147].mxu0 }
0x1796   :  { %v4005_v33 = vsel %vm803_vm8, %v11409_v24, -inf }
0x1797   :  { %4006 = vmax.xlane.f32.xlu1 %v4005_v33  ;;  %v3986_v54 = vpop.f32.mrb[148].mxu0 }
0x1798   :  { %v3987_v29 = vadd.f32 %v11413_v55, %v3986_v54  ;;  %v9199_v56 = vpop.f32.mrb[149].mxu0 }
0x179a   :  { %v4008_v45 = vsel %vm803_vm8, %v3987_v29, -inf }
0x179b   :  { %4009 = vmax.xlane.f32.xlu0 %v4008_v45  ;;  %v3991_v34 = vpop.f32.mrb[150].mxu0 }
0x179c   :  { %v3992_v37 = vadd.f32 %v11417_v57, %v3991_v34  ;;  %v9202_v59 = vpop.f32.mrb[151].mxu0 }
0x179e   :  { %v4011_v31 = vsel %vm803_vm8, %v3992_v37, -inf }
0x179f   :  { %4012 = vmax.xlane.f32.xlu1 %v4011_v31  ;;  %v3996_v60 = vpop.f32.mrb[152].mxu0 }
0x17a0   :  { %v3997_v1 = vadd.f32 %v11421_v44, %v3996_v60  ;;  %v9205_v50 = vpop.f32.mrb[153].mxu0 }
0x17a2   :  { %v4014_v5 = vsel %vm803_vm8, %v3997_v1, -inf }
0x17a3   :  { %4015 = vmax.xlane.f32.xlu0 %v4014_v5  ;;  %v4001_v7 = vpop.f32.mrb[154].mxu0 }
0x17a4   :  { %v4002_v46 = vadd.f32 %v11425_v8, %v4001_v7  ;;  %v9208_v10 = vpop.f32.mrb[155].mxu0 }
0x17a6   :  { %v4017_v61 = vsel %vm816_vm9, %v4002_v46, -inf }
0x17a7   :  { %4018 = vmax.xlane.f32.xlu1 %v4017_v61  ;;  %v11429_v13 = vpop.f32.mrb[156].mxu0 }
0x17a8   :  { %v9244_v18 = vpop.f32.mrb[157].mxu0 }
0x17ab   :  { %v11431_v51 = vpop.f32.mrb[158].mxu0 }
0x17ac   :  { %v9247_v58 = vpop.f32.mrb[159].mxu0 }
0x17af   :  { %v11433_v62 = vpop.f32.mrb[160].mxu0 }
0x17b0   :  { %v9250_v47 = vpop.f32.mrb[161].mxu0 }
0x17b3   :  { %v11435_v20 = vpop.f32.mrb[162].mxu0 }
0x17b4   :  { %v9253_v9 = vpop.f32.mrb[163].mxu0 }
0x17b7   :  { %v11437_v11 = vpop.f32.mrb[164].mxu0 }
0x17b8   :  { %v9256_v14 = vpop.f32.mrb[165].mxu0 }
0x17bb   :  { %v4442_v3 = vpop.f32.mrb[166].mxu0 }
0x17bc   :  { %v9290_v4 = vpop.f32.mrb[167].mxu0  ;;  %v4443_v27 = vadd.f32 %v7827_v2, %v4442_v3  ;;  %v4268_v3 = vld [vmem:[#allocation2 + $0x370] sm:$0xff] }
0x17bd   :  { %v4269_v4 = vld [vmem:[#allocation2 + $0x378] sm:$0xff] }
0x17bf   :  { %v4447_v19 = vpop.f32.mrb[168].mxu0 }
0x17c0   :  { %v4448_v30 = vadd.f32 %v7827_v2, %v4447_v19  ;;  %v9293_v32 = vpop.f32.mrb[169].mxu0  ;;  %v9980_v19 = vpack.c.bf16 %v4269_v4, %v4268_v3 }
0x17c1   :  { %v4270_v32 = vld [vmem:[#allocation2 + $0x380] sm:$0xff] }
0x17c2   :  { %v10000_v6 = vpack.c.bf16 %v4448_v30, %v4443_v27 }
0x17c3   :  { %v4452_v35 = vpop.f32.mrb[170].mxu0 }
0x17c4   :  { %v9296_v22 = vpop.f32.mrb[171].mxu0  ;;  %10001 = vmatpush3.bf16.msra.mxu0 %v10000_v6  ;;  %v4453_v26 = vadd.f32 %v7827_v2, %v4452_v35  ;;  %v4271_v6 = vld [vmem:[#allocation2 + $0x388] sm:$0xff] }
0x17c5   :  { %10002 = vmatprep.subr.bf16.mxu0 %v10388_v21  ;;  %v9983_v22 = vpack.c.bf16 %v4271_v6, %v4270_v32 }
0x17c7   :  { %v4457_v38 = vpop.f32.mrb[172].mxu0 }
0x17c8   :  { %v4458_v40 = vadd.f32 %v7827_v2, %v4457_v38  ;;  %v9299_v42 = vpop.f32.mrb[173].mxu0 }
0x17ca   :  { %v10003_v36 = vpack.c.bf16 %v4458_v40, %v4453_v26 }
0x17cb   :  { %v4462_v23 = vpop.f32.mrb[174].mxu0 }
0x17cc   :  { %v9302_v48 = vpop.f32.mrb[175].mxu0  ;;  %10004 = vmatpush3.bf16.msra.mxu0 %v10003_v36  ;;  %v4463_v49 = vadd.f32 %v7827_v2, %v4462_v23 }
0x17cd   :  { %9336 = vmatprep.subr.mxu0 %v10386_v0 }
0x17d0   :  { %9337 = vmatpush3.msk.msra.mxu0 %vm875_vm7, %v4463_v49 }
0x17d1   :  { %9370 = vmatprep.subr.mxu0 %v10386_v0 }
0x1824   :  { %v4007_v52 = vpop.xlane.xlu1 %4006 }
0x1825   :  { %v4020_v28 = vsub.f32 %v11409_v24, %v4007_v52 }
0x1827   :  { %v4025_v53 = vmul.f32 1.442695, %v4020_v28 }
0x1828   :  { %v4010_v39 = vpop.xlane.xlu0 %4009 }
0x1829   :  { %10222 = vpow2.f32 %v4025_v53  ;;  %v4021_v43 = vsub.f32 %v3987_v29, %v4010_v39 }
0x182b   :  { %v4027_v33 = vmul.f32 1.442695, %v4021_v43 }
0x182c   :  { %v4013_v54 = vpop.xlane.xlu1 %4012 }
0x182d   :  { %10224 = vpow2.f32 %v4027_v33  ;;  %v4022_v56 = vsub.f32 %v3992_v37, %v4013_v54 }
0x182f   :  { %v4029_v45 = vmul.f32 1.442695, %v4022_v56 }
0x1830   :  { %v4016_v34 = vpop.xlane.xlu0 %4015 }
0x1831   :  { %10226 = vpow2.f32 %v4029_v45  ;;  %v4023_v59 = vsub.f32 %v3997_v1, %v4016_v34 }
0x1833   :  { %v10223_v31 = vpop.eup %10222  ;;  %v4031_v60 = vmul.f32 1.442695, %v4023_v59 }
0x1834   :  { %v4019_v50 = vpop.xlane.xlu1 %4018  ;;  %v4035_v5 = vsel %vm803_vm8, %v10223_v31, 0.0 }
0x1835   :  { %10228 = vpow2.f32 %v4031_v60  ;;  %v4024_v7 = vsub.f32 %v4002_v46, %v4019_v50  ;;  %4036 = vadd.xlane.f32.xlu0 %v4035_v5  ;;  %v7821_v60 = vld [vmem:[#allocation2 + $0x390] ss:$0 sm:$0xff] }
0x1837   :  { %v10225_v24 = vpop.eup %10224  ;;  %v4033_v10 = vmul.f32 1.442695, %v4024_v7 }
0x1838   :  { %v4038_v29 = vsel %vm803_vm8, %v10225_v24, 0.0 }
0x1839   :  { %10230 = vpow2.f32 %v4033_v10  ;;  %4039 = vadd.xlane.f32.xlu1 %v4038_v29 }
0x183b   :  { %v10227_v61 = vpop.eup %10226 }
0x183c   :  { %v4041_v37 = vsel %vm803_vm8, %v10227_v61, 0.0 }
0x183d   :  { %4042 = vadd.xlane.f32.xlu0 %v4041_v37 }
0x183f   :  { %v10229_v18 = vpop.eup %10228 }
0x1840   :  { %v4044_v1 = vsel %vm803_vm8, %v10229_v18, 0.0 }
0x1841   :  { %4045 = vadd.xlane.f32.xlu1 %v4044_v1 }
0x1843   :  { %v10231_v58 = vpop.eup %10230 }
0x1844   :  { %v4047_v47 = vsel %vm816_vm9, %v10231_v58, 0.0 }
0x1845   :  { %4048 = vadd.xlane.f32.xlu0 %v4047_v47 }
0x18c2   :  { %v4037_v46 = vpop.xlane.xlu0 %4036 }
0x18c3   :  { %10232 = vrcp.f32 %v4037_v46 }
0x18c6   :  { %v4040_v9 = vpop.xlane.xlu1 %4039 }
0x18c7   :  { %10234 = vrcp.f32 %v4040_v9 }
0x18ca   :  { %v4043_v14 = vpop.xlane.xlu0 %4042 }
0x18cb   :  { %10236 = vrcp.f32 %v4043_v14  ;;  %v7815_v14 = vld [vmem:[#allocation2 + $0x368] ss:$0 sm:$0xff] }
0x18cc   :  { %v4245_v4 = vadd.f32 %v7815_v14, %v11429_v13  ;;  %v4260_v13 = vadd.f32 %v7815_v14, %v11435_v20 }
0x18cd   :  { %v10233_v2 = vpop.eup %10232 }
0x18ce   :  { %v4055_v27 = vmul.f32 %v10233_v2, %v10223_v31  ;;  %v4046_v30 = vpop.xlane.xlu1 %4045  ;;  %v4250_v2 = vadd.f32 %v7815_v14, %v11431_v51  ;;  %v4265_v51 = vadd.f32 %v7815_v14, %v11437_v11 }
0x18cf   :  { %10238 = vrcp.f32 %v4046_v30 }
0x18d0   :  { %9220 = vmatmul.mubr.msk.f32.vlgmr.msra.gmra.mrb[154].mxu1 %vm803_vm8, %v4055_v27 }
0x18d1   :  { %v10235_v35 = vpop.eup %10234  ;;  %9222 = vmatprep.mubr.msk.f32.mxu1 %vm10387_vm0, %v10386_v0  ;;  %9981 = vmatpush3.bf16.msra.mxu1 %v9980_v19  ;;  %v4255_v19 = vadd.f32 %v7815_v14, %v11433_v62 }
0x18d2   :  { %v4049_v38 = vpop.xlane.xlu0 %4048  ;;  %v4056_v26 = vmul.f32 %v10235_v35, %v10225_v24  ;;  %9982 = vmatprep.subr.bf16.mxu1 %v10388_v21 }
0x18d3   :  { %10240 = vrcp.f32 %v4049_v38 }
0x18d4   :  { %9223 = vmatmul.mubr.msk.f32.gmra.mrb[156].mxu1 %vm803_vm8, %v4056_v26 }
0x18d5   :  { %v10237_v40 = vpop.eup %10236  ;;  %9225 = vmatprep.mubr.msk.f32.mxu1 %vm10387_vm0, %v10386_v0  ;;  %9984 = vmatpush3.bf16.msra.mxu1 %v9983_v22 }
0x18d6   :  { %v4057_v42 = vmul.f32 %v10237_v40, %v10227_v61  ;;  %9991 = vmatprep.subr.bf16.mxu1 %v10388_v21 }
0x18d8   :  { %9226 = vmatmul.mubr.msk.f32.gmra.mrb[158].mxu1 %vm803_vm8, %v4057_v42 }
0x18d9   :  { %v10239_v36 = vpop.eup %10238  ;;  %9228 = vmatprep.mubr.msk.f32.mxu1 %vm10387_vm0, %v10386_v0 }
0x18da   :  { %v4058_v23 = vmul.f32 %v10239_v36, %v10229_v18 }
0x18dc   :  { %9229 = vmatmul.mubr.msk.f32.gmra.mrb[160].mxu1 %vm803_vm8, %v4058_v23 }
0x18dd   :  { %v10241_v48 = vpop.eup %10240  ;;  %9231 = vmatprep.mubr.msk.f32.mxu1 %vm10387_vm0, %v10386_v0 }
0x18de   :  { %v4059_v49 = vmul.f32 %v10241_v48, %v10231_v58 }
0x18e0   :  { %9232 = vmatmul.mubr.msk.f32.gmra.mrb[162].mxu1 %vm803_vm8, %v4059_v49 }
0x18e1   :  { %9265 = vmatprep.mubr.msk.f32.mxu1 %vm10387_vm0, %v10386_v0 }
0x18e4   :  { %9266 = vmatmul.mubr.msk.f32.vlgmr.msra.gmra.mrb[164].mxu1 %vm383_vm5, %v11259_v63 }
0x18e5   :  { %9268 = vmatprep.mubr.msk.f32.mxu1 %vm10387_vm0, %v10386_v0 }
0x18e8   :  { %9269 = vmatmul.mubr.msk.f32.gmra.mrb[166].mxu1 %vm383_vm5, %v11270_v25 }
0x18e9   :  { %9271 = vmatprep.mubr.msk.f32.mxu1 %vm10387_vm0, %v10386_v0 }
0x18ec   :  { %9272 = vmatmul.mubr.msk.f32.gmra.mrb[168].mxu1 %vm383_vm5, %v11282_v16 }
0x18ed   :  { %9274 = vmatprep.mubr.msk.f32.mxu1 %vm10387_vm0, %v10386_v0 }
0x18f0   :  { %9275 = vmatmul.mubr.msk.f32.gmra.mrb[170].mxu1 %vm383_vm5, %v11294_v12 }
0x18f1   :  { %9277 = vmatprep.mubr.msk.f32.mxu1 %vm10387_vm0, %v10386_v0 }
0x18f4   :  { %9278 = vmatmul.mubr.msk.f32.gmra.mrb[172].mxu1 %vm383_vm5, %v11305_v17 }
0x18f5   :  { %9313 = vmatprep.mubr.msk.f32.mxu1 %vm10387_vm0, %v10386_v0 }
0x19a3   :  { %v11486_v52 = vpop.f32.mrb[154].mxu1 }
0x19a4   :  { %v9221_v28 = vpop.f32.mrb[155].mxu1 }
0x19a7   :  { %v11488_v53 = vpop.f32.mrb[156].mxu1 }
0x19a8   :  { %v9224_v39 = vpop.f32.mrb[157].mxu1 }
0x19ab   :  { %v11490_v43 = vpop.f32.mrb[158].mxu1 }
0x19ac   :  { %v9227_v33 = vpop.f32.mrb[159].mxu1 }
0x19af   :  { %v11492_v54 = vpop.f32.mrb[160].mxu1 }
0x19b0   :  { %v9230_v56 = vpop.f32.mrb[161].mxu1 }
0x19b3   :  { %v11494_v45 = vpop.f32.mrb[162].mxu1 }
0x19b4   :  { %v9233_v34 = vpop.f32.mrb[163].mxu1 }
0x19b7   :  { %v4343_v59 = vpop.f32.mrb[164].mxu1 }
0x19b8   :  { %v9267_v31 = vpop.f32.mrb[165].mxu1  ;;  %v4344_v5 = vadd.f32 %v7821_v60, %v4343_v59 }
0x19bb   :  { %v4348_v50 = vpop.f32.mrb[166].mxu1 }
0x19bc   :  { %v4349_v7 = vadd.f32 %v7821_v60, %v4348_v50  ;;  %v9270_v24 = vpop.f32.mrb[167].mxu1 }
0x19be   :  { %v9992_v10 = vpack.c.bf16 %v4349_v7, %v4344_v5 }
0x19bf   :  { %v4353_v29 = vpop.f32.mrb[168].mxu1 }
0x19c0   :  { %v9273_v61 = vpop.f32.mrb[169].mxu1  ;;  %9994 = vmatpush3.bf16.xpose.msk.msra.mxu1 %vm10550_vm6, %v9992_v10  ;;  %v4354_v18 = vadd.f32 %v7821_v60, %v4353_v29 }
0x19c1   :  { %9995 = vmatprep.subr.bf16.mxu1 %v10388_v21 }
0x19c3   :  { %v4358_v37 = vpop.f32.mrb[170].mxu1 }
0x19c4   :  { %v4359_v1 = vadd.f32 %v7821_v60, %v4358_v37  ;;  %v9276_v58 = vpop.f32.mrb[171].mxu1 }
0x19c6   :  { %v9996_v47 = vpack.c.bf16 %v4359_v1, %v4354_v18 }
0x19c7   :  { %v4363_v46 = vpop.f32.mrb[172].mxu1 }
0x19c8   :  { %v9279_v9 = vpop.f32.mrb[173].mxu1  ;;  %9998 = vmatpush3.bf16.xpose.msk.msra.mxu1 %vm10550_vm6, %v9996_v47  ;;  %v4364_v3 = vadd.f32 %v7821_v60, %v4363_v46 }
0x19c9   :  { %9311 = vmatprep.subr.mxu1 %v10386_v0 }
0x19d0   :  { %9312 = vmatpush3.xpose.msk.msra.mxu1 %vm38_vm1, %v4364_v3 }
0x19d1   :  { %9353 = vmatprep.subr.mxu1 %v10386_v0 }
0x19d3   :  { %9314 = vmatmul.mubr.msk.f32.vlgmr.msra.gmra.mrb[174].mxu1 %vm38_vm1, %v4245_v4 }
0x19d4   :  { %9316 = vmatprep.mubr.msk.f32.mxu1 %vm10387_vm0, %v10386_v0 }
0x19d7   :  { %9317 = vmatmul.mubr.msk.f32.gmra.mrb[176].mxu1 %vm38_vm1, %v4250_v2 }
0x19d8   :  { %9319 = vmatprep.mubr.msk.f32.mxu1 %vm10387_vm0, %v10386_v0 }
0x19db   :  { %9320 = vmatmul.mubr.msk.f32.gmra.mrb[178].mxu1 %vm38_vm1, %v4255_v19 }
0x19dc   :  { %9322 = vmatprep.mubr.msk.f32.mxu1 %vm10387_vm0, %v10386_v0 }
0x19df   :  { %9323 = vmatmul.mubr.msk.f32.gmra.mrb[180].mxu1 %vm38_vm1, %v4260_v13 }
0x19e0   :  { %9325 = vmatprep.mubr.msk.f32.mxu1 %vm10387_vm0, %v10386_v0 }
0x19e3   :  { %9326 = vmatmul.mubr.msk.f32.gmra.mrb[182].mxu1 %vm38_vm1, %v4265_v51 }
0x19e4   :  { %9355 = vmatprep.mubr.msk.f32.mxu1 %vm10387_vm0, %v10386_v0 }
0x1aa6   :  { %v4562_v62 = vpop.f32.mrb[174].mxu1 }
0x1aa7   :  { %v4563_v27 = vadd.f32 %v11406_v41, %v4562_v62  ;;  %v9315_v30 = vpop.f32.mrb[175].mxu1 }
0x1aa9   :  { %v4586_v32 = vsel %vm803_vm8, %v4563_v27, -inf }
0x1aaa   :  { %4587 = vmax.xlane.f32.xlu1 %v4586_v32  ;;  %v4567_v20 = vpop.f32.mrb[176].mxu1 }
0x1aab   :  { %v4568_v6 = vadd.f32 %v11413_v55, %v4567_v20  ;;  %v9318_v35 = vpop.f32.mrb[177].mxu1 }
0x1aad   :  { %v4589_v22 = vsel %vm803_vm8, %v4568_v6, -inf }
0x1aae   :  { %4590 = vmax.xlane.f32.xlu0 %v4589_v22  ;;  %v4572_v11 = vpop.f32.mrb[178].mxu1 }
0x1aaf   :  { %v4573_v38 = vadd.f32 %v11417_v57, %v4572_v11  ;;  %v9321_v26 = vpop.f32.mrb[179].mxu1 }
0x1ab1   :  { %v4592_v40 = vsel %vm803_vm8, %v4573_v38, -inf }
0x1ab2   :  { %4593 = vmax.xlane.f32.xlu1 %v4592_v40  ;;  %v4577_v42 = vpop.f32.mrb[180].mxu1 }
0x1ab3   :  { %v4578_v36 = vadd.f32 %v11421_v44, %v4577_v42  ;;  %v9324_v23 = vpop.f32.mrb[181].mxu1 }
0x1ab5   :  { %v4595_v48 = vsel %vm803_vm8, %v4578_v36, -inf }
0x1ab6   :  { %4596 = vmax.xlane.f32.xlu0 %v4595_v48  ;;  %v4582_v49 = vpop.f32.mrb[182].mxu1  ;;  %v5059_v48 = vld [vmem:[#allocation2 + $0x3f0] sm:$0xff] }
0x1ab7   :  { %v4583_v28 = vadd.f32 %v11425_v8, %v4582_v49  ;;  %v9327_v39 = vpop.f32.mrb[183].mxu1  ;;  %v5060_v49 = vld [vmem:[#allocation2 + $0x3f8] sm:$0xff] }
0x1ab8   :  { %v5061_v39 = vld [vmem:[#allocation2 + $0x400] sm:$0xff] }
0x1ab9   :  { %v4598_v33 = vsel %vm816_vm9, %v4583_v28, -inf }
0x1aba   :  { %4599 = vmax.xlane.f32.xlu1 %v4598_v33  ;;  %v5062_v33 = vld [vmem:[#allocation2 + $0x408] sm:$0xff] }
0x1b37   :  { %v4588_v56 = vpop.xlane.xlu1 %4587 }
0x1b38   :  { %v4601_v34 = vsub.f32 %v4563_v27, %v4588_v56  ;;  %v10015_v56 = vpack.c.bf16 %v5062_v33, %v5061_v39 }
0x1b3a   :  { %v4606_v59 = vmul.f32 1.442695, %v4601_v34  ;;  %v4963_v34 = vld [vmem:[#allocation2 + $0x3e0] sm:$0xff] }
0x1b3b   :  { %v4591_v31 = vpop.xlane.xlu0 %4590 }
0x1b3c   :  { %10242 = vpow2.f32 %v4606_v59  ;;  %v4602_v60 = vsub.f32 %v4568_v6, %v4591_v31  ;;  %v4168_v6 = vld [vmem:[#allocation2 + $0x340] sm:$0xff] }
0x1b3e   :  { %v4608_v50 = vmul.f32 1.442695, %v4602_v60 }
0x1b3f   :  { %v4594_v5 = vpop.xlane.xlu1 %4593 }
0x1b40   :  { %10244 = vpow2.f32 %v4608_v50  ;;  %v4603_v7 = vsub.f32 %v4573_v38, %v4594_v5 }
0x1b42   :  { %v4610_v24 = vmul.f32 1.442695, %v4603_v7 }
0x1b43   :  { %v4597_v10 = vpop.xlane.xlu0 %4596 }
0x1b44   :  { %10246 = vpow2.f32 %v4610_v24  ;;  %v4604_v29 = vsub.f32 %v4578_v36, %v4597_v10 }
0x1b46   :  { %v10243_v61 = vpop.eup %10242  ;;  %v4612_v37 = vmul.f32 1.442695, %v4604_v29 }
0x1b47   :  { %v4600_v18 = vpop.xlane.xlu1 %4599  ;;  %v4616_v1 = vsel %vm803_vm8, %v10243_v61, 0.0 }
0x1b48   :  { %10248 = vpow2.f32 %v4612_v37  ;;  %v4605_v58 = vsub.f32 %v4583_v28, %v4600_v18  ;;  %4617 = vadd.xlane.f32.xlu0 %v4616_v1  ;;  %v10012_v28 = vpack.c.bf16 %v5060_v49, %v5059_v48  ;;  %v5159_v37 = vld [vmem:[#allocation2 + $0x420] sm:$0xff] }
0x1b4a   :  { %v10245_v47 = vpop.eup %10244  ;;  %v4614_v46 = vmul.f32 1.442695, %v4605_v58 }
0x1b4b   :  { %v4619_v9 = vsel %vm803_vm8, %v10245_v47, 0.0 }
0x1b4c   :  { %10250 = vpow2.f32 %v4614_v46  ;;  %4620 = vadd.xlane.f32.xlu1 %v4619_v9  ;;  %v5161_v46 = vld [vmem:[#allocation2 + $0x430] sm:$0xff] }
0x1b4e   :  { %v10247_v14 = vpop.eup %10246 }
0x1b4f   :  { %v4622_v3 = vsel %vm803_vm8, %v10247_v14, 0.0 }
0x1b50   :  { %4623 = vadd.xlane.f32.xlu0 %v4622_v3 }
0x1b52   :  { %v10249_v4 = vpop.eup %10248 }
0x1b53   :  { %v4625_v2 = vsel %vm803_vm8, %v10249_v4, 0.0 }
0x1b54   :  { %4626 = vadd.xlane.f32.xlu1 %v4625_v2 }
0x1b56   :  { %v10251_v19 = vpop.eup %10250 }
0x1b57   :  { %v4628_v13 = vsel %vm816_vm9, %v10251_v19, 0.0 }
0x1b58   :  { %4629 = vadd.xlane.f32.xlu0 %v4628_v13 }
0x1bd5   :  { %v4618_v51 = vpop.xlane.xlu0 %4617 }
0x1bd6   :  { %10252 = vrcp.f32 %v4618_v51 }
0x1bd9   :  { %v4621_v62 = vpop.xlane.xlu1 %4620 }
0x1bda   :  { %10254 = vrcp.f32 %v4621_v62 }
0x1bdd   :  { %v4624_v27 = vpop.xlane.xlu0 %4623 }
0x1bde   :  { %10256 = vrcp.f32 %v4624_v27 }
0x1be0   :  { %v10253_v30 = vpop.eup %10252 }
0x1be1   :  { %v4636_v32 = vmul.f32 %v10253_v30, %v10243_v61  ;;  %v4627_v20 = vpop.xlane.xlu1 %4626  ;;  %v5158_v61 = vld [vmem:[#allocation2 + $0x418] sm:$0xff] }
0x1be2   :  { %10258 = vrcp.f32 %v4627_v20  ;;  %v10018_v58 = vpack.c.bf16 %v5159_v37, %v5158_v61  ;;  %v7859_v61 = vld [vmem:[#allocation2 + $0x3e8] ss:$0 sm:$0xff] }
0x1be3   :  { %9339 = vmatmul.mubr.msk.f32.vlgmr.msra.gmra.mrb[176].mxu0 %vm803_vm8, %v4636_v32 }
0x1be4   :  { %v10255_v35 = vpop.eup %10254  ;;  %9341 = vmatprep.mubr.msk.f32.mxu0 %vm10387_vm0, %v10386_v0  ;;  %9371 = vmatpush3.msra.mxu0 %v4168_v6  ;;  %v7865_v6 = vld [vmem:[#allocation2 + $0x410] ss:$0 sm:$0xff] }
0x1be5   :  { %v4630_v22 = vpop.xlane.xlu0 %4629  ;;  %v4637_v11 = vmul.f32 %v10255_v35, %v10245_v47  ;;  %10011 = vmatprep.subr.bf16.mxu0 %v10388_v21  ;;  %v5160_v47 = vld [vmem:[#allocation2 + $0x428] sm:$0xff] }
0x1be6   :  { %10260 = vrcp.f32 %v4630_v22  ;;  %v10021_v3 = vpack.c.bf16 %v5161_v46, %v5160_v47 }
0x1be7   :  { %9342 = vmatmul.mubr.msk.f32.gmra.mrb[178].mxu0 %vm803_vm8, %v4637_v11 }
0x1be8   :  { %v10257_v38 = vpop.eup %10256  ;;  %9344 = vmatprep.mubr.msk.f32.mxu0 %vm10387_vm0, %v10386_v0 }
0x1be9   :  { %v4638_v26 = vmul.f32 %v10257_v38, %v10247_v14 }
0x1beb   :  { %9345 = vmatmul.mubr.msk.f32.gmra.mrb[180].mxu0 %vm803_vm8, %v4638_v26 }
0x1bec   :  { %v10259_v40 = vpop.eup %10258  ;;  %9347 = vmatprep.mubr.msk.f32.mxu0 %vm10387_vm0, %v10386_v0 }
0x1bed   :  { %v4639_v42 = vmul.f32 %v10259_v40, %v10249_v4 }
0x1bef   :  { %9348 = vmatmul.mubr.msk.f32.gmra.mrb[182].mxu0 %vm803_vm8, %v4639_v42 }
0x1bf0   :  { %v10261_v36 = vpop.eup %10260  ;;  %9350 = vmatprep.mubr.msk.f32.mxu0 %vm10387_vm0, %v10386_v0 }
0x1bf1   :  { %v4640_v23 = vmul.f32 %v10261_v36, %v10251_v19 }
0x1bf3   :  { %9351 = vmatmul.mubr.msk.f32.gmra.mrb[184].mxu0 %vm803_vm8, %v4640_v23 }
0x1bf4   :  { %9372 = vmatprep.mubr.msk.f32.mxu0 %vm10387_vm0, %v10386_v0 }
0x1bf7   :  { %9373 = vmatmul.mubr.msk.f32.vlgmr.msra.gmra.mrb[186].mxu0 %vm38_vm1, %v11486_v52  ;;  %v4749_v52 = vld [vmem:[#allocation2 + $0x3c0] sm:$0xff] }
0x1bf8   :  { %9375 = vmatprep.mubr.msk.f32.mxu0 %vm10387_vm0, %v10386_v0  ;;  %10013 = vmatpush3.bf16.msra.mxu0 %v10012_v28 }
0x1bf9   :  { %10014 = vmatprep.subr.bf16.mxu0 %v10388_v21  ;;  %9354 = vmatpush3.msra.mxu1 %v4749_v52 }
0x1bfa   :  { %10005 = vmatprep.subr.bf16.mxu1 %v10388_v21 }
0x1bfb   :  { %9376 = vmatmul.mubr.msk.f32.gmra.mrb[188].mxu0 %vm38_vm1, %v11488_v53  ;;  %v4960_v53 = vld [vmem:[#allocation2 + $0x3c8] sm:$0xff] }
0x1bfc   :  { %9378 = vmatprep.mubr.msk.f32.mxu0 %vm10387_vm0, %v10386_v0  ;;  %10016 = vmatpush3.bf16.msra.mxu0 %v10015_v56 }
0x1bfd   :  { %10023 = vmatprep.subr.bf16.mxu0 %v10388_v21 }
0x1bff   :  { %9379 = vmatmul.mubr.msk.f32.gmra.mrb[190].mxu0 %vm38_vm1, %v11490_v43  ;;  %v4961_v43 = vld [vmem:[#allocation2 + $0x3d0] sm:$0xff] }
0x1c00   :  { %9381 = vmatprep.mubr.msk.f32.mxu0 %vm10387_vm0, %v10386_v0 }
0x1c03   :  { %9382 = vmatmul.mubr.msk.f32.gmra.mrb[192].mxu0 %vm38_vm1, %v11492_v54  ;;  %v10006_v54 = vpack.c.bf16 %v4961_v43, %v4960_v53 }
0x1c04   :  { %9384 = vmatprep.mubr.msk.f32.mxu0 %vm10387_vm0, %v10386_v0 }
0x1c07   :  { %9385 = vmatmul.mubr.msk.f32.gmra.mrb[194].mxu0 %vm38_vm1, %v11494_v45  ;;  %v4962_v45 = vld [vmem:[#allocation2 + $0x3d8] sm:$0xff] }
0x1c08   :  { %9418 = vmatprep.mubr.msk.f32.mxu0 %vm10387_vm0, %v10386_v0  ;;  %v10009_v60 = vpack.c.bf16 %v4963_v34, %v4962_v45 }
0x1c0b   :  { %9419 = vmatmul.mubr.msk.f32.vlgmr.msra.gmra.mrb[196].mxu0 %vm383_vm5, %v11259_v63 }
0x1c0c   :  { %9421 = vmatprep.mubr.msk.f32.mxu0 %vm10387_vm0, %v10386_v0 }
0x1c0f   :  { %9422 = vmatmul.mubr.msk.f32.gmra.mrb[198].mxu0 %vm383_vm5, %v11270_v25 }
0x1c10   :  { %9424 = vmatprep.mubr.msk.f32.mxu0 %vm10387_vm0, %v10386_v0 }
0x1c13   :  { %9425 = vmatmul.mubr.msk.f32.gmra.mrb[200].mxu0 %vm383_vm5, %v11282_v16 }
0x1c14   :  { %9427 = vmatprep.mubr.msk.f32.mxu0 %vm10387_vm0, %v10386_v0 }
0x1c17   :  { %9428 = vmatmul.mubr.msk.f32.gmra.mrb[202].mxu0 %vm383_vm5, %v11294_v12 }
0x1c18   :  { %9430 = vmatprep.mubr.msk.f32.mxu0 %vm10387_vm0, %v10386_v0 }
0x1c1b   :  { %9431 = vmatmul.mubr.msk.f32.gmra.mrb[204].mxu0 %vm383_vm5, %v11305_v17 }
0x1c1c   :  { %9466 = vmatprep.mubr.msk.f32.mxu0 %vm10387_vm0, %v10386_v0 }
0x1cb6   :  { %v4725_v59 = vpop.f32.mrb[176].mxu0 }
0x1cb7   :  { %v9340_v31 = vpop.f32.mrb[177].mxu0  ;;  %9356 = vmatmul.mubr.msk.f32.vlgmr.msra.gmra.mrb[184].mxu1 %vm38_vm1, %v4725_v59 }
0x1cb8   :  { %9358 = vmatprep.mubr.msk.f32.mxu1 %vm10387_vm0, %v10386_v0  ;;  %10007 = vmatpush3.bf16.msra.mxu1 %v10006_v54 }
0x1cb9   :  { %10008 = vmatprep.subr.bf16.mxu1 %v10388_v21 }
0x1cba   :  { %v4730_v50 = vpop.f32.mrb[178].mxu0 }
0x1cbb   :  { %v9343_v5 = vpop.f32.mrb[179].mxu0  ;;  %9359 = vmatmul.mubr.msk.f32.gmra.mrb[186].mxu1 %vm38_vm1, %v4730_v50 }
0x1cbc   :  { %9361 = vmatprep.mubr.msk.f32.mxu1 %vm10387_vm0, %v10386_v0  ;;  %10010 = vmatpush3.bf16.msra.mxu1 %v10009_v60 }
0x1cbd   :  { %10017 = vmatprep.subr.bf16.mxu1 %v10388_v21 }
0x1cbe   :  { %v4735_v7 = vpop.f32.mrb[180].mxu0 }
0x1cbf   :  { %v9346_v24 = vpop.f32.mrb[181].mxu0  ;;  %9362 = vmatmul.mubr.msk.f32.gmra.mrb[188].mxu1 %vm38_vm1, %v4735_v7 }
0x1cc0   :  { %9364 = vmatprep.mubr.msk.f32.mxu1 %vm10387_vm0, %v10386_v0 }
0x1cc2   :  { %v4740_v10 = vpop.f32.mrb[182].mxu0 }
0x1cc3   :  { %v9349_v29 = vpop.f32.mrb[183].mxu0  ;;  %9365 = vmatmul.mubr.msk.f32.gmra.mrb[190].mxu1 %vm38_vm1, %v4740_v10 }
0x1cc4   :  { %9367 = vmatprep.mubr.msk.f32.mxu1 %vm10387_vm0, %v10386_v0 }
0x1cc6   :  { %v4745_v18 = vpop.f32.mrb[184].mxu0 }
0x1cc7   :  { %v9352_v1 = vpop.f32.mrb[185].mxu0  ;;  %9368 = vmatmul.mubr.msk.f32.gmra.mrb[192].mxu1 %vm38_vm1, %v4745_v18 }
0x1cc8   :  { %9395 = vmatprep.mubr.msk.f32.mxu1 %vm10387_vm0, %v10386_v0 }
0x1cca   :  { %v4936_v9 = vpop.f32.mrb[186].mxu0 }
0x1ccb   :  { %v9374_v14 = vpop.f32.mrb[187].mxu0  ;;  %9396 = vmatmul.mubr.msk.f32.vlgmr.msra.gmra.mrb[194].mxu1 %vm383_vm5, %v11259_v63 }
0x1ccc   :  { %9398 = vmatprep.mubr.msk.f32.mxu1 %vm10387_vm0, %v10386_v0  ;;  %10019 = vmatpush3.bf16.msra.mxu1 %v10018_v58 }
0x1ccd   :  { %10020 = vmatprep.subr.bf16.mxu1 %v10388_v21 }
0x1cce   :  { %v4941_v4 = vpop.f32.mrb[188].mxu0 }
0x1ccf   :  { %v9377_v2 = vpop.f32.mrb[189].mxu0  ;;  %9399 = vmatmul.mubr.msk.f32.gmra.mrb[196].mxu1 %vm383_vm5, %v11270_v25 }
0x1cd0   :  { %9401 = vmatprep.mubr.msk.f32.mxu1 %vm10387_vm0, %v10386_v0  ;;  %10022 = vmatpush3.bf16.msra.mxu1 %v10021_v3 }
0x1cd1   :  { %10031 = vmatprep.subr.bf16.mxu1 %v10388_v21 }
0x1cd2   :  { %v4946_v19 = vpop.f32.mrb[190].mxu0 }
0x1cd3   :  { %v9380_v13 = vpop.f32.mrb[191].mxu0  ;;  %9402 = vmatmul.mubr.msk.f32.gmra.mrb[198].mxu1 %vm383_vm5, %v11282_v16 }
0x1cd4   :  { %9404 = vmatprep.mubr.msk.f32.mxu1 %vm10387_vm0, %v10386_v0 }
0x1cd6   :  { %v4951_v51 = vpop.f32.mrb[192].mxu0 }
0x1cd7   :  { %v9383_v62 = vpop.f32.mrb[193].mxu0  ;;  %9405 = vmatmul.mubr.msk.f32.gmra.mrb[200].mxu1 %vm383_vm5, %v11294_v12 }
0x1cd8   :  { %9407 = vmatprep.mubr.msk.f32.mxu1 %vm10387_vm0, %v10386_v0 }
0x1cda   :  { %v4956_v27 = vpop.f32.mrb[194].mxu0 }
0x1cdb   :  { %v9386_v30 = vpop.f32.mrb[195].mxu0  ;;  %9408 = vmatmul.mubr.msk.f32.gmra.mrb[202].mxu1 %vm383_vm5, %v11305_v17 }
0x1cdc   :  { %9441 = vmatprep.mubr.msk.f32.mxu1 %vm10387_vm0, %v10386_v0 }
0x1cde   :  { %v5134_v32 = vpop.f32.mrb[196].mxu0 }
0x1cdf   :  { %v9420_v20 = vpop.f32.mrb[197].mxu0  ;;  %9442 = vmatmul.mubr.msk.f32.vlgmr.msra.gmra.mrb[204].mxu1 %vm383_vm5, %v11259_v63  ;;  %v5135_v22 = vadd.f32 %v7865_v6, %v5134_v32  ;;  %v7871_v32 = vld [vmem:[#allocation2 + $0x438] ss:$0 sm:$0xff] }
0x1ce0   :  { %9444 = vmatprep.mubr.msk.f32.mxu1 %vm10387_vm0, %v10386_v0 }
0x1ce2   :  { %v5139_v35 = vpop.f32.mrb[198].mxu0 }
0x1ce3   :  { %v5140_v11 = vadd.f32 %v7865_v6, %v5139_v35  ;;  %v9423_v38 = vpop.f32.mrb[199].mxu0  ;;  %9445 = vmatmul.mubr.msk.f32.gmra.mrb[206].mxu1 %vm383_vm5, %v11270_v25 }
0x1ce4   :  { %9447 = vmatprep.mubr.msk.f32.mxu1 %vm10387_vm0, %v10386_v0 }
0x1ce5   :  { %v10024_v26 = vpack.c.bf16 %v5140_v11, %v5135_v22 }
0x1ce6   :  { %v5144_v40 = vpop.f32.mrb[200].mxu0 }
0x1ce7   :  { %v9426_v42 = vpop.f32.mrb[201].mxu0  ;;  %9448 = vmatmul.mubr.msk.f32.gmra.mrb[208].mxu1 %vm383_vm5, %v11282_v16  ;;  %10026 = vmatpush3.bf16.xpose.msk.msra.mxu0 %vm10550_vm6, %v10024_v26  ;;  %v5145_v23 = vadd.f32 %v7865_v6, %v5144_v40 }
0x1ce8   :  { %9450 = vmatprep.mubr.msk.f32.mxu1 %vm10387_vm0, %v10386_v0  ;;  %10027 = vmatprep.subr.bf16.mxu0 %v10388_v21 }
0x1cea   :  { %v5149_v36 = vpop.f32.mrb[202].mxu0 }
0x1ceb   :  { %v5150_v48 = vadd.f32 %v7865_v6, %v5149_v36  ;;  %v9429_v49 = vpop.f32.mrb[203].mxu0  ;;  %9451 = vmatmul.mubr.msk.f32.gmra.mrb[210].mxu1 %vm383_vm5, %v11294_v12 }
0x1cec   :  { %9453 = vmatprep.mubr.msk.f32.mxu1 %vm10387_vm0, %v10386_v0 }
0x1ced   :  { %v10028_v28 = vpack.c.bf16 %v5150_v48, %v5145_v23 }
0x1cee   :  { %v5154_v39 = vpop.f32.mrb[204].mxu0 }
0x1cef   :  { %v9432_v33 = vpop.f32.mrb[205].mxu0  ;;  %9454 = vmatmul.mubr.msk.f32.gmra.mrb[212].mxu1 %vm383_vm5, %v11305_v17  ;;  %10030 = vmatpush3.bf16.xpose.msk.msra.mxu0 %vm10550_vm6, %v10028_v28  ;;  %v5155_v56 = vadd.f32 %v7865_v6, %v5154_v39 }
0x1cf0   :  { %9464 = vmatprep.subr.mxu0 %v10386_v0  ;;  %9491 = vmatprep.mubr.msk.f32.mxu1 %vm10387_vm0, %v10386_v0 }
0x1cf7   :  { %9465 = vmatpush3.xpose.msk.msra.mxu0 %vm38_vm1, %v5155_v56 }
0x1cf8   :  { %9506 = vmatprep.subr.mxu0 %v10386_v0 }
0x1d8a   :  { %v4831_v52 = vpop.f32.mrb[184].mxu1 }
0x1d8b   :  { %v11665_v53 = vadd.f32 %v4936_v9, %v4831_v52  ;;  %v9357_v43 = vpop.f32.mrb[185].mxu1 }
0x1d8e   :  { %v4836_v54 = vpop.f32.mrb[186].mxu1 }
0x1d8f   :  { %v11667_v45 = vadd.f32 %v4941_v4, %v4836_v54  ;;  %v9360_v34 = vpop.f32.mrb[187].mxu1 }
0x1d92   :  { %v4841_v59 = vpop.f32.mrb[188].mxu1 }
0x1d93   :  { %v11669_v31 = vadd.f32 %v4946_v19, %v4841_v59  ;;  %v9363_v60 = vpop.f32.mrb[189].mxu1 }
0x1d96   :  { %v4846_v50 = vpop.f32.mrb[190].mxu1 }
0x1d97   :  { %v11671_v5 = vadd.f32 %v4951_v51, %v4846_v50  ;;  %v9366_v7 = vpop.f32.mrb[191].mxu1 }
0x1d9a   :  { %v4851_v24 = vpop.f32.mrb[192].mxu1 }
0x1d9b   :  { %v11673_v10 = vadd.f32 %v4956_v27, %v4851_v24  ;;  %v9369_v29 = vpop.f32.mrb[193].mxu1 }
0x1d9e   :  { %v5035_v37 = vpop.f32.mrb[194].mxu1 }
0x1d9f   :  { %v5036_v18 = vadd.f32 %v7859_v61, %v5035_v37  ;;  %v9397_v1 = vpop.f32.mrb[195].mxu1 }
0x1da1   :  { %9467 = vmatmul.mubr.msk.f32.vlgmr.msra.gmra.mrb[206].mxu0 %vm38_vm1, %v5036_v18 }
0x1da2   :  { %v5040_v58 = vpop.f32.mrb[196].mxu1  ;;  %9469 = vmatprep.mubr.msk.f32.mxu0 %vm10387_vm0, %v10386_v0 }
0x1da3   :  { %v5041_v47 = vadd.f32 %v7859_v61, %v5040_v58  ;;  %v9400_v46 = vpop.f32.mrb[197].mxu1 }
0x1da5   :  { %9470 = vmatmul.mubr.msk.f32.gmra.mrb[208].mxu0 %vm38_vm1, %v5041_v47 }
0x1da6   :  { %v5045_v9 = vpop.f32.mrb[198].mxu1  ;;  %9472 = vmatprep.mubr.msk.f32.mxu0 %vm10387_vm0, %v10386_v0 }
0x1da7   :  { %v5046_v14 = vadd.f32 %v7859_v61, %v5045_v9  ;;  %v9403_v3 = vpop.f32.mrb[199].mxu1 }
0x1da9   :  { %9473 = vmatmul.mubr.msk.f32.gmra.mrb[210].mxu0 %vm38_vm1, %v5046_v14 }
0x1daa   :  { %v5050_v4 = vpop.f32.mrb[200].mxu1  ;;  %9475 = vmatprep.mubr.msk.f32.mxu0 %vm10387_vm0, %v10386_v0 }
0x1dab   :  { %v5051_v2 = vadd.f32 %v7859_v61, %v5050_v4  ;;  %v9406_v19 = vpop.f32.mrb[201].mxu1 }
0x1dad   :  { %9476 = vmatmul.mubr.msk.f32.gmra.mrb[212].mxu0 %vm38_vm1, %v5051_v2 }
0x1dae   :  { %v5055_v13 = vpop.f32.mrb[202].mxu1  ;;  %9478 = vmatprep.mubr.msk.f32.mxu0 %vm10387_vm0, %v10386_v0 }
0x1daf   :  { %v5056_v51 = vadd.f32 %v7859_v61, %v5055_v13  ;;  %v9409_v62 = vpop.f32.mrb[203].mxu1 }
0x1db1   :  { %9479 = vmatmul.mubr.msk.f32.gmra.mrb[214].mxu0 %vm38_vm1, %v5056_v51 }
0x1db2   :  { %v5233_v27 = vpop.f32.mrb[204].mxu1  ;;  %9508 = vmatprep.mubr.msk.f32.mxu0 %vm10387_vm0, %v10386_v0 }
0x1db3   :  { %v9443_v30 = vpop.f32.mrb[205].mxu1  ;;  %v5234_v6 = vadd.f32 %v7871_v32, %v5233_v27 }
0x1db6   :  { %v5238_v20 = vpop.f32.mrb[206].mxu1 }
0x1db7   :  { %v5239_v35 = vadd.f32 %v7871_v32, %v5238_v20  ;;  %v9446_v22 = vpop.f32.mrb[207].mxu1 }
0x1db9   :  { %v10032_v11 = vpack.c.bf16 %v5239_v35, %v5234_v6 }
0x1dba   :  { %v5243_v38 = vpop.f32.mrb[208].mxu1 }
0x1dbb   :  { %v9449_v26 = vpop.f32.mrb[209].mxu1  ;;  %10033 = vmatpush3.bf16.msra.mxu1 %v10032_v11  ;;  %v5244_v42 = vadd.f32 %v7871_v32, %v5243_v38 }
0x1dbc   :  { %10034 = vmatprep.subr.bf16.mxu1 %v10388_v21 }
0x1dbe   :  { %v5248_v40 = vpop.f32.mrb[210].mxu1 }
0x1dbf   :  { %v5249_v36 = vadd.f32 %v7871_v32, %v5248_v40  ;;  %v9452_v23 = vpop.f32.mrb[211].mxu1 }
0x1dc1   :  { %v10035_v48 = vpack.c.bf16 %v5249_v36, %v5244_v42 }
0x1dc2   :  { %v5253_v49 = vpop.f32.mrb[212].mxu1 }
0x1dc3   :  { %v9455_v28 = vpop.f32.mrb[213].mxu1  ;;  %10036 = vmatpush3.bf16.msra.mxu1 %v10035_v48  ;;  %v5254_v39 = vadd.f32 %v7871_v32, %v5253_v49  ;;  %v5651_v49 = vld [vmem:[#allocation2 + $0x448] sm:$0xff] }
0x1dc4   :  { %9489 = vmatprep.subr.mxu1 %v10386_v0  ;;  %v5652_v28 = vld [vmem:[#allocation2 + $0x450] sm:$0xff] }
0x1dc7   :  { %9490 = vmatpush3.msk.msra.mxu1 %vm875_vm7, %v5254_v39 }
0x1dc8   :  { %10037 = vmatprep.subr.bf16.mxu1 %v10388_v21 }
0x1e74   :  { %v5353_v33 = vpop.f32.mrb[206].mxu0 }
0x1e75   :  { %v5354_v56 = vadd.f32 %v11406_v41, %v5353_v33  ;;  %v9468_v52 = vpop.f32.mrb[207].mxu0  ;;  %v10038_v33 = vpack.c.bf16 %v5652_v28, %v5651_v49 }
0x1e77   :  { %v5377_v43 = vsel %vm803_vm8, %v5354_v56, -inf }
0x1e78   :  { %5378 = vmax.xlane.f32.xlu1 %v5377_v43  ;;  %v5358_v54 = vpop.f32.mrb[208].mxu0  ;;  %v5653_v43 = vld [vmem:[#allocation2 + $0x458] sm:$0xff] }
0x1e79   :  { %v5359_v34 = vadd.f32 %v11413_v55, %v5358_v54  ;;  %v9471_v59 = vpop.f32.mrb[209].mxu0  ;;  %v5654_v54 = vld [vmem:[#allocation2 + $0x460] sm:$0xff] }
0x1e7a   :  { %v10041_v59 = vpack.c.bf16 %v5654_v54, %v5653_v43 }
0x1e7b   :  { %v5380_v60 = vsel %vm803_vm8, %v5359_v34, -inf }
0x1e7c   :  { %5381 = vmax.xlane.f32.xlu0 %v5380_v60  ;;  %v5363_v50 = vpop.f32.mrb[210].mxu0 }
0x1e7d   :  { %v5364_v7 = vadd.f32 %v11417_v57, %v5363_v50  ;;  %v9474_v24 = vpop.f32.mrb[211].mxu0 }
0x1e7f   :  { %v5383_v29 = vsel %vm803_vm8, %v5364_v7, -inf }
0x1e80   :  { %5384 = vmax.xlane.f32.xlu1 %v5383_v29  ;;  %v5368_v61 = vpop.f32.mrb[212].mxu0 }
0x1e81   :  { %v5369_v41 = vadd.f32 %v11421_v44, %v5368_v61  ;;  %v9477_v37 = vpop.f32.mrb[213].mxu0 }
0x1e83   :  { %v5386_v18 = vsel %vm803_vm8, %v5369_v41, -inf }
0x1e84   :  { %5387 = vmax.xlane.f32.xlu0 %v5386_v18  ;;  %v5373_v1 = vpop.f32.mrb[214].mxu0  ;;  %v5849_v18 = vld [vmem:[#allocation2 + $0x498] sm:$0xff] }
0x1e85   :  { %v5374_v55 = vadd.f32 %v11425_v8, %v5373_v1  ;;  %v9480_v58 = vpop.f32.mrb[215].mxu0  ;;  %v5850_v1 = vld [vmem:[#allocation2 + $0x4a0] sm:$0xff] }
0x1e86   :  { %v5851_v58 = vld [vmem:[#allocation2 + $0x4a8] sm:$0xff] }
0x1e87   :  { %v5389_v47 = vsel %vm816_vm9, %v5374_v55, -inf }
0x1e88   :  { %5390 = vmax.xlane.f32.xlu1 %v5389_v47  ;;  %v5852_v47 = vld [vmem:[#allocation2 + $0x4b0] sm:$0xff] }
0x1f05   :  { %v5379_v46 = vpop.xlane.xlu1 %5378 }
0x1f06   :  { %v5392_v57 = vsub.f32 %v5354_v56, %v5379_v46  ;;  %v10053_v46 = vpack.c.bf16 %v5852_v47, %v5851_v58 }
0x1f08   :  { %v5397_v9 = vmul.f32 1.442695, %v5392_v57  ;;  %v5540_v57 = vld [vmem:[#allocation2 + $0x440] sm:$0xff] }
0x1f09   :  { %v5382_v14 = vpop.xlane.xlu0 %5381  ;;  %9507 = vmatpush3.msra.mxu0 %v5540_v57 }
0x1f0a   :  { %10262 = vpow2.f32 %v5397_v9  ;;  %v5393_v3 = vsub.f32 %v5359_v34, %v5382_v14  ;;  %10043 = vmatprep.subr.bf16.mxu0 %v10388_v21  ;;  %v5750_v9 = vld [vmem:[#allocation2 + $0x470] sm:$0xff]  ;;  %v5751_v14 = vld [vmem:[#allocation2 + $0x478] sm:$0xff] }
0x1f0c   :  { %v5399_v4 = vmul.f32 1.442695, %v5393_v3  ;;  %v10044_v3 = vpack.c.bf16 %v5751_v14, %v5750_v9 }
0x1f0d   :  { %v5385_v2 = vpop.xlane.xlu1 %5384 }
0x1f0e   :  { %10264 = vpow2.f32 %v5399_v4  ;;  %v5394_v44 = vsub.f32 %v5364_v7, %v5385_v2  ;;  %v5752_v4 = vld [vmem:[#allocation2 + $0x480] sm:$0xff]  ;;  %v5753_v2 = vld [vmem:[#allocation2 + $0x488] sm:$0xff] }
0x1f10   :  { %v5401_v19 = vmul.f32 1.442695, %v5394_v44 }
0x1f11   :  { %v5388_v13 = vpop.xlane.xlu0 %5387 }
0x1f12   :  { %10266 = vpow2.f32 %v5401_v19  ;;  %v5395_v51 = vsub.f32 %v5369_v41, %v5388_v13  ;;  %v10047_v13 = vpack.c.bf16 %v5753_v2, %v5752_v4 }
0x1f14   :  { %v10263_v62 = vpop.eup %10262  ;;  %v5403_v8 = vmul.f32 1.442695, %v5395_v51 }
0x1f15   :  { %v5391_v27 = vpop.xlane.xlu1 %5390  ;;  %v5407_v30 = vsel %vm803_vm8, %v10263_v62, 0.0 }
0x1f16   :  { %10268 = vpow2.f32 %v5403_v8  ;;  %v5396_v32 = vsub.f32 %v5374_v55, %v5391_v27  ;;  %5408 = vadd.xlane.f32.xlu0 %v5407_v30  ;;  %v10050_v55 = vpack.c.bf16 %v5850_v1, %v5849_v18 }
0x1f18   :  { %v10265_v20 = vpop.eup %10264  ;;  %v5405_v6 = vmul.f32 1.442695, %v5396_v32 }
0x1f19   :  { %v5410_v35 = vsel %vm803_vm8, %v10265_v20, 0.0 }
0x1f1a   :  { %10270 = vpow2.f32 %v5405_v6  ;;  %5411 = vadd.xlane.f32.xlu1 %v5410_v35 }
0x1f1c   :  { %v10267_v22 = vpop.eup %10266 }
0x1f1d   :  { %v5413_v11 = vsel %vm803_vm8, %v10267_v22, 0.0 }
0x1f1e   :  { %5414 = vadd.xlane.f32.xlu0 %v5413_v11 }
0x1f20   :  { %v10269_v38 = vpop.eup %10268 }
0x1f21   :  { %v5416_v26 = vsel %vm803_vm8, %v10269_v38, 0.0 }
0x1f22   :  { %5417 = vadd.xlane.f32.xlu1 %v5416_v26 }
0x1f24   :  { %v10271_v40 = vpop.eup %10270 }
0x1f25   :  { %v5419_v42 = vsel %vm816_vm9, %v10271_v40, 0.0 }
0x1f26   :  { %5420 = vadd.xlane.f32.xlu0 %v5419_v42 }
0x1fa3   :  { %v5409_v36 = vpop.xlane.xlu0 %5408 }
0x1fa4   :  { %10272 = vrcp.f32 %v5409_v36 }
0x1fa7   :  { %v5412_v23 = vpop.xlane.xlu1 %5411 }
0x1fa8   :  { %10274 = vrcp.f32 %v5412_v23 }
0x1fab   :  { %v5415_v48 = vpop.xlane.xlu0 %5414 }
0x1fac   :  { %10276 = vrcp.f32 %v5415_v48 }
0x1fae   :  { %v10273_v39 = vpop.eup %10272 }
0x1faf   :  { %v5427_v56 = vmul.f32 %v10273_v39, %v10263_v62  ;;  %v5418_v52 = vpop.xlane.xlu1 %5417  ;;  %v7910_v39 = vld [vmem:[#allocation2 + $0x4b8] ss:$0 sm:$0xff] }
0x1fb0   :  { %10278 = vrcp.f32 %v5418_v52 }
0x1fb1   :  { %9492 = vmatmul.mubr.msk.f32.vlgmr.msra.gmra.mrb[214].mxu1 %vm803_vm8, %v5427_v56 }
0x1fb2   :  { %v10275_v34 = vpop.eup %10274  ;;  %9494 = vmatprep.mubr.msk.f32.mxu1 %vm10387_vm0, %v10386_v0  ;;  %10039 = vmatpush3.bf16.msra.mxu1 %v10038_v33 }
0x1fb3   :  { %v5421_v60 = vpop.xlane.xlu0 %5420  ;;  %v5428_v50 = vmul.f32 %v10275_v34, %v10265_v20  ;;  %10040 = vmatprep.subr.bf16.mxu1 %v10388_v21 }
0x1fb4   :  { %10280 = vrcp.f32 %v5421_v60 }
0x1fb5   :  { %9495 = vmatmul.mubr.msk.f32.gmra.mrb[216].mxu1 %vm803_vm8, %v5428_v50 }
0x1fb6   :  { %v10277_v7 = vpop.eup %10276  ;;  %9497 = vmatprep.mubr.msk.f32.mxu1 %vm10387_vm0, %v10386_v0  ;;  %10042 = vmatpush3.bf16.msra.mxu1 %v10041_v59 }
0x1fb7   :  { %v5429_v24 = vmul.f32 %v10277_v7, %v10267_v22  ;;  %10049 = vmatprep.subr.bf16.mxu1 %v10388_v21 }
0x1fb9   :  { %9498 = vmatmul.mubr.msk.f32.gmra.mrb[218].mxu1 %vm803_vm8, %v5429_v24 }
0x1fba   :  { %v10279_v29 = vpop.eup %10278  ;;  %9500 = vmatprep.mubr.msk.f32.mxu1 %vm10387_vm0, %v10386_v0 }
0x1fbb   :  { %v5430_v61 = vmul.f32 %v10279_v29, %v10269_v38 }
0x1fbd   :  { %9501 = vmatmul.mubr.msk.f32.gmra.mrb[220].mxu1 %vm803_vm8, %v5430_v61 }
0x1fbe   :  { %v10281_v41 = vpop.eup %10280  ;;  %9503 = vmatprep.mubr.msk.f32.mxu1 %vm10387_vm0, %v10386_v0 }
0x1fbf   :  { %v5431_v37 = vmul.f32 %v10281_v41, %v10271_v40 }
0x1fc1   :  { %9504 = vmatmul.mubr.msk.f32.gmra.mrb[222].mxu1 %vm803_vm8, %v5431_v37 }
0x1fc2   :  { %9531 = vmatprep.mubr.msk.f32.mxu1 %vm10387_vm0, %v10386_v0 }
0x1fc5   :  { %9532 = vmatmul.mubr.msk.f32.vlgmr.msra.gmra.mrb[224].mxu1 %vm383_vm5, %v11259_v63 }
0x1fc6   :  { %9534 = vmatprep.mubr.msk.f32.mxu1 %vm10387_vm0, %v10386_v0  ;;  %10051 = vmatpush3.bf16.msra.mxu1 %v10050_v55 }
0x1fc7   :  { %10052 = vmatprep.subr.bf16.mxu1 %v10388_v21 }
0x1fc9   :  { %9535 = vmatmul.mubr.msk.f32.gmra.mrb[226].mxu1 %vm383_vm5, %v11270_v25 }
0x1fca   :  { %9537 = vmatprep.mubr.msk.f32.mxu1 %vm10387_vm0, %v10386_v0  ;;  %10054 = vmatpush3.bf16.msra.mxu1 %v10053_v46 }
0x1fcb   :  { %10063 = vmatprep.subr.bf16.mxu1 %v10388_v21 }
0x1fcd   :  { %9538 = vmatmul.mubr.msk.f32.gmra.mrb[228].mxu1 %vm383_vm5, %v11282_v16 }
0x1fce   :  { %9540 = vmatprep.mubr.msk.f32.mxu1 %vm10387_vm0, %v10386_v0 }
0x1fd1   :  { %9541 = vmatmul.mubr.msk.f32.gmra.mrb[230].mxu1 %vm383_vm5, %v11294_v12 }
0x1fd2   :  { %9543 = vmatprep.mubr.msk.f32.mxu1 %vm10387_vm0, %v10386_v0 }
0x1fd5   :  { %9544 = vmatmul.mubr.msk.f32.gmra.mrb[232].mxu1 %vm383_vm5, %v11305_v17 }
0x1fd6   :  { %9577 = vmatprep.mubr.msk.f32.mxu1 %vm10387_vm0, %v10386_v0 }
0x1fd9   :  { %9578 = vmatmul.mubr.msk.f32.vlgmr.msra.gmra.mrb[234].mxu1 %vm383_vm5, %v11259_v63 }
0x1fda   :  { %9580 = vmatprep.mubr.msk.f32.mxu1 %vm10387_vm0, %v10386_v0 }
0x1fdd   :  { %9581 = vmatmul.mubr.msk.f32.gmra.mrb[236].mxu1 %vm383_vm5, %v11270_v25 }
0x1fde   :  { %9583 = vmatprep.mubr.msk.f32.mxu1 %vm10387_vm0, %v10386_v0 }
0x1fe1   :  { %9584 = vmatmul.mubr.msk.f32.gmra.mrb[238].mxu1 %vm383_vm5, %v11282_v16 }
0x1fe2   :  { %9586 = vmatprep.mubr.msk.f32.mxu1 %vm10387_vm0, %v10386_v0 }
0x1fe5   :  { %9587 = vmatmul.mubr.msk.f32.gmra.mrb[240].mxu1 %vm383_vm5, %v11294_v12 }
0x1fe6   :  { %9589 = vmatprep.mubr.msk.f32.mxu1 %vm10387_vm0, %v10386_v0 }
0x1fe9   :  { %9590 = vmatmul.mubr.msk.f32.gmra.mrb[242].mxu1 %vm383_vm5, %v11305_v17 }
0x1fea   :  { %9627 = vmatprep.mubr.msk.f32.mxu1 %vm10387_vm0, %v10386_v0 }
0x2084   :  { %v5516_v44 = vpop.f32.mrb[214].mxu1 }
0x2085   :  { %v9493_v19 = vpop.f32.mrb[215].mxu1  ;;  %9509 = vmatmul.mubr.msk.f32.vlgmr.msra.gmra.mrb[216].mxu0 %vm38_vm1, %v5516_v44 }
0x2086   :  { %9511 = vmatprep.mubr.msk.f32.mxu0 %vm10387_vm0, %v10386_v0  ;;  %10045 = vmatpush3.bf16.msra.mxu0 %v10044_v3 }
0x2087   :  { %10046 = vmatprep.subr.bf16.mxu0 %v10388_v21 }
0x2088   :  { %v5521_v51 = vpop.f32.mrb[216].mxu1 }
0x2089   :  { %v9496_v62 = vpop.f32.mrb[217].mxu1  ;;  %9512 = vmatmul.mubr.msk.f32.gmra.mrb[218].mxu0 %vm38_vm1, %v5521_v51 }
0x208a   :  { %9514 = vmatprep.mubr.msk.f32.mxu0 %vm10387_vm0, %v10386_v0  ;;  %10048 = vmatpush3.bf16.msra.mxu0 %v10047_v13 }
0x208b   :  { %10055 = vmatprep.subr.bf16.mxu0 %v10388_v21 }
0x208c   :  { %v5526_v8 = vpop.f32.mrb[218].mxu1 }
0x208d   :  { %v9499_v27 = vpop.f32.mrb[219].mxu1  ;;  %9515 = vmatmul.mubr.msk.f32.gmra.mrb[220].mxu0 %vm38_vm1, %v5526_v8 }
0x208e   :  { %9517 = vmatprep.mubr.msk.f32.mxu0 %vm10387_vm0, %v10386_v0 }
0x2090   :  { %v5531_v30 = vpop.f32.mrb[220].mxu1 }
0x2091   :  { %v9502_v32 = vpop.f32.mrb[221].mxu1  ;;  %9518 = vmatmul.mubr.msk.f32.gmra.mrb[222].mxu0 %vm38_vm1, %v5531_v30 }
0x2092   :  { %9520 = vmatprep.mubr.msk.f32.mxu0 %vm10387_vm0, %v10386_v0 }
0x2094   :  { %v5536_v20 = vpop.f32.mrb[222].mxu1 }
0x2095   :  { %v9505_v6 = vpop.f32.mrb[223].mxu1  ;;  %9521 = vmatmul.mubr.msk.f32.gmra.mrb[224].mxu0 %vm38_vm1, %v5536_v20 }
0x2096   :  { %9554 = vmatprep.mubr.msk.f32.mxu0 %vm10387_vm0, %v10386_v0 }
0x2098   :  { %v11786_v35 = vpop.f32.mrb[224].mxu1 }
0x2099   :  { %v9533_v22 = vpop.f32.mrb[225].mxu1  ;;  %9555 = vmatmul.mubr.msk.f32.vlgmr.msra.gmra.mrb[226].mxu0 %vm383_vm5, %v11259_v63 }
0x209a   :  { %9557 = vmatprep.mubr.msk.f32.mxu0 %vm10387_vm0, %v10386_v0 }
0x209c   :  { %v11792_v11 = vpop.f32.mrb[226].mxu1 }
0x209d   :  { %v9536_v38 = vpop.f32.mrb[227].mxu1  ;;  %9558 = vmatmul.mubr.msk.f32.gmra.mrb[228].mxu0 %vm383_vm5, %v11270_v25 }
0x209e   :  { %9560 = vmatprep.mubr.msk.f32.mxu0 %vm10387_vm0, %v10386_v0 }
0x20a0   :  { %v11798_v26 = vpop.f32.mrb[228].mxu1 }
0x20a1   :  { %v9539_v40 = vpop.f32.mrb[229].mxu1  ;;  %9561 = vmatmul.mubr.msk.f32.gmra.mrb[230].mxu0 %vm383_vm5, %v11282_v16 }
0x20a2   :  { %9563 = vmatprep.mubr.msk.f32.mxu0 %vm10387_vm0, %v10386_v0 }
0x20a4   :  { %v11804_v42 = vpop.f32.mrb[230].mxu1 }
0x20a5   :  { %v9542_v36 = vpop.f32.mrb[231].mxu1  ;;  %9564 = vmatmul.mubr.msk.f32.gmra.mrb[232].mxu0 %vm383_vm5, %v11294_v12 }
0x20a6   :  { %9566 = vmatprep.mubr.msk.f32.mxu0 %vm10387_vm0, %v10386_v0 }
0x20a8   :  { %v11810_v23 = vpop.f32.mrb[232].mxu1 }
0x20a9   :  { %v9545_v48 = vpop.f32.mrb[233].mxu1  ;;  %9567 = vmatmul.mubr.msk.f32.gmra.mrb[234].mxu0 %vm383_vm5, %v11305_v17 }
0x20aa   :  { %9602 = vmatprep.mubr.msk.f32.mxu0 %vm10387_vm0, %v10386_v0  ;;  %v7898_v48 = vld [vmem:[#allocation2 + $0x468] ss:$0 sm:$0xff] }
0x20ab   :  { %v5737_v15 = vadd.f32 %v7898_v48, %v11798_v26 }
0x20ac   :  { %v5924_v49 = vpop.f32.mrb[234].mxu1 }
0x20ad   :  { %v9579_v28 = vpop.f32.mrb[235].mxu1  ;;  %v5925_v56 = vadd.f32 %v7910_v39, %v5924_v49 }
0x20ae   :  { %v5727_v28 = vadd.f32 %v7898_v48, %v11786_v35  ;;  %v5742_v35 = vadd.f32 %v7898_v48, %v11804_v42 }
0x20b0   :  { %v5929_v33 = vpop.f32.mrb[236].mxu1 }
0x20b1   :  { %v5930_v52 = vadd.f32 %v7910_v39, %v5929_v33  ;;  %v9582_v43 = vpop.f32.mrb[237].mxu1  ;;  %v10330_v33 = vld [vmem:[#allocation2 + $0x660] sm:$0xff] }
0x20b3   :  { %v10064_v54 = vpack.c.bf16 %v5930_v52, %v5925_v56 }
0x20b4   :  { %v5934_v34 = vpop.f32.mrb[238].mxu1 }
0x20b5   :  { %v9585_v59 = vpop.f32.mrb[239].mxu1  ;;  %10065 = vmatpush3.bf16.msra.mxu1 %v10064_v54  ;;  %v5935_v50 = vadd.f32 %v7910_v39, %v5934_v34  ;;  %v10331_v54 = vld [vmem:[#allocation2 + $0x668] sm:$0xff] }
0x20b6   :  { %10066 = vmatprep.subr.bf16.mxu1 %v10388_v21 }
0x20b8   :  { %v5939_v60 = vpop.f32.mrb[240].mxu1 }
0x20b9   :  { %v5940_v7 = vadd.f32 %v7910_v39, %v5939_v60  ;;  %v9588_v24 = vpop.f32.mrb[241].mxu1 }
0x20ba   :  { %v10332_v24 = vld [vmem:[#allocation2 + $0x678] sm:$0xff] }
0x20bb   :  { %v10067_v29 = vpack.c.bf16 %v5940_v7, %v5935_v50 }
0x20bc   :  { %v5944_v61 = vpop.f32.mrb[242].mxu1 }
0x20bd   :  { %v9591_v41 = vpop.f32.mrb[243].mxu1  ;;  %10068 = vmatpush3.bf16.msra.mxu1 %v10067_v29  ;;  %v5945_v37 = vadd.f32 %v7910_v39, %v5944_v61  ;;  %v5732_v39 = vadd.f32 %v7898_v48, %v11792_v11  ;;  %v5747_v11 = vadd.f32 %v7898_v48, %v11810_v23 }
0x20be   :  { %9625 = vmatprep.subr.mxu1 %v10386_v0 }
0x20c1   :  { %9626 = vmatpush3.msk.msra.mxu1 %vm875_vm7, %v5945_v37 }
0x20c2   :  { %10069 = vmatprep.subr.bf16.mxu1 %v10388_v21 }
0x2158   :  { %v5622_v18 = vpop.f32.mrb[216].mxu0 }
0x2159   :  { %v11821_v1 = vadd.f32 %v5622_v18, %v11665_v53  ;;  %v9510_v55 = vpop.f32.mrb[217].mxu0 }
0x215c   :  { %v5627_v58 = vpop.f32.mrb[218].mxu0 }
0x215d   :  { %v11824_v47 = vadd.f32 %v5627_v58, %v11667_v45  ;;  %v9513_v46 = vpop.f32.mrb[219].mxu0  ;;  %v7904_v45 = vld [vmem:[#allocation2 + $0x490] ss:$0 sm:$0xff] }
0x2160   :  { %v5632_v57 = vpop.f32.mrb[220].mxu0 }
0x2161   :  { %v11827_v9 = vadd.f32 %v5632_v57, %v11669_v31  ;;  %v9516_v14 = vpop.f32.mrb[221].mxu0 }
0x2164   :  { %v5637_v3 = vpop.f32.mrb[222].mxu0 }
0x2165   :  { %v11830_v4 = vadd.f32 %v5637_v3, %v11671_v5  ;;  %v9519_v2 = vpop.f32.mrb[223].mxu0 }
0x2168   :  { %v5642_v44 = vpop.f32.mrb[224].mxu0 }
0x2169   :  { %v11833_v53 = vadd.f32 %v5642_v44, %v11673_v10  ;;  %v9522_v19 = vpop.f32.mrb[225].mxu0 }
0x216c   :  { %v5825_v13 = vpop.f32.mrb[226].mxu0 }
0x216d   :  { %v9556_v51 = vpop.f32.mrb[227].mxu0  ;;  %v5826_v8 = vadd.f32 %v7904_v45, %v5825_v13 }
0x216e   :  { %v10333_v51 = vld [vmem:[#allocation2 + $0x670] sm:$0xff] }
0x2170   :  { %v5830_v62 = vpop.f32.mrb[228].mxu0 }
0x2171   :  { %v5831_v27 = vadd.f32 %v7904_v45, %v5830_v62  ;;  %v9559_v30 = vpop.f32.mrb[229].mxu0 }
0x2173   :  { %v10056_v31 = vpack.c.bf16 %v5831_v27, %v5826_v8  ;;  %v10334_v8 = vld [vmem:[#allocation2 + $0x680] sm:$0xf] }
0x2174   :  { %v5835_v32 = vpop.f32.mrb[230].mxu0 }
0x2175   :  { %v9562_v20 = vpop.f32.mrb[231].mxu0  ;;  %10058 = vmatpush3.bf16.xpose.msk.msra.mxu0 %vm10550_vm6, %v10056_v31  ;;  %v5836_v6 = vadd.f32 %v7904_v45, %v5835_v32 }
0x2176   :  { %10059 = vmatprep.subr.bf16.mxu0 %v10388_v21 }
0x2178   :  { %v5840_v5 = vpop.f32.mrb[232].mxu0 }
0x2179   :  { %v5841_v10 = vadd.f32 %v7904_v45, %v5840_v5  ;;  %v9565_v22 = vpop.f32.mrb[233].mxu0 }
0x217b   :  { %v10060_v38 = vpack.c.bf16 %v5841_v10, %v5836_v6 }
0x217c   :  { %v5845_v40 = vpop.f32.mrb[234].mxu0 }
0x217d   :  { %v9568_v36 = vpop.f32.mrb[235].mxu0  ;;  %10062 = vmatpush3.bf16.xpose.msk.msra.mxu0 %vm10550_vm6, %v10060_v38  ;;  %v5846_v49 = vadd.f32 %v7904_v45, %v5845_v40 }
0x217e   :  { %9600 = vmatprep.subr.mxu0 %v10386_v0 }
0x2185   :  { %9601 = vmatpush3.xpose.msk.msra.mxu0 %vm38_vm1, %v5846_v49 }
0x2186   :  { %9642 = vmatprep.subr.mxu0 %v10386_v0 }
0x2188   :  { %9603 = vmatmul.mubr.msk.f32.vlgmr.msra.gmra.mrb[236].mxu0 %vm38_vm1, %v5727_v28 }
0x2189   :  { %9605 = vmatprep.mubr.msk.f32.mxu0 %vm10387_vm0, %v10386_v0 }
0x218c   :  { %9606 = vmatmul.mubr.msk.f32.gmra.mrb[238].mxu0 %vm38_vm1, %v5732_v39 }
0x218d   :  { %9608 = vmatprep.mubr.msk.f32.mxu0 %vm10387_vm0, %v10386_v0 }
0x2190   :  { %9609 = vmatmul.mubr.msk.f32.gmra.mrb[240].mxu0 %vm38_vm1, %v5737_v15 }
0x2191   :  { %9611 = vmatprep.mubr.msk.f32.mxu0 %vm10387_vm0, %v10386_v0 }
0x2194   :  { %9612 = vmatmul.mubr.msk.f32.gmra.mrb[242].mxu0 %vm38_vm1, %v5742_v35 }
0x2195   :  { %9614 = vmatprep.mubr.msk.f32.mxu0 %vm10387_vm0, %v10386_v0 }
0x2198   :  { %9615 = vmatmul.mubr.msk.f32.gmra.mrb[244].mxu0 %vm38_vm1, %v5747_v11 }
0x2199   :  { %9644 = vmatprep.mubr.msk.f32.mxu0 %vm10387_vm0, %v10386_v0 }
0x225b   :  { %v6044_v26 = vpop.f32.mrb[236].mxu0 }
0x225c   :  { %v6045_v56 = vadd.f32 %v10330_v33, %v6044_v26  ;;  %v9604_v52 = vpop.f32.mrb[237].mxu0  ;;  %v6231_v26 = vld [vmem:[#allocation2 + $0x4c0] sm:$0xff] }
0x225d   :  { %9643 = vmatpush3.msra.mxu0 %v6231_v26 }
0x225e   :  { %v6068_v43 = vsel %vm803_vm8, %v6045_v56, -inf  ;;  %10075 = vmatprep.subr.bf16.mxu0 %v10388_v21 }
0x225f   :  { %6069 = vmax.xlane.f32.xlu1 %v6068_v43  ;;  %v6049_v42 = vpop.f32.mrb[238].mxu0 }
0x2260   :  { %v6050_v34 = vadd.f32 %v10331_v54, %v6049_v42  ;;  %v9607_v59 = vpop.f32.mrb[239].mxu0 }
0x2261   :  { %v11888_v59 = vld [vmem:[#allocation2 + $0x4c8] ss:$0 sm:$0xff] }
0x2262   :  { %v6071_v60 = vsel %vm803_vm8, %v6050_v34, -inf }
0x2263   :  { %6072 = vmax.xlane.f32.xlu1 %v6071_v60  ;;  %v6054_v23 = vpop.f32.mrb[240].mxu0 }
0x2264   :  { %v9610_v50 = vpop.f32.mrb[241].mxu0  ;;  %v6055_v45 = vadd.f32 %v10333_v51, %v6054_v23 }
0x2266   :  { %v6074_v30 = vsel %vm803_vm8, %v6055_v45, -inf }
0x2267   :  { %v6059_v7 = vpop.f32.mrb[242].mxu0 }
0x2268   :  { %v6060_v29 = vadd.f32 %v10332_v24, %v6059_v7  ;;  %v9613_v61 = vpop.f32.mrb[243].mxu0 }
0x226a   :  { %v6077_v41 = vsel %vm803_vm8, %v6060_v29, -inf }
0x226b   :  { %6078 = vmax.xlane.f32.xlu1 %v6077_v41  ;;  %v6064_v37 = vpop.f32.mrb[244].mxu0 }
0x226c   :  { %v9616_v18 = vpop.f32.mrb[245].mxu0  ;;  %v6065_v27 = vadd.f32 %v10334_v8, %v6064_v37  ;;  %v6442_v8 = vld [vmem:[#allocation2 + $0x4d0] sm:$0xff] }
0x226e   :  { %v6080_v31 = vsel %vm816_vm9, %v6065_v27, -inf }
0x22ec   :  { %v6070_v55 = vpop.xlane.xlu1 %6069 }
0x22ed   :  { %v6083_v58 = vsub.f32 %v6045_v56, %v6070_v55 }
0x22ef   :  { %v6088_v46 = vmul.f32 1.442695, %v6083_v58 }
0x22f0   :  { %v6073_v57 = vpop.xlane.xlu1 %6072 }
0x22f1   :  { %10282 = vpow2.f32 %v6088_v46  ;;  %v6084_v14 = vsub.f32 %v6050_v34, %v6073_v57 }
0x22f3   :  { %v6090_v3 = vmul.f32 1.442695, %v6084_v14 }
0x22f5   :  { %10284 = vpow2.f32 %v6090_v3 }
0x22f8   :  { %v6079_v2 = vpop.xlane.xlu1 %6078 }
0x22f9   :  { %v6086_v44 = vsub.f32 %v6060_v29, %v6079_v2 }
0x22fb   :  { %v10283_v19 = vpop.eup %10282  ;;  %v6094_v13 = vmul.f32 1.442695, %v6086_v44 }
0x22fc   :  { %v6098_v62 = vsel %vm803_vm8, %v10283_v19, 0.0 }
0x22fd   :  { %6099 = vadd.xlane.f32.xlu0 %v6098_v62  ;;  %10286 = vpow2.f32 %v6094_v13 }
0x22ff   :  { %v10285_v32 = vpop.eup %10284 }
0x2300   :  { %v6101_v20 = vsel %vm803_vm8, %v10285_v32, 0.0 }
0x2301   :  { %6075 = vmax.xlane.f32.xlu0 %v6074_v30 }
0x2305   :  { %6081 = vmax.xlane.f32.xlu0 %v6080_v31  ;;  %v6444_v31 = vld [vmem:[#allocation2 + $0x4e0] sm:$0xff] }
0x2307   :  { %v11870_v5 = vpop.eup %10286 }
0x2308   :  { %v6107_v6 = vsel %vm803_vm8, %v11870_v5, 0.0 }
0x2309   :  { %6102 = vadd.xlane.f32.xlu0 %v6101_v20 }
0x230d   :  { %6108 = vadd.xlane.f32.xlu0 %v6107_v6  ;;  %v6562_v6 = vld [vmem:[#allocation2 + $0x500] sm:$0xff] }
0x238a   :  { %v6100_v10 = vpop.xlane.xlu0 %6099 }
0x238b   :  { %10288 = vrcp.f32 %v6100_v10  ;;  %v6563_v10 = vld [vmem:[#allocation2 + $0x508] sm:$0xff] }
0x238e   :  { %v6076_v22 = vpop.xlane.xlu0 %6075 }
0x238f   :  { %v6085_v42 = vsub.f32 %v6055_v45, %v6076_v22 }
0x2391   :  { %v6092_v54 = vmul.f32 1.442695, %v6085_v42 }
0x2392   :  { %v6082_v38 = vpop.xlane.xlu0 %6081 }
0x2393   :  { %v6087_v40 = vsub.f32 %v6065_v27, %v6082_v38  ;;  %v6443_v27 = vld [vmem:[#allocation2 + $0x4d8] sm:$0xff]  ;;  %v6564_v38 = vld [vmem:[#allocation2 + $0x510] sm:$0xff] }
0x2394   :  { %v10070_v30 = vpack.c.bf16 %v6443_v27, %v6442_v8 }
0x2395   :  { %v10289_v36 = vpop.eup %10288  ;;  %v6096_v48 = vmul.f32 1.442695, %v6087_v40  ;;  %v10079_v40 = vpack.c.bf16 %v6564_v38, %v6563_v10 }
0x2396   :  { %v6118_v49 = vmul.f32 %v10289_v36, %v10283_v19  ;;  %v6103_v28 = vpop.xlane.xlu0 %6102  ;;  %v6565_v36 = vld [vmem:[#allocation2 + $0x518] sm:$0xff] }
0x2397   :  { %10290 = vpow2.f32 %v6096_v48  ;;  %v6566_v48 = vld [vmem:[#allocation2 + $0x520] sm:$0xff] }
0x2398   :  { %10292 = vrcp.f32 %v6103_v28  ;;  %9628 = vmatmul.mubr.msk.f32.vlgmr.msra.gmra.mrb[244].mxu1 %vm803_vm8, %v6118_v49  ;;  %v10082_v49 = vpack.c.bf16 %v6566_v48, %v6565_v36 }
0x2399   :  { %9630 = vmatprep.mubr.msk.f32.mxu1 %vm10387_vm0, %v10386_v0  ;;  %10294 = vpow2.f32 %v6092_v54  ;;  %10071 = vmatpush3.bf16.msra.mxu1 %v10070_v30 }
0x239a   :  { %v6109_v57 = vpop.xlane.xlu0 %6108  ;;  %10072 = vmatprep.subr.bf16.mxu1 %v10388_v21 }
0x23a1   :  { %v10291_v39 = vpop.eup %10290 }
0x23a2   :  { %v10293_v15 = vpop.eup %10292  ;;  %v6110_v35 = vsel %vm816_vm9, %v10291_v39, 0.0 }
0x23a3   :  { %6111 = vadd.xlane.f32.xlu0 %v6110_v35  ;;  %v6119_v11 = vmul.f32 %v10293_v15, %v10285_v32  ;;  %v10295_v29 = vpop.eup %10294  ;;  %v6445_v32 = vld [vmem:[#allocation2 + $0x4e8] sm:$0xff] }
0x23a4   :  { %v6104_v61 = vsel %vm803_vm8, %v10295_v29, 0.0  ;;  %v10073_v20 = vpack.c.bf16 %v6445_v32, %v6444_v31 }
0x23a5   :  { %9631 = vmatmul.mubr.msk.f32.gmra.mrb[246].mxu1 %vm803_vm8, %v6119_v11  ;;  %v11918_v11 = vld [vmem:[#allocation2 + $0x540] ss:$0 sm:$0xff] }
0x23a6   :  { %9633 = vmatprep.mubr.msk.f32.mxu1 %vm10387_vm0, %v10386_v0  ;;  %10074 = vmatpush3.bf16.msra.mxu1 %v10073_v20 }
0x23a7   :  { %9713 = vmatprep.subr.mxu1 %v10386_v0 }
0x2430   :  { %v6112_v44 = vpop.xlane.xlu0 %6111 }
0x246b   :  { %v6207_v33 = vpop.f32.mrb[244].mxu1 }
0x246c   :  { %v9629_v56 = vpop.f32.mrb[245].mxu1  ;;  %9645 = vmatmul.mubr.msk.f32.vlgmr.msra.gmra.mrb[246].mxu0 %vm38_vm1, %v6207_v33  ;;  %v11920_v33 = vld [vmem:[#allocation2 + $0x548] ss:$0 sm:$0xff] }
0x246d   :  { %9647 = vmatprep.mubr.msk.f32.mxu0 %vm10387_vm0, %v10386_v0 }
0x2478   :  { %v6212_v52 = vpop.f32.mrb[246].mxu1 }
0x2479   :  { %v9632_v43 = vpop.f32.mrb[247].mxu1  ;;  %9648 = vmatmul.mubr.msk.f32.gmra.mrb[248].mxu0 %vm38_vm1, %v6212_v52 }
0x247a   :  { %9650 = vmatprep.mubr.msk.f32.mxu0 %vm10387_vm0, %v10386_v0 }
0x253f   :  { %v6313_v34 = vpop.f32.mrb[246].mxu0 }
0x2540   :  { %v6337_v60 = vadd.f32 %v6313_v34, %v11821_v1  ;;  %v9646_v23 = vpop.f32.mrb[247].mxu0 }
0x2542   :  { %v6347_v50 = vadd.f32 %v11888_v59, %v6337_v60 }
0x2544   :  { %v6352_v7 = vadd.f32 %v6347_v50, %v11259_v63  ;;  %v6567_v50 = vld [vmem:[#allocation2 + $0x528] sm:$0xff] }
0x2546   :  { %v6359_v24 = vsel %vm383_vm5, %v6352_v7, 0.0 }
0x2547   :  { %6360 = vadd.xlane.f32.xlu1 %v6359_v24 }
0x254b   :  { %6105 = vadd.xlane.f32.xlu1 %v6104_v61 }
0x254c   :  { %v6318_v41 = vpop.f32.mrb[248].mxu0 }
0x254d   :  { %v6338_v37 = vadd.f32 %v6318_v41, %v11824_v47  ;;  %v9649_v18 = vpop.f32.mrb[249].mxu0 }
0x254f   :  { %v6348_v1 = vadd.f32 %v11888_v59, %v6338_v37 }
0x2551   :  { %v11899_v2 = vadd.f32 %v6348_v1, %v11270_v25 }
0x2553   :  { %v6362_v47 = vsel %vm383_vm5, %v11899_v2, 0.0 }
0x25d4   :  { %v6361_v55 = vpop.xlane.xlu1 %6360 }
0x25d5   :  { %v6374_v58 = vmul.f32 0.03125, %v6361_v55 }
0x25d7   :  { %v6379_v46 = vsub.f32 %v6352_v7, %v6374_v58  ;;  %v6568_v7 = vld [vmem:[#allocation2 + $0x530] sm:$0xff] }
0x25d8   :  { %v6106_v14 = vpop.xlane.xlu1 %6105  ;;  %v10085_v24 = vpack.c.bf16 %v6568_v7, %v6567_v50 }
0x25d9   :  { %10296 = vrcp.f32 %v6106_v14  ;;  %v6384_v63 = vmul.f32 %v6379_v46, %v6379_v46 }
0x25da   :  { %10298 = vrcp.f32 %v6109_v57 }
0x25db   :  { %v6389_v3 = vsel %vm383_vm5, %v6384_v63, 0.0  ;;  %10300 = vrcp.f32 %v6112_v44 }
0x25dc   :  { %6390 = vadd.xlane.f32.xlu1 %v6389_v3 }
0x25e0   :  { %6363 = vadd.xlane.f32.xlu1 %v6362_v47 }
0x25e3   :  { %v10297_v19 = vpop.eup %10296 }
0x25e4   :  { %v6120_v13 = vmul.f32 %v10297_v19, %v10295_v29  ;;  %v10299_v51 = vpop.eup %10298  ;;  %v11940_v29 = vld [vmem:[#allocation2 + $0x4f0] ss:$0 sm:$0xff] }
0x25e5   :  { %v6121_v45 = vmul.f32 %v10299_v51, %v11870_v5  ;;  %v10301_v62 = vpop.eup %10300  ;;  %v6561_v5 = vld [vmem:[#allocation2 + $0x4f8] sm:$0xff] }
0x25e6   :  { %9634 = vmatmul.mubr.msk.f32.gmra.mrb[248].mxu1 %vm803_vm8, %v6120_v13  ;;  %v6122_v25 = vmul.f32 %v10301_v62, %v10291_v39  ;;  %v10076_v22 = vpack.c.bf16 %v6562_v6, %v6561_v5  ;;  %v7946_v5 = vld [vmem:[#allocation2 + $0x538] ss:$0 sm:$0xff] }
0x25e7   :  { %9636 = vmatprep.mubr.msk.f32.mxu1 %vm10387_vm0, %v10386_v0 }
0x25e8   :  { %10077 = vmatpush3.bf16.msra.mxu0 %v10076_v22 }
0x25e9   :  { %10078 = vmatprep.subr.bf16.mxu0 %v10388_v21 }
0x25ea   :  { %9637 = vmatmul.mubr.msk.f32.gmra.mrb[250].mxu1 %vm803_vm8, %v6121_v45 }
0x25eb   :  { %9639 = vmatprep.mubr.msk.f32.mxu1 %vm10387_vm0, %v10386_v0 }
0x25ec   :  { %10080 = vmatpush3.bf16.msra.mxu0 %v10079_v40 }
0x25ed   :  { %10081 = vmatprep.subr.bf16.mxu0 %v10388_v21 }
0x25ee   :  { %9640 = vmatmul.mubr.msk.f32.gmra.mrb[252].mxu1 %vm803_vm8, %v6122_v25 }
0x25ef   :  { %9667 = vmatprep.mubr.msk.f32.mxu1 %vm10387_vm0, %v10386_v0 }
0x25f0   :  { %10083 = vmatpush3.bf16.msra.mxu0 %v10082_v49 }
0x25f1   :  { %10084 = vmatprep.subr.bf16.mxu0 %v10388_v21 }
0x25f4   :  { %10086 = vmatpush3.bf16.msra.mxu0 %v10085_v24 }
0x25f5   :  { %9718 = vmatprep.subr.mxu0 %v10386_v0 }
0x2669   :  { %v6391_v28 = vpop.xlane.xlu1 %6390 }
0x266a   :  { %v6404_v39 = vmul.f32 0.03125, %v6391_v28 }
0x266c   :  { %v6409_v15 = vadd.f32 1e-05, %v6404_v39 }
0x266d   :  { %v6364_v57 = vpop.xlane.xlu1 %6363 }
0x266e   :  { %10302 = vrsqrt.f32 %v6409_v15  ;;  %v6375_v47 = vmul.f32 0.03125, %v6364_v57 }
0x2670   :  { %v6380_v25 = vsub.f32 %v11899_v2, %v6375_v47 }
0x2672   :  { %v6385_v30 = vmul.f32 %v6380_v25, %v6380_v25 }
0x2674   :  { %v6392_v31 = vsel %vm383_vm5, %v6385_v30, 0.0 }
0x2678   :  { %v10303_v35 = vpop.eup %10302 }
0x2679   :  { %v6419_v26 = vmul.f32 %v10303_v35, %v6379_v46 }
0x267b   :  { %v6428_v56 = vmul.f32 %v11918_v11, %v6419_v26 }
0x267d   :  { %v11924_v52 = vadd.f32 %v11920_v33, %v6428_v56 }
0x267f   :  { %9668 = vmatmul.mubr.msk.f32.vlgmr.msra.gmra.mrb[254].mxu1 %vm383_vm5, %v11924_v52 }
0x2680   :  { %9670 = vmatprep.mubr.msk.f32.mxu1 %vm10387_vm0, %v10386_v0 }
0x26b9   :  { %v6217_v43 = vpop.f32.mrb[248].mxu1 }
0x26ba   :  { %v9635_v42 = vpop.f32.mrb[249].mxu1  ;;  %9651 = vmatmul.mubr.msk.f32.gmra.mrb[250].mxu0 %vm38_vm1, %v6217_v43 }
0x26bb   :  { %9653 = vmatprep.mubr.msk.f32.mxu0 %vm10387_vm0, %v10386_v0 }
0x26bd   :  { %v6222_v54 = vpop.f32.mrb[250].mxu1 }
0x26be   :  { %v9638_v34 = vpop.f32.mrb[251].mxu1  ;;  %9654 = vmatmul.mubr.msk.f32.gmra.mrb[252].mxu0 %vm38_vm1, %v6222_v54 }
0x26bf   :  { %9656 = vmatprep.mubr.msk.f32.mxu0 %vm10387_vm0, %v10386_v0 }
0x26c1   :  { %v6227_v60 = vpop.f32.mrb[252].mxu1 }
0x26c2   :  { %v9641_v23 = vpop.f32.mrb[253].mxu1  ;;  %9657 = vmatmul.mubr.msk.f32.gmra.mrb[254].mxu0 %vm38_vm1, %v6227_v60 }
0x26c3   :  { %9698 = vmatprep.mubr.msk.f32.mxu0 %vm10387_vm0, %v10386_v0 }
0x2752   :  { %v6532_v61 = vpop.f32.mrb[254].mxu1 }
0x2753   :  { %v6533_v41 = vadd.f32 %v11940_v29, %v6532_v61  ;;  %v9669_v37 = vpop.f32.mrb[255].mxu1 }
0x2755   :  { %v6556_v18 = vmax.f32 %v6533_v41, 0.0 }
0x2757   :  { %9699 = vmatmul.mubr.msk.f32.vlgmr.msra.gmra.mrb[0].mxu0 %vm3377_vm11, %v6556_v18 }
0x2758   :  { %9701 = vmatprep.mubr.msk.f32.mxu0 %vm10387_vm0, %v10386_v0 }
0x278d   :  { %v6323_v55 = vpop.f32.mrb[250].mxu0 }
0x278e   :  { %v6339_v58 = vadd.f32 %v6323_v55, %v11827_v9  ;;  %v9652_v1 = vpop.f32.mrb[251].mxu0 }
0x2790   :  { %v6349_v46 = vadd.f32 %v11888_v59, %v6339_v58 }
0x2791   :  { %v6328_v14 = vpop.f32.mrb[252].mxu0 }
0x2792   :  { %v6340_v63 = vadd.f32 %v6328_v14, %v11830_v4  ;;  %v9655_v3 = vpop.f32.mrb[253].mxu0  ;;  %v6354_v44 = vadd.f32 %v6349_v46, %v11282_v16 }
0x2794   :  { %v6350_v19 = vadd.f32 %v11888_v59, %v6340_v63  ;;  %v6365_v13 = vsel %vm383_vm5, %v6354_v44, 0.0 }
0x2795   :  { %6366 = vadd.xlane.f32.xlu0 %v6365_v13  ;;  %v6333_v51 = vpop.f32.mrb[254].mxu0 }
0x2796   :  { %v6341_v45 = vadd.f32 %v6333_v51, %v11833_v53  ;;  %v9658_v9 = vpop.f32.mrb[255].mxu0  ;;  %v6355_v62 = vadd.f32 %v6350_v19, %v11294_v12 }
0x2798   :  { %v6351_v8 = vadd.f32 %v11888_v59, %v6341_v45  ;;  %v6368_v4 = vsel %vm383_vm5, %v6355_v62, 0.0 }
0x2799   :  { %6369 = vadd.xlane.f32.xlu1 %v6368_v4 }
0x279a   :  { %v6356_v16 = vadd.f32 %v6351_v8, %v11305_v17 }
0x279c   :  { %v6371_v27 = vsel %vm3172_vm10, %v6356_v16, 0.0 }
0x279d   :  { %6372 = vadd.xlane.f32.xlu0 %v6371_v27 }
0x27a1   :  { %6393 = vadd.xlane.f32.xlu0 %v6392_v31 }
0x2822   :  { %v6367_v53 = vpop.xlane.xlu0 %6366 }
0x2823   :  { %v6376_v20 = vmul.f32 0.03125, %v6367_v53 }
0x2825   :  { %v6381_v10 = vsub.f32 %v6354_v44, %v6376_v20 }
0x2826   :  { %v6370_v32 = vpop.xlane.xlu1 %6369 }
0x2827   :  { %v6377_v12 = vmul.f32 0.03125, %v6370_v32  ;;  %v6386_v35 = vmul.f32 %v6381_v10, %v6381_v10  ;;  %v7952_v32 = vld [vmem:[#allocation2 + $0x550] ss:$0 sm:$0xff] }
0x2829   :  { %v6382_v2 = vsub.f32 %v6355_v62, %v6377_v12  ;;  %v6395_v56 = vsel %vm383_vm5, %v6386_v35, 0.0  ;;  %v7953_v12 = vld [vmem:[#allocation2 + $0x558] ss:$0 sm:$0xff] }
0x282a   :  { %v6373_v6 = vpop.xlane.xlu0 %6372  ;;  %v6655_v59 = vpop.f32.mrb[0].mxu0 }
0x282b   :  { %v6378_v22 = vmul.f32 0.03125, %v6373_v6  ;;  %v6656_v38 = vadd.f32 %v7946_v5, %v6655_v59  ;;  %v9700_v40 = vpop.f32.mrb[1].mxu0  ;;  %v6387_v17 = vmul.f32 %v6382_v2, %v6382_v2  ;;  %v6701_v6 = vld [vmem:[#allocation2 + $0x6a8] sm:$0xff] }
0x282d   :  { %v6675_v36 = vadd.f32 %v6656_v38, %v11924_v52  ;;  %v6398_v48 = vsel %vm383_vm5, %v6387_v17, 0.0  ;;  %v6383_v28 = vsub.f32 %v6356_v16, %v6378_v22 }
0x282e   :  { %6399 = vadd.xlane.f32.xlu0 %v6398_v48  ;;  %v6394_v49 = vpop.xlane.xlu0 %6393 }
0x282f   :  { %v6405_v39 = vmul.f32 0.03125, %v6394_v49  ;;  %v6678_v15 = vsel %vm383_vm5, %v6675_v36, 0.0  ;;  %v6388_v43 = vmul.f32 %v6383_v28, %v6383_v28 }
0x2830   :  { %6679 = vadd.xlane.f32.xlu1 %v6678_v15 }
0x2831   :  { %v6410_v26 = vadd.f32 1e-05, %v6405_v39  ;;  %v6401_v42 = vsel %vm3172_vm10, %v6388_v43, 0.0  ;;  %v6853_v43 = vld [vmem:[#allocation2 + $0x618] sm:$0xff] }
0x2833   :  { %10304 = vrsqrt.f32 %v6410_v26 }
0x2834   :  { %6396 = vadd.xlane.f32.xlu1 %v6395_v56  ;;  %v6852_v56 = vld [vmem:[#allocation2 + $0x610] sm:$0xff] }
0x2838   :  { %6402 = vadd.xlane.f32.xlu1 %v6401_v42  ;;  %v6854_v42 = vld [vmem:[#allocation2 + $0x620] sm:$0xff] }
0x283d   :  { %v10305_v52 = vpop.eup %10304 }
0x283e   :  { %v6420_v54 = vmul.f32 %v10305_v52, %v6380_v25  ;;  %v10088_v52 = vpack.c.bf16 %v6853_v43, %v6852_v56 }
0x2840   :  { %v6429_v34 = vmul.f32 %v11918_v11, %v6420_v54  ;;  %v6855_v54 = vld [vmem:[#allocation2 + $0x628] sm:$0xff] }
0x2842   :  { %v6438_v60 = vadd.f32 %v11920_v33, %v6429_v34  ;;  %v6778_v34 = vld [vmem:[#allocation2 + $0x6b0] sm:$0x3] }
0x2844   :  { %9671 = vmatmul.mubr.msk.f32.gmra.mrb[0].mxu1 %vm383_vm5, %v6438_v60 }
0x2845   :  { %9673 = vmatprep.mubr.msk.f32.mxu1 %vm10387_vm0, %v10386_v0 }
0x28bb   :  { %v6400_v23 = vpop.xlane.xlu0 %6399 }
0x28bc   :  { %v6407_v50 = vmul.f32 0.03125, %v6400_v23 }
0x28bd   :  { %v6680_v7 = vpop.xlane.xlu1 %6679 }
0x28be   :  { %v6681_v24 = vmul.f32 0.03125, %v6680_v7  ;;  %v6412_v61 = vadd.f32 1e-05, %v6407_v50 }
0x28c0   :  { %v6682_v41 = vsub.f32 %v6675_v36, %v6681_v24  ;;  %10306 = vrsqrt.f32 %v6412_v61 }
0x28c1   :  { %v6397_v37 = vpop.xlane.xlu1 %6396 }
0x28c2   :  { %v6406_v18 = vmul.f32 0.03125, %v6397_v37  ;;  %v6683_v55 = vmul.f32 %v6682_v41, %v6682_v41 }
0x28c4   :  { %v6411_v58 = vadd.f32 1e-05, %v6406_v18  ;;  %v6684_v1 = vsel %vm383_vm5, %v6683_v55, 0.0 }
0x28c5   :  { %6685 = vadd.xlane.f32.xlu0 %v6684_v1  ;;  %v6403_v46 = vpop.xlane.xlu1 %6402 }
0x28c6   :  { %10308 = vrsqrt.f32 %v6411_v58  ;;  %v6408_v57 = vmul.f32 0.03125, %v6403_v46  ;;  %v7957_v58 = vld [vmem:[#allocation2 + $0x630] ss:$0 sm:$0xff] }
0x28c8   :  { %v6413_v14 = vadd.f32 1e-05, %v6408_v57 }
0x28ca   :  { %10310 = vrsqrt.f32 %v6413_v14  ;;  %v10307_v63 = vpop.eup %10306 }
0x28cb   :  { %v6422_v44 = vmul.f32 %v10307_v63, %v6382_v2 }
0x28cd   :  { %v6431_v51 = vmul.f32 %v11918_v11, %v6422_v44 }
0x28cf   :  { %v6440_v62 = vadd.f32 %v11920_v33, %v6431_v51  ;;  %v6963_v51 = vld [vmem:[#allocation2 + $0x650] sm:$0xff] }
0x28d0   :  { %v10309_v3 = vpop.eup %10308 }
0x28d1   :  { %v6421_v47 = vmul.f32 %v10309_v3, %v6381_v10 }
0x28d3   :  { %v6430_v19 = vmul.f32 %v11918_v11, %v6421_v47 }
0x28d4   :  { %v10311_v13 = vpop.eup %10310 }
0x28d5   :  { %v6439_v45 = vadd.f32 %v11920_v33, %v6430_v19  ;;  %v6423_v9 = vmul.f32 %v10311_v13, %v6383_v28  ;;  %v6962_v13 = vld [vmem:[#allocation2 + $0x648] sm:$0xff] }
0x28d7   :  { %9674 = vmatmul.mubr.msk.f32.gmra.mrb[2].mxu1 %vm383_vm5, %v6439_v45  ;;  %v6432_v25 = vmul.f32 %v11918_v11, %v6423_v9  ;;  %v10094_v45 = vpack.c.bf16 %v6963_v51, %v6962_v13  ;;  %v7966_v13 = vld [vmem:[#allocation2 + $0x590] ss:$0 sm:$0xff] }
0x28d8   :  { %9676 = vmatprep.mubr.msk.f32.mxu1 %vm10387_vm0, %v10386_v0 }
0x28d9   :  { %v6441_v8 = vadd.f32 %v11920_v33, %v6432_v25 }
0x28db   :  { %9677 = vmatmul.mubr.msk.f32.gmra.mrb[4].mxu1 %vm383_vm5, %v6440_v62 }
0x28dc   :  { %9679 = vmatprep.mubr.msk.f32.mxu1 %vm10387_vm0, %v10386_v0 }
0x28df   :  { %9680 = vmatmul.mubr.msk.f32.gmra.mrb[6].mxu1 %vm383_vm5, %v6441_v8 }
0x28e0   :  { %9715 = vmatprep.mubr.msk.f32.mxu1 %vm10387_vm0, %v10386_v0 }
0x2917   :  { %v6537_v4 = vpop.f32.mrb[0].mxu1 }
0x2918   :  { %v6538_v16 = vadd.f32 %v11940_v29, %v6537_v4  ;;  %v9672_v27 = vpop.f32.mrb[1].mxu1  ;;  %v7959_v4 = vld [vmem:[#allocation2 + $0x638] ss:$0 sm:$0xff] }
0x2919   :  { %v7960_v27 = vld [vmem:[#allocation2 + $0x640] ss:$0 sm:$0xff] }
0x291a   :  { %v6557_v30 = vmax.f32 %v6538_v16, 0.0 }
0x291c   :  { %9702 = vmatmul.mubr.msk.f32.gmra.mrb[2].mxu0 %vm3377_vm11, %v6557_v30 }
0x291d   :  { %9704 = vmatprep.mubr.msk.f32.mxu0 %vm10387_vm0, %v10386_v0 }
0x2952   :  { %v6686_v11 = vpop.xlane.xlu0 %6685 }
0x2953   :  { %v6687_v31 = vmul.f32 0.03125, %v6686_v11  ;;  %v7044_v11 = vld [vmem:[#allocation2 + $0x560] sm:$0xff] }
0x2955   :  { %v6688_v53 = vadd.f32 1e-05, %v6687_v31  ;;  %v7045_v31 = vld [vmem:[#allocation2 + $0x568] sm:$0xff] }
0x2957   :  { %10312 = vrsqrt.f32 %v6688_v53 }
0x2961   :  { %v10313_v33 = vpop.eup %10312 }
0x2962   :  { %v6690_v20 = vmul.f32 %v10313_v33, %v6682_v41  ;;  %v10097_v33 = vpack.c.bf16 %v7045_v31, %v7044_v11  ;;  %v7342_v11 = vld [vmem:[#allocation2 + $0x600] sm:$0xff] }
0x2964   :  { %v6695_v5 = vmul.f32 %v7952_v32, %v6690_v20  ;;  %v7046_v20 = vld [vmem:[#allocation2 + $0x570] sm:$0xff] }
0x2966   :  { %v6700_v2 = vadd.f32 %v7953_v12, %v6695_v5  ;;  %v7047_v12 = vld [vmem:[#allocation2 + $0x578] sm:$0xff] }
0x2967   :  { %v10100_v5 = vpack.c.bf16 %v7047_v12, %v7046_v20  ;;  %v7973_v20 = vld [vmem:[#allocation2 + $0x608] ss:$0 sm:$0xff]  ;;  %v7967_v12 = vld [vmem:[#allocation2 + $0x5b0] ss:$0 sm:$0xff] }
0x2968   :  { %9714 = vmatpush3.msk.msra.mxu1 %vm238_vm4, %v6700_v2  ;;  %v7235_v2 = vld [vmem:[#allocation2 + $0x5b8] sm:$0xff] }
0x2969   :  { %9716 = vmatmul.mubr.msk.f32.vlgmr.msra.gmra.mrb[8].mxu1 %vm225_vm2, %v6701_v6  ;;  %10087 = vmatprep.subr.bf16.mxu1 %v10388_v21  ;;  %v7236_v6 = vld [vmem:[#allocation2 + $0x5c0] sm:$0xff] }
0x296a   :  { %9731 = vmatprep.mubr.msk.f32.mxu1 %vm10387_vm0, %v10386_v0  ;;  %10089 = vmatpush3.bf16.msra.mxu1 %v10088_v52 }
0x296b   :  { %10090 = vmatprep.subr.bf16.mxu1 %v10388_v21 }
0x29aa   :  { %v6542_v59 = vpop.f32.mrb[2].mxu1 }
0x29ab   :  { %v6543_v10 = vadd.f32 %v11940_v29, %v6542_v59  ;;  %v9675_v22 = vpop.f32.mrb[3].mxu1  ;;  %v10106_v59 = vpack.c.bf16 %v7236_v6, %v7235_v2 }
0x29ac   :  { %v7238_v22 = vld [vmem:[#allocation2 + $0x5d0] sm:$0xff] }
0x29ad   :  { %v6558_v38 = vmax.f32 %v6543_v10, 0.0  ;;  %v7237_v10 = vld [vmem:[#allocation2 + $0x5c8] sm:$0xff] }
0x29ae   :  { %v6547_v40 = vpop.f32.mrb[4].mxu1 }
0x29af   :  { %v6548_v17 = vadd.f32 %v11940_v29, %v6547_v40  ;;  %v9678_v36 = vpop.f32.mrb[5].mxu1  ;;  %9705 = vmatmul.mubr.msk.f32.gmra.mrb[4].mxu0 %vm3377_vm11, %v6558_v38  ;;  %v10109_v38 = vpack.c.bf16 %v7238_v22, %v7237_v10  ;;  %v7961_v40 = vld [vmem:[#allocation2 + $0x658] ss:$0 sm:$0xff] }
0x29b0   :  { %9707 = vmatprep.mubr.msk.f32.mxu0 %vm10387_vm0, %v10386_v0 }
0x29b1   :  { %v6559_v48 = vmax.f32 %v6548_v17, 0.0 }
0x29b2   :  { %v6552_v49 = vpop.f32.mrb[6].mxu1 }
0x29b3   :  { %v6553_v28 = vadd.f32 %v11940_v29, %v6552_v49  ;;  %v9681_v39 = vpop.f32.mrb[7].mxu1  ;;  %9708 = vmatmul.mubr.msk.f32.gmra.mrb[6].mxu0 %vm3377_vm11, %v6559_v48  ;;  %v10091_v29 = vpack.c.bf16 %v6855_v54, %v6854_v42  ;;  %v7963_v49 = vld [vmem:[#allocation2 + $0x580] ss:$0 sm:$0xff] }
0x29b4   :  { %9710 = vmatprep.mubr.msk.f32.mxu0 %vm10387_vm0, %v10386_v0 }
0x29b5   :  { %v6560_v15 = vmax.f32 %v6553_v28, 0.0  ;;  %10092 = vmatpush3.bf16.msra.mxu1 %v10091_v29 }
0x29b6   :  { %10102 = vmatprep.subr.bf16.mxu1 %v10388_v21 }
0x29b7   :  { %9711 = vmatmul.mubr.msk.f32.gmra.mrb[8].mxu0 %vm3377_vm11, %v6560_v15 }
0x29b8   :  { %9720 = vmatprep.mubr.msk.f32.mxu0 %vm10387_vm0, %v10386_v0 }
0x29ef   :  { %v6660_v35 = vpop.f32.mrb[2].mxu0 }
0x29f0   :  { %v9703_v26 = vpop.f32.mrb[3].mxu0 }
0x29f1   :  { %v7969_v26 = vld [vmem:[#allocation2 + $0x5d8] ss:$0 sm:$0xff] }
0x2a3c   :  { %v12009_v60 = vpop.f32.mrb[8].mxu1 }
0x2a3d   :  { %v9717_v23 = vpop.f32.mrb[9].mxu1  ;;  %9719 = vmatpush3.msra.mxu0 %v12009_v60 }
0x2a3e   :  { %9721 = vmatmul.mubr.msk.f32.vlgmr.msra.gmra.mrb[10].mxu0 %vm38_vm1, %v6778_v34  ;;  %10093 = vmatprep.subr.bf16.mxu0 %v10388_v21 }
0x2a3f   :  { %9738 = vmatprep.mubr.msk.f32.mxu0 %vm10387_vm0, %v10386_v0  ;;  %10095 = vmatpush3.bf16.msra.mxu0 %v10094_v45  ;;  %v7340_v45 = vld [vmem:[#allocation2 + $0x5f0] sm:$0xff] }
0x2a40   :  { %10096 = vmatprep.subr.bf16.mxu0 %v10388_v21 }
0x2a82   :  { %v6664_v50 = vpop.f32.mrb[4].mxu0 }
0x2a83   :  { %v9706_v7 = vpop.f32.mrb[5].mxu0 }
0x2a86   :  { %v6668_v24 = vpop.f32.mrb[6].mxu0 }
0x2a87   :  { %v9709_v61 = vpop.f32.mrb[7].mxu0 }
0x2a8a   :  { %v6672_v41 = vpop.f32.mrb[8].mxu0 }
0x2a8b   :  { %v9712_v37 = vpop.f32.mrb[9].mxu0 }
0x2a8c   :  { %v7154_v37 = vld [vmem:[#allocation2 + $0x598] sm:$0xff] }
0x2b11   :  { %v6848_v18 = vpop.f32.mrb[10].mxu0 }
0x2b12   :  { %9732 = vmatmul.mubr.msk.f32.vlgmr.msra.gmra.mrb[10].mxu1 %vm383_vm5, %v6848_v18  ;;  %v9722_v55 = vpop.f32.mrb[11].mxu0  ;;  %v7155_v18 = vld [vmem:[#allocation2 + $0x5a0] sm:$0xff] }
0x2b13   :  { %9758 = vmatprep.mubr.msk.f32.mxu1 %vm10387_vm0, %v10386_v0  ;;  %v10103_v55 = vpack.c.bf16 %v7155_v18, %v7154_v37 }
0x2b15   :  { %10104 = vmatpush3.bf16.msra.mxu1 %v10103_v55 }
0x2b16   :  { %9756 = vmatprep.subr.mxu1 %v10386_v0 }
0x2be5   :  { %v6930_v1 = vpop.f32.mrb[10].mxu1 }
0x2be6   :  { %v6931_v46 = vadd.f32 %v7957_v58, %v6930_v1  ;;  %v9733_v57 = vpop.f32.mrb[11].mxu1  ;;  %v7156_v58 = vld [vmem:[#allocation2 + $0x5a8] sm:$0xff] }
0x2be7   :  { %9757 = vmatpush3.msra.mxu1 %v7156_v58 }
0x2be8   :  { %v6937_v14 = vsel %vm6936_vm12, %v6931_v46, 0.0  ;;  %10111 = vmatprep.subr.bf16.mxu1 %v10388_v21 }
0x2be9   :  { %6938 = vadd.xlane.f32.xlu1 %v6937_v14 }
0x2c76   :  { %v6939_v63 = vpop.xlane.xlu1 %6938 }
0x2c77   :  { %v6941_v3 = vmul.f32 0.0625, %v6939_v63 }
0x2c79   :  { %v6942_v44 = vsub.f32 %v6931_v46, %v6941_v3 }
0x2c7b   :  { %v6943_v47 = vmul.f32 %v6942_v44, %v6942_v44 }
0x2c7d   :  { %v6944_v19 = vsel %vm6936_vm12, %v6943_v47, 0.0  ;;  %v7965_v47 = vld [vmem:[#allocation2 + $0x588] ss:$0 sm:$0xff] }
0x2c7e   :  { %6945 = vadd.xlane.f32.xlu0 %v6944_v19 }
0x2d0b   :  { %v6946_v9 = vpop.xlane.xlu0 %6945 }
0x2d0c   :  { %v6947_v62 = vmul.f32 0.0625, %v6946_v9  ;;  %v7341_v9 = vld [vmem:[#allocation2 + $0x5f8] sm:$0xff] }
0x2d0e   :  { %v6948_v25 = vadd.f32 1e-05, %v6947_v62 }
0x2d10   :  { %10314 = vrsqrt.f32 %v6948_v25  ;;  %v10112_v25 = vpack.c.bf16 %v7341_v9, %v7340_v45 }
0x2d1a   :  { %v10315_v8 = vpop.eup %10314 }
0x2d1b   :  { %v6950_v16 = vmul.f32 %v10315_v8, %v6942_v44 }
0x2d1d   :  { %v6955_v30 = vmul.f32 %v7959_v4, %v6950_v16 }
0x2d1f   :  { %v6960_v53 = vadd.f32 %v7960_v27, %v6955_v30  ;;  %v7972_v27 = vld [vmem:[#allocation2 + $0x5e8] ss:$0 sm:$0xff] }
0x2d21   :  { %v6961_v32 = vmax.f32 %v6960_v53, 0.0 }
0x2d23   :  { %9739 = vmatmul.mubr.msk.f32.vlgmr.msra.gmra.mrb[12].mxu0 %vm123_vm3, %v6961_v32 }
0x2d24   :  { %10098 = vmatpush3.bf16.msra.mxu0 %v10097_v33  ;;  %9749 = vmatprep.mubr.msk.f32.mxu0 %vm10387_vm0, %v10386_v0 }
0x2d25   :  { %10099 = vmatprep.subr.bf16.mxu0 %v10388_v21 }
0x2d28   :  { %10101 = vmatpush3.bf16.msra.mxu0 %v10100_v5 }
0x2d29   :  { %10105 = vmatprep.subr.bf16.mxu0 %v10388_v21 }
0x2d2b   :  { %9750 = vmatmul.mubr.msk.f32.vlgmr.msra.gmra.mrb[14].mxu0 %vm383_vm5, %v12009_v60 }
0x2d2c   :  { %10107 = vmatpush3.bf16.msra.mxu0 %v10106_v59  ;;  %9769 = vmatprep.mubr.msk.f32.mxu0 %vm10387_vm0, %v10386_v0 }
0x2d2d   :  { %10108 = vmatprep.subr.bf16.mxu0 %v10388_v21  ;;  %v7971_v21 = vld [vmem:[#allocation2 + $0x5e0] ss:$0 sm:$0xff] }
0x2d30   :  { %10110 = vmatpush3.bf16.msra.mxu0 %v10109_v38 }
0x2d31   :  { %9786 = vmatprep.subr.mxu0 %v10386_v0 }
0x2d33   :  { %9770 = vmatmul.mubr.msk.f32.vlgmr.msra.gmra.mrb[16].mxu0 %vm383_vm5, %v12009_v60 }
0x2d34   :  { %9788 = vmatprep.mubr.msk.f32.mxu0 %vm10387_vm0, %v10386_v0 }
0x2df6   :  { %v7038_v17 = vpop.f32.mrb[12].mxu0 }
0x2df7   :  { %v7039_v36 = vadd.f32 %v7961_v40, %v7038_v17  ;;  %v9740_v48 = vpop.f32.mrb[13].mxu0 }
0x2df9   :  { %7043 = vst.msk [vmem:[%s12072_s4] sm:$0x3] %vm7042_vm13, %v7039_v36  ;;  %s10390_s4 = smov [#allocation5]  }
0x2dfa   :  { %s7582_s13 = sshll.u32 %s10390_s4, 4  ;;  %s7583_s13 = int_to_ptr.vmem [resolvable:$true] %s7582_s13 }
0x2dfb   :  { %s10357_s14 = scalar_lea.vmem %s7583_s13, 128  ;;  %p10362_p9 = scmp.lt.s32.totalorder %s7583_s13, %s7583_s13 }
0x2dfc   :  { %p10358_p8 = scmp.ne.s32.totalorder %s7583_s13, %s10357_s14  ;;  %p10363_p10 = scmp.lt.s32.totalorder %s10357_s14, %s10357_s14 }
0x2dfe   :  { %v7122_v28 = vpop.f32.mrb[14].mxu0  ;;  %p10364_p11 = por %p10363_p10, %p10362_p9 }
0x2dff   :  { %v7123_v39 = vadd.f32 %v7963_v49, %v7122_v28  ;;  %v9751_v15 = vpop.f32.mrb[15].mxu0 }
0x2e00   :  { %p10365_p12 = pnand %p10364_p11, %p10358_p8 }
0x2e01   :  { %v7129_v35 = vsel %vm7128_vm14, %v7123_v39, 0.0 }
0x2e02   :  { %7130 = vadd.xlane.f32.xlu1 %v7129_v35 }
0x2e06   :  { %v7310_v56 = vpop.f32.mrb[16].mxu0 }
0x2e07   :  { %v7311_v43 = vadd.f32 %v7969_v26, %v7310_v56  ;;  %v9771_v42 = vpop.f32.mrb[17].mxu0 }
0x2e09   :  { %v7316_v52 = vsel %vm7128_vm14, %v7311_v43, 0.0 }
0x2e0a   :  { %7317 = vadd.xlane.f32.xlu0 %v7316_v52 }
0x2e8f   :  { %v7131_v54 = vpop.xlane.xlu1 %7130 }
0x2e90   :  { %v7133_v29 = vmul.f32 0.041666668, %v7131_v54 }
0x2e92   :  { %v7134_v34 = vsub.f32 %v7123_v39, %v7133_v29 }
0x2e94   :  { %v7135_v60 = vmul.f32 %v7134_v34, %v7134_v34 }
0x2e96   :  { %v7136_v23 = vsel %vm7128_vm14, %v7135_v60, 0.0 }
0x2e97   :  { %7137 = vadd.xlane.f32.xlu1 %v7136_v23  ;;  %v7318_v50 = vpop.xlane.xlu0 %7317 }
0x2e98   :  { %v7319_v7 = vmul.f32 0.041666668, %v7318_v50 }
0x2e9a   :  { %v7320_v24 = vsub.f32 %v7311_v43, %v7319_v7 }
0x2e9c   :  { %v7321_v61 = vmul.f32 %v7320_v24, %v7320_v24 }
0x2e9e   :  { %v7322_v41 = vsel %vm7128_vm14, %v7321_v61, 0.0 }
0x2e9f   :  { %7323 = vadd.xlane.f32.xlu0 %v7322_v41 }
0x2f24   :  { %v7138_v1 = vpop.xlane.xlu1 %7137 }
0x2f25   :  { %v7139_v46 = vmul.f32 0.041666668, %v7138_v1 }
0x2f27   :  { %v7140_v57 = vadd.f32 1e-05, %v7139_v46 }
0x2f29   :  { %10316 = vrsqrt.f32 %v7140_v57 }
0x2f2c   :  { %v7324_v14 = vpop.xlane.xlu0 %7323 }
0x2f2d   :  { %v7325_v63 = vmul.f32 0.041666668, %v7324_v14 }
0x2f2f   :  { %v7326_v3 = vadd.f32 1e-05, %v7325_v63 }
0x2f31   :  { %10318 = vrsqrt.f32 %v7326_v3 }
0x2f33   :  { %v10317_v44 = vpop.eup %10316 }
0x2f34   :  { %v7142_v19 = vmul.f32 %v10317_v44, %v7134_v34 }
0x2f36   :  { %v7147_v51 = vmul.f32 %v7965_v47, %v7142_v19 }
0x2f38   :  { %v7152_v62 = vadd.f32 %v7966_v13, %v7147_v51 }
0x2f3a   :  { %v7153_v8 = vmax.f32 %v7152_v62, 0.0 }
0x2f3b   :  { %v10319_v4 = vpop.eup %10318 }
0x2f3c   :  { %v7328_v16 = vmul.f32 %v10319_v4, %v7320_v24  ;;  %9759 = vmatmul.mubr.msk.f32.vlgmr.msra.gmra.mrb[12].mxu1 %vm7128_vm14, %v7153_v8 }
0x2f3d   :  { %10113 = vmatpush3.bf16.msra.mxu1 %v10112_v25  ;;  %9778 = vmatprep.mubr.msk.f32.mxu1 %vm10387_vm0, %v10386_v0 }
0x2f3e   :  { %v7333_v30 = vmul.f32 %v7971_v21, %v7328_v16  ;;  %9776 = vmatprep.subr.mxu1 %v10386_v0 }
0x2f40   :  { %v7338_v31 = vadd.f32 %v7972_v27, %v7333_v30 }
0x2f41   :  { %9777 = vmatpush3.msra.mxu1 %v7342_v11 }
0x2f42   :  { %v7339_v53 = vmax.f32 %v7338_v31, 0.0  ;;  %9781 = vmatprep.subr.mxu1 %v10386_v0 }
0x2f44   :  { %9779 = vmatmul.mubr.msk.f32.vlgmr.msra.gmra.mrb[14].mxu1 %vm7128_vm14, %v7339_v53 }
0x2f45   :  { %9783 = vmatprep.mubr.msk.f32.mxu1 %vm10387_vm0, %v10386_v0 }
0x300f   :  { %v7231_v33 = vpop.f32.mrb[12].mxu1 }
0x3010   :  { %v9760_v32 = vpop.f32.mrb[13].mxu1  ;;  %v7232_v59 = vadd.f32 %v7967_v12, %v7231_v33 }
0x3012   :  { %v7499_v22 = vrot.slane %v7232_v59, 4 }
0x3017   :  { %v7417_v5 = vpop.f32.mrb[14].mxu1 }
0x3018   :  { %v7418_v2 = vadd.f32 %v7973_v20, %v7417_v5  ;;  %v9780_v6 = vpop.f32.mrb[15].mxu1 }
0x301a   :  { %v7500_v10 = vrot.slane %v7418_v2, 4  ;;  %9782 = vmatpush3.xpose.msk.msra.mxu1 %vm123_vm3, %v7418_v2 }
0x301c   :  { %9787 = vmatpush3.xpose.msk.msra.mxu0 %vm123_vm3, %v7500_v10 }
0x301d   :  { %9784 = vmatmul.mubr.msk.f32.vlgmr.msra.gmra.mrb[16].mxu1 %vm123_vm3, %v7232_v59 }
0x301f   :  { %9789 = vmatmul.mubr.msk.f32.vlgmr.msra.gmra.mrb[18].mxu0 %vm123_vm3, %v7499_v22 }
0x30f0   :  { %v7493_v0 = vpop.f32.mrb[16].mxu1 }
0x30f1   :  { %7498 = vst.msk [vmem:[#allocation5] sm:$0xf] %vm7497_vm15, %v7493_v0  ;;  %v9785_v38 = vpop.f32.mrb[17].mxu1 }
0x30f2   :  { %v7571_v40 = vpop.f32.mrb[18].mxu0 }
0x30f3   :  { %7575 = vst.msk [vmem:[#allocation5 + $0x4] sm:$0xf] %vm7497_vm15, %v7571_v40  ;;  %v9790_v17 = vpop.f32.mrb[19].mxu0 }
0x30f4   :  { %10368 = shalt.err (!%p10365_p12)
}
0x30f5   :  { %s10369_s17 = scalar_lea.hbm %s12071_s3, 128 }
0x30f6   :  { %p10370_p13 = scmp.ne.s32.totalorder %s12071_s3, %s10369_s17  ;;  %p10373_p0 = scmp.lt.u32.totalorder %s10369_s17, %s12071_s3 }
0x30f8   :  { %p10375_p1 = pnand %p10373_p0, %p10370_p13 }
0x30fa   :  { %10378 = shalt.err (!%p10375_p1)
}
0x30fb   :  { %7585 = dma.vmem_to_hbm [thread:$0]  %s7583_s13, 128, %s12071_s3, [#allocation4]  }
0x30fc   :  { %10381 = dma.done.wait [#allocation4], 128  }
0x30fd   :  { %10382 = vsyncadd [#allocation4], 4294967168 }
0x30fe   :  { %7593 = vsyncpa [#allocation3], 1 }
0x30ff   :  { %7594 = vsyncpa [#allocation4], 1 }

</bundles_post_ra>
